<compile_context>
chip_gen: v6e
topology: v6e:2x2x1
jax: 0.10.0
libtpu: 0.0.40
codegen_flags: <defaults>
</compile_context>

<pallas_src>
import functools

import jax
import jax.numpy as jnp
from jax import lax
from jax.experimental import pallas as pl
from jax.experimental.pallas import tpu as pltpu


def _round_up(x, m):
    return -(-x // m) * m


# ----------------------------------------------------------------------------
# Generic row-tiled Linear (used for the fused fwd|bwd LSTM gate projection)
# ----------------------------------------------------------------------------
def _linear_kernel(x_ref, w_ref, b_ref, o_ref):
    y = jnp.dot(x_ref[...], w_ref[...], preferred_element_type=jnp.float32)
    o_ref[...] = (y + b_ref[...]).astype(o_ref.dtype)


def linear(x, w, b, row_tile=512):
    """x: (N, D), w: (D, O), b: (1, O) -> (N, O).

    Row-tiled over N: HBM<->VMEM transfers are double-buffered by the
    BlockSpec pipeline and the grid axis is "parallel" (dual-TC sharding)."""
    N, D = x.shape
    O = w.shape[1]
    t = min(row_tile, N)
    Np = -(-N // t) * t
    xp = jnp.pad(x, ((0, Np - N), (0, 0))) if Np != N else x
    out = pl.pallas_call(
        _linear_kernel,
        out_shape=jax.ShapeDtypeStruct((Np, O), jnp.float32),
        grid=(Np // t,),
        in_specs=[pl.BlockSpec((t, D), lambda i: (i, 0)),
                  pl.BlockSpec((D, O), lambda i: (0, 0)),
                  pl.BlockSpec((1, O), lambda i: (0, 0))],
        out_specs=pl.BlockSpec((t, O), lambda i: (i, 0)),
        compiler_params=pltpu.CompilerParams(
            dimension_semantics=("parallel",)),
    )(xp, w, b)
    return out[:N] if Np != N else out


# ----------------------------------------------------------------------------
# Char CNN: Conv1d(padding=K-1) + max-over-time + tanh as one matmul per tile
# ----------------------------------------------------------------------------
def _char_conv_kernel(x_ref, w_ref, b_ref, o_ref, *, T_out, F):
    # one MXU matmul computes every conv window (block-Toeplitz weight),
    # then a lane-sliced max-over-time + bias + tanh on the VPU.
    y = jnp.dot(x_ref[...], w_ref[...], preferred_element_type=jnp.float32)
    m = y[:, 0:F]
    for t in range(1, T_out):                        # static unroll, tiny
        m = jnp.maximum(m, y[:, t * F:(t + 1) * F])
    # conv bias is constant per filter -> max-then-bias == bias-then-max
    o_ref[...] = jnp.tanh(m + b_ref[...])


def char_cnn(char_emb, conv_w, conv_b, row_tile=256):
    """char_emb: (N, C, Dc), conv_w: (K, Dc, F), conv_b: (1, F) -> (N, F)."""
    N, C, Dc = char_emb.shape
    K, _, F = conv_w.shape
    T_pad = C + 2 * (K - 1)
    T_out = C + K - 1
    x = jnp.pad(char_emb, ((0, 0), (K - 1, K - 1), (0, 0))).reshape(N, T_pad * Dc)

    # dense block-Toeplitz expansion of the (tiny) conv weight, built once
    # in XLA: W2[(tau*Dc+c), (t*F+f)] = conv_w[tau-t, c, f] for 0<=tau-t<K
    w4 = jnp.zeros((T_pad, Dc, T_out, F), jnp.float32)
    for t in range(T_out):
        w4 = w4.at[t:t + K, :, t, :].set(conv_w)
    w2 = w4.reshape(T_pad * Dc, T_out * F)

    t_rows = min(row_tile, N)
    Np = -(-N // t_rows) * t_rows
    if Np != N:
        x = jnp.pad(x, ((0, Np - N), (0, 0)))
    out = pl.pallas_call(
        functools.partial(_char_conv_kernel, T_out=T_out, F=F),
        out_shape=jax.ShapeDtypeStruct((Np, F), jnp.float32),
        grid=(Np // t_rows,),
        in_specs=[pl.BlockSpec((t_rows, T_pad * Dc), lambda i: (i, 0)),
                  pl.BlockSpec((T_pad * Dc, T_out * F), lambda i: (0, 0)),
                  pl.BlockSpec((1, F), lambda i: (0, 0))],
        out_specs=pl.BlockSpec((t_rows, F), lambda i: (i, 0)),
        compiler_params=pltpu.CompilerParams(
            dimension_semantics=("parallel",)),
    )(x, w2, conv_b)
    return out[:N] if Np != N else out


# ----------------------------------------------------------------------------
# Bidirectional LSTM layer (eval-mode VarMaskedFastLSTM)
# ----------------------------------------------------------------------------
def _lstm_scan_kernel(g_ref, whh_ref, out_ref, *, L, H):
    """Both directions stepped together; output written pre-concatenated.

    g_ref:   (L, bB, 8H) precomputed x@W_ih + b; cols [0:4H]=fwd, [4H:8H]=bwd
    whh_ref: (2H, 8H) block-diagonal [whh_f 0; 0 whh_b]
    out_ref: (L, bB, 2H) -- fwd hidden in lanes [0:H], bwd in [H:2H]
    """
    whh = whh_ref[...]                               # hoisted out of the loop
    Bb = out_ref.shape[1]

    def split_gates(g4):
        # NOTE: with production H (>=128) these gate slices are vreg-aligned;
        # at H=32 they are sub-vreg slices (unavoidable without padding H).
        i = jax.nn.sigmoid(g4[:, 0:H])
        f = jax.nn.sigmoid(g4[:, H:2 * H])
        g = jnp.tanh(g4[:, 2 * H:3 * H])
        o = jax.nn.sigmoid(g4[:, 3 * H:4 * H])
        return i, f, g, o

    zeros = jnp.zeros((Bb, H), jnp.float32)

    def body(t, carry):
        hf, cf, hb, cb = carry
        tb = L - 1 - t
        gf_pre = g_ref[t][:, 0:4 * H]
        gb_pre = g_ref[tb][:, 4 * H:8 * H]
        # single block-diagonal recurrence matmul for both directions
        rec = jnp.dot(jnp.concatenate([hf, hb], axis=-1), whh,
                      preferred_element_type=jnp.float32)            # (Bb, 8H)
        i, f, g, o = split_gates(gf_pre + rec[:, 0:4 * H])
        cf = f * cf + i * g
        hf = o * jnp.tanh(cf)
        out_ref[t, :, 0:H] = hf
        i, f, g, o = split_gates(gb_pre + rec[:, 4 * H:8 * H])
        cb = f * cb + i * g
        hb = o * jnp.tanh(cb)
        out_ref[tb, :, H:2 * H] = hb
        return hf, cf, hb, cb

    # unrolling gives the scheduler visibility to overlap the independent
    # fwd/bwd cells and the per-step stores inside the serial recurrence.
    lax.fori_loop(0, L, body, (zeros, zeros, zeros, zeros),
                  unroll=True if L <= 16 else 4)


def lstm_bidir_layer(x_tm, lp):
    """x_tm: time-major (L, B, D) -> (L, B, 2H) (fwd|bwd pre-concatenated)."""
    L, B, D = x_tm.shape
    H = lp["whh_f"].shape[0]
    # TODO(synk): VarMaskedFastLSTM applies the sequence mask inside the
    # recurrence; this eval-mode kernel ignores mask/length (exact only for
    # mask=None / full-length batches).
    # fused fwd|bwd gate projection: one lane-dense (D, 8H) matmul
    wih = jnp.concatenate([lp["wih_f"], lp["wih_b"]], axis=1)         # (D, 8H)
    bih = jnp.concatenate([lp["b_f"], lp["b_b"]], axis=1)             # (1, 8H)
    g = linear(x_tm.reshape(L * B, D), wih, bih).reshape(L, B, 8 * H)

    z = jnp.zeros((H, 4 * H), jnp.float32)
    whh_bd = jnp.concatenate(
        [jnp.concatenate([lp["whh_f"], z], axis=1),
         jnp.concatenate([z, lp["whh_b"]], axis=1)], axis=0)          # (2H, 8H)

    bB = 8 if (B > 8 and B % 8 == 0) else B                            # batch tile
    out = pl.pallas_call(
        functools.partial(_lstm_scan_kernel, L=L, H=H),
        out_shape=jax.ShapeDtypeStruct((L, B, 2 * H), jnp.float32),
        grid=(B // bB,),
        in_specs=[pl.BlockSpec((L, bB, 8 * H), lambda i: (0, i, 0)),
                  pl.BlockSpec((2 * H, 8 * H), lambda i: (0, 0))],
        out_specs=pl.BlockSpec((L, bB, 2 * H), lambda i: (0, i, 0)),
        compiler_params=pltpu.CompilerParams(
            dimension_semantics=("parallel",),
            vmem_limit_bytes=32 * 1024 * 1024),
    )(g, whh_bd)
    # NOTE: at production (L, B, H) the gate tensor should be streamed per
    # time-chunk (manual double-buffer) instead of kept fully VMEM-resident.
    return out                                                         # (L, B, 2H)


# ----------------------------------------------------------------------------
# Fused head projections (ELU) + biaffine arc attention (+ mask), per batch
# ----------------------------------------------------------------------------
def _heads_biaffine_kernel(*refs, Ap, T, Tp, use_mask):
    if use_mask:
        (x_ref, w_ref, b_ref, u_ref, md_ref, me_ref,
         arc_ref, th_ref, tc_ref) = refs
    else:
        x_ref, w_ref, b_ref, u_ref, arc_ref, th_ref, tc_ref = refs

    # one lane-dense head matmul; padded columns have zero weight & bias so
    # ELU(0)=0 keeps the padding exact; the "ones" columns use bias 1 (ELU(1)=1).
    h = jnp.dot(x_ref[0], w_ref[...], preferred_element_type=jnp.float32)
    h = h + b_ref[...]
    h = jnp.where(h > 0, h, jnp.exp(jnp.minimum(h, 0.0)) - 1.0)        # ELU

    arc_h = h[:, 0:Ap]                      # [arc_h | 1 | 0...]   (vreg-aligned)
    arc_c = h[:, Ap:2 * Ap]                 # [arc_c | 1 | 0...]
    th_ref[0] = h[:, 2 * Ap:2 * Ap + T]
    tc_ref[0] = h[:, 2 * Ap + Tp:2 * Ap + Tp + T]

    # augmented bilinear: h_aug @ U_aug @ c_aug^T == h U c^T + h w_d + w_e c^T + b
    hu = jnp.dot(arc_h, u_ref[...], preferred_element_type=jnp.float32)
    s = lax.dot_general(hu, arc_c, (((1,), (1,)), ((), ())),
                        preferred_element_type=jnp.float32)            # (L, L)
    if use_mask:
        s = s * md_ref[0] * me_ref[0]       # mask fused: no HBM round-trip
    arc_ref[0] = s


def heads_and_biaffine(out_bm, W, b, U_aug, T, Ap, Tp, mask=None):
    """out_bm: (B, L, 2H) -> out_arc (B,L,L), type_h (B,L,T), type_c (B,L,T)."""
    B, L, D2 = out_bm.shape
    Wtot = W.shape[1]
    use_mask = mask is not None

    in_specs = [pl.BlockSpec((1, L, D2), lambda i: (i, 0, 0)),
                pl.BlockSpec((D2, Wtot), lambda i: (0, 0)),
                pl.BlockSpec((1, Wtot), lambda i: (0, 0)),
                pl.BlockSpec((Ap, Ap), lambda i: (0, 0))]
    args = [out_bm, W, b, U_aug]
    if use_mask:
        m = mask.astype(jnp.float32)
        in_specs += [pl.BlockSpec((1, L, 1), lambda i: (i, 0, 0)),
                     pl.BlockSpec((1, 1, L), lambda i: (i, 0, 0))]
        args += [m[:, :, None], m[:, None, :]]

    out_shapes = (jax.ShapeDtypeStruct((B, L, L), jnp.float32),
                  jax.ShapeDtypeStruct((B, L, T), jnp.float32),
                  jax.ShapeDtypeStruct((B, L, T), jnp.float32))
    out_specs = (pl.BlockSpec((1, L, L), lambda i: (i, 0, 0)),
                 pl.BlockSpec((1, L, T), lambda i: (i, 0, 0)),
                 pl.BlockSpec((1, L, T), lambda i: (i, 0, 0)))

    return pl.pallas_call(
        functools.partial(_heads_biaffine_kernel,
                          Ap=Ap, T=T, Tp=Tp, use_mask=use_mask),
        out_shape=out_shapes,
        grid=(B,),
        in_specs=in_specs,
        out_specs=out_specs,
        compiler_params=pltpu.CompilerParams(
            dimension_semantics=("parallel",)),
    )(*args)


# ----------------------------------------------------------------------------
# Weight re-packing helpers (tiny, done once per call in XLA)
# ----------------------------------------------------------------------------
def _fused_head_params(params):
    """One lane-dense fused head weight with 128-aligned segments:
    [arc_h | 1 | 0.. ][arc_c | 1 | 0.. ][type_h | 0.. ][type_c | 0.. ]
    The two bias-1 / zero-weight columns survive ELU exactly (ELU(1)=1) and
    provide the ones-columns of the augmented biaffine inputs for free."""
    A = params["arc_h_w"].shape[1]
    T = params["type_h_w"].shape[1]
    D = params["arc_h_w"].shape[0]
    Ap = _round_up(A + 1, 128)
    Tp = _round_up(T, 128)

    zc = lambda n: jnp.zeros((D, n), jnp.float32)
    zb = lambda n: jnp.zeros((1, n), jnp.float32)
    ones_w = jnp.zeros((D, 1), jnp.float32)
    W = jnp.concatenate(
        [params["arc_h_w"], ones_w, zc(Ap - A - 1),
         params["arc_c_w"], ones_w, zc(Ap - A - 1),
         params["type_h_w"], zc(Tp - T),
         params["type_c_w"], zc(Tp - T)], axis=1)
    b = jnp.concatenate(
        [params["arc_h_b"], jnp.ones((1, 1), jnp.float32), zb(Ap - A - 1),
         params["arc_c_b"], jnp.ones((1, 1), jnp.float32), zb(Ap - A - 1),
         params["type_h_b"], zb(Tp - T),
         params["type_c_b"], zb(Tp - T)], axis=1)
    return W, b, A, T, Ap, Tp


def _augmented_u(params, Ap):
    """Zero-padded U_aug with [[U, w_d], [w_e, b]] in the top-left (A+1, A+1)."""
    A = params["U"].shape[0]
    u = jnp.zeros((Ap, Ap), jnp.float32)
    u = u.at[:A, :A].set(params["U"])
    u = u.at[:A, A:A + 1].set(params["w_d"])
    u = u.at[A:A + 1, :A].set(params["w_e"])
    u = u.at[A, A].set(params["att_b"][0, 0])
    return u


# ----------------------------------------------------------------------------
# Model forward
# ----------------------------------------------------------------------------
def forward(params, input_word, input_char, input_pos, mask=None, length=None):
    # embedding lookups: data-dependent gathers, kept in plain JAX/XLA
    word = jnp.take(params["word_emb"], input_word, axis=0)           # (B, L, Dw)
    char = jnp.take(params["char_emb"], input_char, axis=0)           # (B, L, C, Dc)
    pos = jnp.take(params["pos_emb"], input_pos, axis=0)              # (B, L, Dp)

    B, L, C, Dc = char.shape
    char_feat = char_cnn(char.reshape(B * L, C, Dc),
                         params["conv_w"], params["conv_b"]).reshape(B, L, -1)

    # dropout_in / dropout_out: identity in eval mode
    enc_in = jnp.concatenate([word, char_feat, pos], axis=2)          # (B, L, dim_enc)

    # time-major so the (much larger) gate tensors never get transposed in XLA
    out = enc_in.transpose(1, 0, 2)                                   # (L, B, D)
    for lp in params["lstm"]:                                         # biLSTM stack
        out = lstm_bidir_layer(out, lp)                               # (L, B, 2H)
    out_bm = out.transpose(1, 0, 2)                                   # (B, L, 2H)

    # fused: head projections + ELU + biaffine arc attention (+ mask)
    W_heads, b_heads, A, T, Ap, Tp = _fused_head_params(params)
    U_aug = _augmented_u(params, Ap)
    out_arc, type_h, type_c = heads_and_biaffine(
        out_bm, W_heads, b_heads, U_aug, T, Ap, Tp, mask)
    # BiAAttention(arc_h, arc_c, mask, mask).squeeze(1), num_labels == 1
    return out_arc, (type_h, type_c), mask, length


# ----------------------------------------------------------------------------
# Deterministic synthetic parameters (shapes follow the module's __init__)
# ----------------------------------------------------------------------------
def init_params(key):
    cfg = dict(num_words=100, word_dim=16, num_chars=50, char_dim=8,
               num_pos=20, pos_dim=8, num_filters=16, kernel_size=3,
               hidden_size=32, num_layers=1, arc_space=32, type_space=16)
    keys = iter(jax.random.split(key, 32))

    def nrm(shape, scale=0.1):
        return scale * jax.random.normal(next(keys), shape, dtype=jnp.float32)

    H = cfg["hidden_size"]
    dim_enc = cfg["word_dim"] + cfg["num_filters"] + cfg["pos_dim"]
    enc_out = 2 * H
    params = dict(
        word_emb=nrm((cfg["num_words"], cfg["word_dim"])),
        char_emb=nrm((cfg["num_chars"], cfg["char_dim"])),
        pos_emb=nrm((cfg["num_pos"], cfg["pos_dim"])),
        conv_w=nrm((cfg["kernel_size"], cfg["char_dim"], cfg["num_filters"])),
        conv_b=nrm((1, cfg["num_filters"])),
        # NOTE: b_f / b_b correspond to PyTorch's (b_ih + b_hh) pre-summed.
        lstm=[dict(
            wih_f=nrm((dim_enc, 4 * H)), whh_f=nrm((H, 4 * H)), b_f=nrm((1, 4 * H)),
            wih_b=nrm((dim_enc, 4 * H)), whh_b=nrm((H, 4 * H)), b_b=nrm((1, 4 * H)),
        )],
        arc_h_w=nrm((enc_out, cfg["arc_space"])), arc_h_b=nrm((1, cfg["arc_space"])),
        arc_c_w=nrm((enc_out, cfg["arc_space"])), arc_c_b=nrm((1, cfg["arc_space"])),
        type_h_w=nrm((enc_out, cfg["type_space"])), type_h_b=nrm((1, cfg["type_space"])),
        type_c_w=nrm((enc_out, cfg["type_space"])), type_c_b=nrm((1, cfg["type_space"])),
        U=nrm((cfg["arc_space"], cfg["arc_space"])),
        w_d=nrm((cfg["arc_space"], 1)),
        w_e=nrm((1, cfg["arc_space"])),
        att_b=nrm((1, 1)),
    )
    return cfg, params


if __name__ == "__main__":
    key = jax.random.PRNGKey(0)
    pkey, k1, k2, k3 = jax.random.split(key, 4)
    cfg, params = init_params(pkey)

    B, L, C = 2, 8, 8
    input_word = jax.random.randint(k1, (B, L), 0, cfg["num_words"], dtype=jnp.int32)
    input_char = jax.random.randint(k2, (B, L, C), 0, cfg["num_chars"], dtype=jnp.int32)
    input_pos = jax.random.randint(k3, (B, L), 0, cfg["num_pos"], dtype=jnp.int32)

    fwd = jax.jit(forward)
    out_arc, (type_h, type_c), mask, length = fwd(
        params, input_word, input_char, input_pos)
    jax.block_until_ready((out_arc, type_h, type_c))

    assert out_arc.shape == (B, L, L)
    assert type_h.shape == (B, L, cfg["type_space"])
    assert type_c.shape == (B, L, cfg["type_space"])
    print("KERNEL_OK")
</pallas_src>

<mosaic_0001>
module attributes {stable_mosaic.version = 11 : i64} {
  func.func @_char_conv_kernel(%arg0: i32, %arg1: memref<16x96xf32, #tpu.memory_space<vmem>>, %arg2: memref<96x160xf32, #tpu.memory_space<vmem>>, %arg3: memref<1x16xf32, #tpu.memory_space<vmem>>, %arg4: memref<16x16xf32, #tpu.memory_space<vmem>>) attributes {dimension_semantics = [#tpu.dimension_semantics<parallel>], iteration_bounds = array<i64: 1>, scalar_prefetch = 0 : i64, scratch_operands = 0 : i64, tpu.core_type = #tpu.core_type<tc>, window_params = [{transform_indices = @transform_0, window_bounds = array<i64: 16, 96>}, {pipeline_mode = #tpu.pipeline_mode<synchronous>, transform_indices = @transform_1, window_bounds = array<i64: 96, 160>}, {pipeline_mode = #tpu.pipeline_mode<synchronous>, transform_indices = @transform_2, window_bounds = array<i64: 1, 16>}, {transform_indices = @transform_3, window_bounds = array<i64: 16, 16>}]} {
    %c0 = arith.constant 0 : index
    %c0_0 = arith.constant 0 : index
    %0 = vector.load %arg1[%c0, %c0_0] : memref<16x96xf32, #tpu.memory_space<vmem>>, vector<16x96xf32>
    %c0_1 = arith.constant 0 : index
    %c0_2 = arith.constant 0 : index
    %1 = vector.load %arg2[%c0_1, %c0_2] : memref<96x160xf32, #tpu.memory_space<vmem>>, vector<96x160xf32>
    %cst = arith.constant dense<0.000000e+00> : vector<16x160xf32>
    %2 = tpu.matmul %0, %1, %cst {dimension_numbers = #tpu.dot_dimension_numbers<[1], [0], [0], [1], [0, 0, 1, 1], [], []>} : vector<16x96xf32>, vector<96x160xf32>, vector<16x160xf32> -> vector<16x160xf32>
    %3 = vector.extract_strided_slice %2 {offsets = [0, 0], sizes = [16, 16], strides = [1, 1]} : vector<16x160xf32> to vector<16x16xf32>
    %4 = vector.extract_strided_slice %2 {offsets = [0, 16], sizes = [16, 16], strides = [1, 1]} : vector<16x160xf32> to vector<16x16xf32>
    %5 = arith.maximumf %3, %4 : vector<16x16xf32>
    %6 = vector.extract_strided_slice %2 {offsets = [0, 32], sizes = [16, 16], strides = [1, 1]} : vector<16x160xf32> to vector<16x16xf32>
    %7 = arith.maximumf %5, %6 : vector<16x16xf32>
    %8 = vector.extract_strided_slice %2 {offsets = [0, 48], sizes = [16, 16], strides = [1, 1]} : vector<16x160xf32> to vector<16x16xf32>
    %9 = arith.maximumf %7, %8 : vector<16x16xf32>
    %10 = vector.extract_strided_slice %2 {offsets = [0, 64], sizes = [16, 16], strides = [1, 1]} : vector<16x160xf32> to vector<16x16xf32>
    %11 = arith.maximumf %9, %10 : vector<16x16xf32>
    %12 = vector.extract_strided_slice %2 {offsets = [0, 80], sizes = [16, 16], strides = [1, 1]} : vector<16x160xf32> to vector<16x16xf32>
    %13 = arith.maximumf %11, %12 : vector<16x16xf32>
    %14 = vector.extract_strided_slice %2 {offsets = [0, 96], sizes = [16, 16], strides = [1, 1]} : vector<16x160xf32> to vector<16x16xf32>
    %15 = arith.maximumf %13, %14 : vector<16x16xf32>
    %16 = vector.extract_strided_slice %2 {offsets = [0, 112], sizes = [16, 16], strides = [1, 1]} : vector<16x160xf32> to vector<16x16xf32>
    %17 = arith.maximumf %15, %16 : vector<16x16xf32>
    %18 = vector.extract_strided_slice %2 {offsets = [0, 128], sizes = [16, 16], strides = [1, 1]} : vector<16x160xf32> to vector<16x16xf32>
    %19 = arith.maximumf %17, %18 : vector<16x16xf32>
    %20 = vector.extract_strided_slice %2 {offsets = [0, 144], sizes = [16, 16], strides = [1, 1]} : vector<16x160xf32> to vector<16x16xf32>
    %21 = arith.maximumf %19, %20 : vector<16x16xf32>
    %c0_3 = arith.constant 0 : index
    %c0_4 = arith.constant 0 : index
    %22 = vector.load %arg3[%c0_3, %c0_4] : memref<1x16xf32, #tpu.memory_space<vmem>>, vector<1x16xf32>
    %23 = vector.broadcast %22 : vector<1x16xf32> to vector<16x16xf32>
    %24 = arith.addf %21, %23 : vector<16x16xf32>
    %25 = math.tanh %24 : vector<16x16xf32>
    %c0_5 = arith.constant 0 : index
    %c0_6 = arith.constant 0 : index
    %26 = vector.load %arg4[%c0_5, %c0_6] : memref<16x16xf32, #tpu.memory_space<vmem>>, vector<16x16xf32>
    tpu.vector_store %arg4[%c0_5, %c0_6], %25 {strides = array<i32>} : memref<16x16xf32, #tpu.memory_space<vmem>>, vector<16x16xf32>,
    return
  }
  func.func @transform_0(%arg0: i32) -> (i32, i32) {
    %c0_i32 = arith.constant 0 : i32
    %c0_i32_0 = arith.constant 0 : i32
    return %arg0, %c0_i32 : i32, i32
  }
  func.func @transform_1(%arg0: i32) -> (i32, i32) {
    %c0_i32 = arith.constant 0 : i32
    %c0_i32_0 = arith.constant 0 : i32
    %c0_i32_1 = arith.constant 0 : i32
    return %c0_i32, %c0_i32_0 : i32, i32
  }
  func.func @transform_2(%arg0: i32) -> (i32, i32) {
    %c0_i32 = arith.constant 0 : i32
    %c0_i32_0 = arith.constant 0 : i32
    %c0_i32_1 = arith.constant 0 : i32
    return %c0_i32, %c0_i32_0 : i32, i32
  }
  func.func @transform_3(%arg0: i32) -> (i32, i32) {
    %c0_i32 = arith.constant 0 : i32
    %c0_i32_0 = arith.constant 0 : i32
    return %arg0, %c0_i32 : i32, i32
  }
}

module attributes {stable_mosaic.version = 11 : i64} {
  func.func @_linear_kernel(%arg0: i32, %arg1: memref<16x40xf32, #tpu.memory_space<vmem>>, %arg2: memref<40x256xf32, #tpu.memory_space<vmem>>, %arg3: memref<1x256xf32, #tpu.memory_space<vmem>>, %arg4: memref<16x256xf32, #tpu.memory_space<vmem>>) attributes {dimension_semantics = [#tpu.dimension_semantics<parallel>], iteration_bounds = array<i64: 1>, scalar_prefetch = 0 : i64, scratch_operands = 0 : i64, tpu.core_type = #tpu.core_type<tc>, window_params = [{transform_indices = @transform_0, window_bounds = array<i64: 16, 40>}, {pipeline_mode = #tpu.pipeline_mode<synchronous>, transform_indices = @transform_1, window_bounds = array<i64: 40, 256>}, {pipeline_mode = #tpu.pipeline_mode<synchronous>, transform_indices = @transform_2, window_bounds = array<i64: 1, 256>}, {transform_indices = @transform_3, window_bounds = array<i64: 16, 256>}]} {
    %c0 = arith.constant 0 : index
    %c0_0 = arith.constant 0 : index
    %0 = vector.load %arg1[%c0, %c0_0] : memref<16x40xf32, #tpu.memory_space<vmem>>, vector<16x40xf32>
    %c0_1 = arith.constant 0 : index
    %c0_2 = arith.constant 0 : index
    %1 = vector.load %arg2[%c0_1, %c0_2] : memref<40x256xf32, #tpu.memory_space<vmem>>, vector<40x256xf32>
    %cst = arith.constant dense<0.000000e+00> : vector<16x256xf32>
    %2 = tpu.matmul %0, %1, %cst {dimension_numbers = #tpu.dot_dimension_numbers<[1], [0], [0], [1], [0, 0, 1, 1], [], []>} : vector<16x40xf32>, vector<40x256xf32>, vector<16x256xf32> -> vector<16x256xf32>
    %c0_3 = arith.constant 0 : index
    %c0_4 = arith.constant 0 : index
    %3 = vector.load %arg3[%c0_3, %c0_4] : memref<1x256xf32, #tpu.memory_space<vmem>>, vector<1x256xf32>
    %4 = vector.broadcast %3 : vector<1x256xf32> to vector<16x256xf32>
    %5 = arith.addf %2, %4 : vector<16x256xf32>
    %c0_5 = arith.constant 0 : index
    %c0_6 = arith.constant 0 : index
    %6 = vector.load %arg4[%c0_5, %c0_6] : memref<16x256xf32, #tpu.memory_space<vmem>>, vector<16x256xf32>
    tpu.vector_store %arg4[%c0_5, %c0_6], %5 {strides = array<i32>} : memref<16x256xf32, #tpu.memory_space<vmem>>, vector<16x256xf32>,
    return
  }
  func.func @transform_0(%arg0: i32) -> (i32, i32) {
    %c0_i32 = arith.constant 0 : i32
    %c0_i32_0 = arith.constant 0 : i32
    return %arg0, %c0_i32 : i32, i32
  }
  func.func @transform_1(%arg0: i32) -> (i32, i32) {
    %c0_i32 = arith.constant 0 : i32
    %c0_i32_0 = arith.constant 0 : i32
    %c0_i32_1 = arith.constant 0 : i32
    return %c0_i32, %c0_i32_0 : i32, i32
  }
  func.func @transform_2(%arg0: i32) -> (i32, i32) {
    %c0_i32 = arith.constant 0 : i32
    %c0_i32_0 = arith.constant 0 : i32
    %c0_i32_1 = arith.constant 0 : i32
    return %c0_i32, %c0_i32_0 : i32, i32
  }
  func.func @transform_3(%arg0: i32) -> (i32, i32) {
    %c0_i32 = arith.constant 0 : i32
    %c0_i32_0 = arith.constant 0 : i32
    return %arg0, %c0_i32 : i32, i32
  }
}

module attributes {stable_mosaic.version = 11 : i64} {
  func.func @_lstm_scan_kernel(%arg0: i32, %arg1: memref<8x2x256xf32, #tpu.memory_space<vmem>>, %arg2: memref<64x256xf32, #tpu.memory_space<vmem>>, %arg3: memref<8x2x64xf32, #tpu.memory_space<vmem>>) attributes {dimension_semantics = [#tpu.dimension_semantics<parallel>], iteration_bounds = array<i64: 1>, scalar_prefetch = 0 : i64, scratch_operands = 0 : i64, tpu.core_type = #tpu.core_type<tc>, window_params = [{transform_indices = @transform_0, window_bounds = array<i64: 8, 2, 256>}, {pipeline_mode = #tpu.pipeline_mode<synchronous>, transform_indices = @transform_1, window_bounds = array<i64: 64, 256>}, {transform_indices = @transform_2, window_bounds = array<i64: 8, 2, 64>}]} {
    %c0 = arith.constant 0 : index
    %c0_0 = arith.constant 0 : index
    %0 = vector.load %arg2[%c0, %c0_0] : memref<64x256xf32, #tpu.memory_space<vmem>>, vector<64x256xf32>
    %cst = arith.constant 0.000000e+00 : f32
    %1 = vector.broadcast %cst : f32 to vector<2x32xf32>
    %c0_i32 = arith.constant 0 : i32
    %c7_i32 = arith.constant 7 : i32
    %2 = arith.subi %c7_i32, %c0_i32 : i32
    %3 = arith.index_cast %c0_i32 : i32 to index
    %c0_1 = arith.constant 0 : index
    %c0_2 = arith.constant 0 : index
    %4 = vector.load %arg1[%3, %c0_1, %c0_2] : memref<8x2x256xf32, #tpu.memory_space<vmem>>, vector<1x2x256xf32>
    %5 = vector.shape_cast %4 : vector<1x2x256xf32> to vector<2x256xf32>
    %6 = vector.extract_strided_slice %5 {offsets = [0, 0], sizes = [2, 128], strides = [1, 1]} : vector<2x256xf32> to vector<2x128xf32>
    %7 = arith.index_cast %2 : i32 to index
    %c0_3 = arith.constant 0 : index
    %c0_4 = arith.constant 0 : index
    %8 = vector.load %arg1[%7, %c0_3, %c0_4] : memref<8x2x256xf32, #tpu.memory_space<vmem>>, vector<1x2x256xf32>
    %9 = vector.shape_cast %8 : vector<1x2x256xf32> to vector<2x256xf32>
    %10 = vector.extract_strided_slice %9 {offsets = [0, 128], sizes = [2, 128], strides = [1, 1]} : vector<2x256xf32> to vector<2x128xf32>
    %11 = tpu.concatenate %1, %1 in 1 : vector<2x32xf32>, vector<2x32xf32> -> vector<2x64xf32>
    %cst_5 = arith.constant dense<0.000000e+00> : vector<2x256xf32>
    %12 = tpu.matmul %11, %0, %cst_5 {dimension_numbers = #tpu.dot_dimension_numbers<[1], [0], [0], [1], [0, 0, 1, 1], [], []>} : vector<2x64xf32>, vector<64x256xf32>, vector<2x256xf32> -> vector<2x256xf32>
    %13 = vector.extract_strided_slice %12 {offsets = [0, 0], sizes = [2, 128], strides = [1, 1]} : vector<2x256xf32> to vector<2x128xf32>
    %14 = arith.addf %6, %13 : vector<2x128xf32>
    %15 = vector.extract_strided_slice %14 {offsets = [0, 0], sizes = [2, 32], strides = [1, 1]} : vector<2x128xf32> to vector<2x32xf32>
    %16 = arith.negf %15 : vector<2x32xf32>
    %17 = math.exp %16 : vector<2x32xf32>
    %cst_6 = arith.constant 1.000000e+00 : f32
    %18 = vector.broadcast %cst_6 : f32 to vector<2x32xf32>
    %19 = arith.addf %18, %17 : vector<2x32xf32>
    %20 = arith.divf %18, %19 : vector<2x32xf32>
    %21 = vector.extract_strided_slice %14 {offsets = [0, 32], sizes = [2, 32], strides = [1, 1]} : vector<2x128xf32> to vector<2x32xf32>
    %22 = arith.negf %21 : vector<2x32xf32>
    %23 = math.exp %22 : vector<2x32xf32>
    %cst_7 = arith.constant 1.000000e+00 : f32
    %24 = vector.broadcast %cst_7 : f32 to vector<2x32xf32>
    %25 = arith.addf %24, %23 : vector<2x32xf32>
    %26 = arith.divf %24, %25 : vector<2x32xf32>
    %27 = vector.extract_strided_slice %14 {offsets = [0, 64], sizes = [2, 32], strides = [1, 1]} : vector<2x128xf32> to vector<2x32xf32>
    %28 = math.tanh %27 : vector<2x32xf32>
    %29 = vector.extract_strided_slice %14 {offsets = [0, 96], sizes = [2, 32], strides = [1, 1]} : vector<2x128xf32> to vector<2x32xf32>
    %30 = arith.negf %29 : vector<2x32xf32>
    %31 = math.exp %30 : vector<2x32xf32>
    %cst_8 = arith.constant 1.000000e+00 : f32
    %32 = vector.broadcast %cst_8 : f32 to vector<2x32xf32>
    %33 = arith.addf %32, %31 : vector<2x32xf32>
    %34 = arith.divf %32, %33 : vector<2x32xf32>
    %35 = arith.mulf %26, %1 : vector<2x32xf32>
    %36 = arith.mulf %20, %28 : vector<2x32xf32>
    %37 = arith.addf %35, %36 : vector<2x32xf32>
    %38 = math.tanh %37 : vector<2x32xf32>
    %39 = arith.mulf %34, %38 : vector<2x32xf32>
    %40 = arith.index_cast %c0_i32 : i32 to index
    %c0_9 = arith.constant 0 : index
    %c0_10 = arith.constant 0 : index
    %41 = vector.load %arg3[%40, %c0_9, %c0_10] : memref<8x2x64xf32, #tpu.memory_space<vmem>>, vector<1x2x32xf32>
    %42 = vector.shape_cast %41 : vector<1x2x32xf32> to vector<2x32xf32>
    %43 = vector.shape_cast %39 : vector<2x32xf32> to vector<1x2x32xf32>
    tpu.vector_store %arg3[%40, %c0_9, %c0_10], %43 {strides = array<i32>} : memref<8x2x64xf32, #tpu.memory_space<vmem>>, vector<1x2x32xf32>,
    %44 = vector.extract_strided_slice %12 {offsets = [0, 128], sizes = [2, 128], strides = [1, 1]} : vector<2x256xf32> to vector<2x128xf32>
    %45 = arith.addf %10, %44 : vector<2x128xf32>
    %46 = vector.extract_strided_slice %45 {offsets = [0, 0], sizes = [2, 32], strides = [1, 1]} : vector<2x128xf32> to vector<2x32xf32>
    %47 = arith.negf %46 : vector<2x32xf32>
    %48 = math.exp %47 : vector<2x32xf32>
    %cst_11 = arith.constant 1.000000e+00 : f32
    %49 = vector.broadcast %cst_11 : f32 to vector<2x32xf32>
    %50 = arith.addf %49, %48 : vector<2x32xf32>
    %51 = arith.divf %49, %50 : vector<2x32xf32>
    %52 = vector.extract_strided_slice %45 {offsets = [0, 32], sizes = [2, 32], strides = [1, 1]} : vector<2x128xf32> to vector<2x32xf32>
    %53 = arith.negf %52 : vector<2x32xf32>
    %54 = math.exp %53 : vector<2x32xf32>
    %cst_12 = arith.constant 1.000000e+00 : f32
    %55 = vector.broadcast %cst_12 : f32 to vector<2x32xf32>
    %56 = arith.addf %55, %54 : vector<2x32xf32>
    %57 = arith.divf %55, %56 : vector<2x32xf32>
    %58 = vector.extract_strided_slice %45 {offsets = [0, 64], sizes = [2, 32], strides = [1, 1]} : vector<2x128xf32> to vector<2x32xf32>
    %59 = math.tanh %58 : vector<2x32xf32>
    %60 = vector.extract_strided_slice %45 {offsets = [0, 96], sizes = [2, 32], strides = [1, 1]} : vector<2x128xf32> to vector<2x32xf32>
    %61 = arith.negf %60 : vector<2x32xf32>
    %62 = math.exp %61 : vector<2x32xf32>
    %cst_13 = arith.constant 1.000000e+00 : f32
    %63 = vector.broadcast %cst_13 : f32 to vector<2x32xf32>
    %64 = arith.addf %63, %62 : vector<2x32xf32>
    %65 = arith.divf %63, %64 : vector<2x32xf32>
    %66 = arith.mulf %57, %1 : vector<2x32xf32>
    %67 = arith.mulf %51, %59 : vector<2x32xf32>
    %68 = arith.addf %66, %67 : vector<2x32xf32>
    %69 = math.tanh %68 : vector<2x32xf32>
    %70 = arith.mulf %65, %69 : vector<2x32xf32>
    %71 = arith.index_cast %2 : i32 to index
    %c0_14 = arith.constant 0 : index
    %c32 = arith.constant 32 : index
    %72 = vector.load %arg3[%71, %c0_14, %c32] : memref<8x2x64xf32, #tpu.memory_space<vmem>>, vector<1x2x32xf32>
    %73 = vector.shape_cast %72 : vector<1x2x32xf32> to vector<2x32xf32>
    %74 = vector.shape_cast %70 : vector<2x32xf32> to vector<1x2x32xf32>
    tpu.vector_store %arg3[%71, %c0_14, %c32], %74 {strides = array<i32>} : memref<8x2x64xf32, #tpu.memory_space<vmem>>, vector<1x2x32xf32>,
    %c1_i32 = arith.constant 1 : i32
    %c7_i32_15 = arith.constant 7 : i32
    %75 = arith.subi %c7_i32_15, %c1_i32 : i32
    %76 = arith.index_cast %c1_i32 : i32 to index
    %c0_16 = arith.constant 0 : index
    %c0_17 = arith.constant 0 : index
    %77 = vector.load %arg1[%76, %c0_16, %c0_17] : memref<8x2x256xf32, #tpu.memory_space<vmem>>, vector<1x2x256xf32>
    %78 = vector.shape_cast %77 : vector<1x2x256xf32> to vector<2x256xf32>
    %79 = vector.extract_strided_slice %78 {offsets = [0, 0], sizes = [2, 128], strides = [1, 1]} : vector<2x256xf32> to vector<2x128xf32>
    %80 = arith.index_cast %75 : i32 to index
    %c0_18 = arith.constant 0 : index
    %c0_19 = arith.constant 0 : index
    %81 = vector.load %arg1[%80, %c0_18, %c0_19] : memref<8x2x256xf32, #tpu.memory_space<vmem>>, vector<1x2x256xf32>
    %82 = vector.shape_cast %81 : vector<1x2x256xf32> to vector<2x256xf32>
    %83 = vector.extract_strided_slice %82 {offsets = [0, 128], sizes = [2, 128], strides = [1, 1]} : vector<2x256xf32> to vector<2x128xf32>
    %84 = tpu.concatenate %39, %70 in 1 : vector<2x32xf32>, vector<2x32xf32> -> vector<2x64xf32>
    %cst_20 = arith.constant dense<0.000000e+00> : vector<2x256xf32>
    %85 = tpu.matmul %84, %0, %cst_20 {dimension_numbers = #tpu.dot_dimension_numbers<[1], [0], [0], [1], [0, 0, 1, 1], [], []>} : vector<2x64xf32>, vector<64x256xf32>, vector<2x256xf32> -> vector<2x256xf32>
    %86 = vector.extract_strided_slice %85 {offsets = [0, 0], sizes = [2, 128], strides = [1, 1]} : vector<2x256xf32> to vector<2x128xf32>
    %87 = arith.addf %79, %86 : vector<2x128xf32>
    %88 = vector.extract_strided_slice %87 {offsets = [0, 0], sizes = [2, 32], strides = [1, 1]} : vector<2x128xf32> to vector<2x32xf32>
    %89 = arith.negf %88 : vector<2x32xf32>
    %90 = math.exp %89 : vector<2x32xf32>
    %cst_21 = arith.constant 1.000000e+00 : f32
    %91 = vector.broadcast %cst_21 : f32 to vector<2x32xf32>
    %92 = arith.addf %91, %90 : vector<2x32xf32>
    %93 = arith.divf %91, %92 : vector<2x32xf32>
    %94 = vector.extract_strided_slice %87 {offsets = [0, 32], sizes = [2, 32], strides = [1, 1]} : vector<2x128xf32> to vector<2x32xf32>
    %95 = arith.negf %94 : vector<2x32xf32>
    %96 = math.exp %95 : vector<2x32xf32>
    %cst_22 = arith.constant 1.000000e+00 : f32
    %97 = vector.broadcast %cst_22 : f32 to vector<2x32xf32>
    %98 = arith.addf %97, %96 : vector<2x32xf32>
    %99 = arith.divf %97, %98 : vector<2x32xf32>
    %100 = vector.extract_strided_slice %87 {offsets = [0, 64], sizes = [2, 32], strides = [1, 1]} : vector<2x128xf32> to vector<2x32xf32>
    %101 = math.tanh %100 : vector<2x32xf32>
    %102 = vector.extract_strided_slice %87 {offsets = [0, 96], sizes = [2, 32], strides = [1, 1]} : vector<2x128xf32> to vector<2x32xf32>
    %103 = arith.negf %102 : vector<2x32xf32>
    %104 = math.exp %103 : vector<2x32xf32>
    %cst_23 = arith.constant 1.000000e+00 : f32
    %105 = vector.broadcast %cst_23 : f32 to vector<2x32xf32>
    %106 = arith.addf %105, %104 : vector<2x32xf32>
    %107 = arith.divf %105, %106 : vector<2x32xf32>
    %108 = arith.mulf %99, %37 : vector<2x32xf32>
    %109 = arith.mulf %93, %101 : vector<2x32xf32>
    %110 = arith.addf %108, %109 : vector<2x32xf32>
    %111 = math.tanh %110 : vector<2x32xf32>
    %112 = arith.mulf %107, %111 : vector<2x32xf32>
    %113 = arith.index_cast %c1_i32 : i32 to index
    %c0_24 = arith.constant 0 : index
    %c0_25 = arith.constant 0 : index
    %114 = vector.load %arg3[%113, %c0_24, %c0_25] : memref<8x2x64xf32, #tpu.memory_space<vmem>>, vector<1x2x32xf32>
    %115 = vector.shape_cast %114 : vector<1x2x32xf32> to vector<2x32xf32>
    %116 = vector.shape_cast %112 : vector<2x32xf32> to vector<1x2x32xf32>
    tpu.vector_store %arg3[%113, %c0_24, %c0_25], %116 {strides = array<i32>} : memref<8x2x64xf32, #tpu.memory_space<vmem>>, vector<1x2x32xf32>,
    %117 = vector.extract_strided_slice %85 {offsets = [0, 128], sizes = [2, 128], strides = [1, 1]} : vector<2x256xf32> to vector<2x128xf32>
    %118 = arith.addf %83, %117 : vector<2x128xf32>
    %119 = vector.extract_strided_slice %118 {offsets = [0, 0], sizes = [2, 32], strides = [1, 1]} : vector<2x128xf32> to vector<2x32xf32>
    %120 = arith.negf %119 : vector<2x32xf32>
    %121 = math.exp %120 : vector<2x32xf32>
    %cst_26 = arith.constant 1.000000e+00 : f32
    %122 = vector.broadcast %cst_26 : f32 to vector<2x32xf32>
    %123 = arith.addf %122, %121 : vector<2x32xf32>
    %124 = arith.divf %122, %123 : vector<2x32xf32>
    %125 = vector.extract_strided_slice %118 {offsets = [0, 32], sizes = [2, 32], strides = [1, 1]} : vector<2x128xf32> to vector<2x32xf32>
    %126 = arith.negf %125 : vector<2x32xf32>
    %127 = math.exp %126 : vector<2x32xf32>
    %cst_27 = arith.constant 1.000000e+00 : f32
    %128 = vector.broadcast %cst_27 : f32 to vector<2x32xf32>
    %129 = arith.addf %128, %127 : vector<2x32xf32>
    %130 = arith.divf %128, %129 : vector<2x32xf32>
    %131 = vector.extract_strided_slice %118 {offsets = [0, 64], sizes = [2, 32], strides = [1, 1]} : vector<2x128xf32> to vector<2x32xf32>
    %132 = math.tanh %131 : vector<2x32xf32>
    %133 = vector.extract_strided_slice %118 {offsets = [0, 96], sizes = [2, 32], strides = [1, 1]} : vector<2x128xf32> to vector<2x32xf32>
    %134 = arith.negf %133 : vector<2x32xf32>
    %135 = math.exp %134 : vector<2x32xf32>
    %cst_28 = arith.constant 1.000000e+00 : f32
    %136 = vector.broadcast %cst_28 : f32 to vector<2x32xf32>
    %137 = arith.addf %136, %135 : vector<2x32xf32>
    %138 = arith.divf %136, %137 : vector<2x32xf32>
    %139 = arith.mulf %130, %68 : vector<2x32xf32>
    %140 = arith.mulf %124, %132 : vector<2x32xf32>
    %141 = arith.addf %139, %140 : vector<2x32xf32>
    %142 = math.tanh %141 : vector<2x32xf32>
    %143 = arith.mulf %138, %142 : vector<2x32xf32>
    %144 = arith.index_cast %75 : i32 to index
    %c0_29 = arith.constant 0 : index
    %c32_30 = arith.constant 32 : index
    %145 = vector.load %arg3[%144, %c0_29, %c32_30] : memref<8x2x64xf32, #tpu.memory_space<vmem>>, vector<1x2x32xf32>
    %146 = vector.shape_cast %145 : vector<1x2x32xf32> to vector<2x32xf32>
    %147 = vector.shape_cast %143 : vector<2x32xf32> to vector<1x2x32xf32>
    tpu.vector_store %arg3[%144, %c0_29, %c32_30], %147 {strides = array<i32>} : memref<8x2x64xf32, #tpu.memory_space<vmem>>, vector<1x2x32xf32>,
    %c2_i32 = arith.constant 2 : i32
    %c7_i32_31 = arith.constant 7 : i32
    %148 = arith.subi %c7_i32_31, %c2_i32 : i32
    %149 = arith.index_cast %c2_i32 : i32 to index
    %c0_32 = arith.constant 0 : index
    %c0_33 = arith.constant 0 : index
    %150 = vector.load %arg1[%149, %c0_32, %c0_33] : memref<8x2x256xf32, #tpu.memory_space<vmem>>, vector<1x2x256xf32>
    %151 = vector.shape_cast %150 : vector<1x2x256xf32> to vector<2x256xf32>
    %152 = vector.extract_strided_slice %151 {offsets = [0, 0], sizes = [2, 128], strides = [1, 1]} : vector<2x256xf32> to vector<2x128xf32>
    %153 = arith.index_cast %148 : i32 to index
    %c0_34 = arith.constant 0 : index
    %c0_35 = arith.constant 0 : index
    %154 = vector.load %arg1[%153, %c0_34, %c0_35] : memref<8x2x256xf32, #tpu.memory_space<vmem>>, vector<1x2x256xf32>
    %155 = vector.shape_cast %154 : vector<1x2x256xf32> to vector<2x256xf32>
    %156 = vector.extract_strided_slice %155 {offsets = [0, 128], sizes = [2, 128], strides = [1, 1]} : vector<2x256xf32> to vector<2x128xf32>
    %157 = tpu.concatenate %112, %143 in 1 : vector<2x32xf32>, vector<2x32xf32> -> vector<2x64xf32>
    %cst_36 = arith.constant dense<0.000000e+00> : vector<2x256xf32>
    %158 = tpu.matmul %157, %0, %cst_36 {dimension_numbers = #tpu.dot_dimension_numbers<[1], [0], [0], [1], [0, 0, 1, 1], [], []>} : vector<2x64xf32>, vector<64x256xf32>, vector<2x256xf32> -> vector<2x256xf32>
    %159 = vector.extract_strided_slice %158 {offsets = [0, 0], sizes = [2, 128], strides = [1, 1]} : vector<2x256xf32> to vector<2x128xf32>
    %160 = arith.addf %152, %159 : vector<2x128xf32>
    %161 = vector.extract_strided_slice %160 {offsets = [0, 0], sizes = [2, 32], strides = [1, 1]} : vector<2x128xf32> to vector<2x32xf32>
    %162 = arith.negf %161 : vector<2x32xf32>
    %163 = math.exp %162 : vector<2x32xf32>
    %cst_37 = arith.constant 1.000000e+00 : f32
    %164 = vector.broadcast %cst_37 : f32 to vector<2x32xf32>
    %165 = arith.addf %164, %163 : vector<2x32xf32>
    %166 = arith.divf %164, %165 : vector<2x32xf32>
    %167 = vector.extract_strided_slice %160 {offsets = [0, 32], sizes = [2, 32], strides = [1, 1]} : vector<2x128xf32> to vector<2x32xf32>
    %168 = arith.negf %167 : vector<2x32xf32>
    %169 = math.exp %168 : vector<2x32xf32>
    %cst_38 = arith.constant 1.000000e+00 : f32
    %170 = vector.broadcast %cst_38 : f32 to vector<2x32xf32>
    %171 = arith.addf %170, %169 : vector<2x32xf32>
    %172 = arith.divf %170, %171 : vector<2x32xf32>
    %173 = vector.extract_strided_slice %160 {offsets = [0, 64], sizes = [2, 32], strides = [1, 1]} : vector<2x128xf32> to vector<2x32xf32>
    %174 = math.tanh %173 : vector<2x32xf32>
    %175 = vector.extract_strided_slice %160 {offsets = [0, 96], sizes = [2, 32], strides = [1, 1]} : vector<2x128xf32> to vector<2x32xf32>
    %176 = arith.negf %175 : vector<2x32xf32>
    %177 = math.exp %176 : vector<2x32xf32>
    %cst_39 = arith.constant 1.000000e+00 : f32
    %178 = vector.broadcast %cst_39 : f32 to vector<2x32xf32>
    %179 = arith.addf %178, %177 : vector<2x32xf32>
    %180 = arith.divf %178, %179 : vector<2x32xf32>
    %181 = arith.mulf %172, %110 : vector<2x32xf32>
    %182 = arith.mulf %166, %174 : vector<2x32xf32>
    %183 = arith.addf %181, %182 : vector<2x32xf32>
    %184 = math.tanh %183 : vector<2x32xf32>
    %185 = arith.mulf %180, %184 : vector<2x32xf32>
    %186 = arith.index_cast %c2_i32 : i32 to index
    %c0_40 = arith.constant 0 : index
    %c0_41 = arith.constant 0 : index
    %187 = vector.load %arg3[%186, %c0_40, %c0_41] : memref<8x2x64xf32, #tpu.memory_space<vmem>>, vector<1x2x32xf32>
    %188 = vector.shape_cast %187 : vector<1x2x32xf32> to vector<2x32xf32>
    %189 = vector.shape_cast %185 : vector<2x32xf32> to vector<1x2x32xf32>
    tpu.vector_store %arg3[%186, %c0_40, %c0_41], %189 {strides = array<i32>} : memref<8x2x64xf32, #tpu.memory_space<vmem>>, vector<1x2x32xf32>,
    %190 = vector.extract_strided_slice %158 {offsets = [0, 128], sizes = [2, 128], strides = [1, 1]} : vector<2x256xf32> to vector<2x128xf32>
    %191 = arith.addf %156, %190 : vector<2x128xf32>
    %192 = vector.extract_strided_slice %191 {offsets = [0, 0], sizes = [2, 32], strides = [1, 1]} : vector<2x128xf32> to vector<2x32xf32>
    %193 = arith.negf %192 : vector<2x32xf32>
    %194 = math.exp %193 : vector<2x32xf32>
    %cst_42 = arith.constant 1.000000e+00 : f32
    %195 = vector.broadcast %cst_42 : f32 to vector<2x32xf32>
    %196 = arith.addf %195, %194 : vector<2x32xf32>
    %197 = arith.divf %195, %196 : vector<2x32xf32>
    %198 = vector.extract_strided_slice %191 {offsets = [0, 32], sizes = [2, 32], strides = [1, 1]} : vector<2x128xf32> to vector<2x32xf32>
    %199 = arith.negf %198 : vector<2x32xf32>
    %200 = math.exp %199 : vector<2x32xf32>
    %cst_43 = arith.constant 1.000000e+00 : f32
    %201 = vector.broadcast %cst_43 : f32 to vector<2x32xf32>
    %202 = arith.addf %201, %200 : vector<2x32xf32>
    %203 = arith.divf %201, %202 : vector<2x32xf32>
    %204 = vector.extract_strided_slice %191 {offsets = [0, 64], sizes = [2, 32], strides = [1, 1]} : vector<2x128xf32> to vector<2x32xf32>
    %205 = math.tanh %204 : vector<2x32xf32>
    %206 = vector.extract_strided_slice %191 {offsets = [0, 96], sizes = [2, 32], strides = [1, 1]} : vector<2x128xf32> to vector<2x32xf32>
    %207 = arith.negf %206 : vector<2x32xf32>
    %208 = math.exp %207 : vector<2x32xf32>
    %cst_44 = arith.constant 1.000000e+00 : f32
    %209 = vector.broadcast %cst_44 : f32 to vector<2x32xf32>
    %210 = arith.addf %209, %208 : vector<2x32xf32>
    %211 = arith.divf %209, %210 : vector<2x32xf32>
    %212 = arith.mulf %203, %141 : vector<2x32xf32>
    %213 = arith.mulf %197, %205 : vector<2x32xf32>
    %214 = arith.addf %212, %213 : vector<2x32xf32>
    %215 = math.tanh %214 : vector<2x32xf32>
    %216 = arith.mulf %211, %215 : vector<2x32xf32>
    %217 = arith.index_cast %148 : i32 to index
    %c0_45 = arith.constant 0 : index
    %c32_46 = arith.constant 32 : index
    %218 = vector.load %arg3[%217, %c0_45, %c32_46] : memref<8x2x64xf32, #tpu.memory_space<vmem>>, vector<1x2x32xf32>
    %219 = vector.shape_cast %218 : vector<1x2x32xf32> to vector<2x32xf32>
    %220 = vector.shape_cast %216 : vector<2x32xf32> to vector<1x2x32xf32>
    tpu.vector_store %arg3[%217, %c0_45, %c32_46], %220 {strides = array<i32>} : memref<8x2x64xf32, #tpu.memory_space<vmem>>, vector<1x2x32xf32>,
    %c3_i32 = arith.constant 3 : i32
    %c7_i32_47 = arith.constant 7 : i32
    %221 = arith.subi %c7_i32_47, %c3_i32 : i32
    %222 = arith.index_cast %c3_i32 : i32 to index
    %c0_48 = arith.constant 0 : index
    %c0_49 = arith.constant 0 : index
    %223 = vector.load %arg1[%222, %c0_48, %c0_49] : memref<8x2x256xf32, #tpu.memory_space<vmem>>, vector<1x2x256xf32>
    %224 = vector.shape_cast %223 : vector<1x2x256xf32> to vector<2x256xf32>
    %225 = vector.extract_strided_slice %224 {offsets = [0, 0], sizes = [2, 128], strides = [1, 1]} : vector<2x256xf32> to vector<2x128xf32>
    %226 = arith.index_cast %221 : i32 to index
    %c0_50 = arith.constant 0 : index
    %c0_51 = arith.constant 0 : index
    %227 = vector.load %arg1[%226, %c0_50, %c0_51] : memref<8x2x256xf32, #tpu.memory_space<vmem>>, vector<1x2x256xf32>
    %228 = vector.shape_cast %227 : vector<1x2x256xf32> to vector<2x256xf32>
    %229 = vector.extract_strided_slice %228 {offsets = [0, 128], sizes = [2, 128], strides = [1, 1]} : vector<2x256xf32> to vector<2x128xf32>
    %230 = tpu.concatenate %185, %216 in 1 : vector<2x32xf32>, vector<2x32xf32> -> vector<2x64xf32>
    %cst_52 = arith.constant dense<0.000000e+00> : vector<2x256xf32>
    %231 = tpu.matmul %230, %0, %cst_52 {dimension_numbers = #tpu.dot_dimension_numbers<[1], [0], [0], [1], [0, 0, 1, 1], [], []>} : vector<2x64xf32>, vector<64x256xf32>, vector<2x256xf32> -> vector<2x256xf32>
    %232 = vector.extract_strided_slice %231 {offsets = [0, 0], sizes = [2, 128], strides = [1, 1]} : vector<2x256xf32> to vector<2x128xf32>
    %233 = arith.addf %225, %232 : vector<2x128xf32>
    %234 = vector.extract_strided_slice %233 {offsets = [0, 0], sizes = [2, 32], strides = [1, 1]} : vector<2x128xf32> to vector<2x32xf32>
    %235 = arith.negf %234 : vector<2x32xf32>
    %236 = math.exp %235 : vector<2x32xf32>
    %cst_53 = arith.constant 1.000000e+00 : f32
    %237 = vector.broadcast %cst_53 : f32 to vector<2x32xf32>
    %238 = arith.addf %237, %236 : vector<2x32xf32>
    %239 = arith.divf %237, %238 : vector<2x32xf32>
    %240 = vector.extract_strided_slice %233 {offsets = [0, 32], sizes = [2, 32], strides = [1, 1]} : vector<2x128xf32> to vector<2x32xf32>
    %241 = arith.negf %240 : vector<2x32xf32>
    %242 = math.exp %241 : vector<2x32xf32>
    %cst_54 = arith.constant 1.000000e+00 : f32
    %243 = vector.broadcast %cst_54 : f32 to vector<2x32xf32>
    %244 = arith.addf %243, %242 : vector<2x32xf32>
    %245 = arith.divf %243, %244 : vector<2x32xf32>
    %246 = vector.extract_strided_slice %233 {offsets = [0, 64], sizes = [2, 32], strides = [1, 1]} : vector<2x128xf32> to vector<2x32xf32>
    %247 = math.tanh %246 : vector<2x32xf32>
    %248 = vector.extract_strided_slice %233 {offsets = [0, 96], sizes = [2, 32], strides = [1, 1]} : vector<2x128xf32> to vector<2x32xf32>
    %249 = arith.negf %248 : vector<2x32xf32>
    %250 = math.exp %249 : vector<2x32xf32>
    %cst_55 = arith.constant 1.000000e+00 : f32
    %251 = vector.broadcast %cst_55 : f32 to vector<2x32xf32>
    %252 = arith.addf %251, %250 : vector<2x32xf32>
    %253 = arith.divf %251, %252 : vector<2x32xf32>
    %254 = arith.mulf %245, %183 : vector<2x32xf32>
    %255 = arith.mulf %239, %247 : vector<2x32xf32>
    %256 = arith.addf %254, %255 : vector<2x32xf32>
    %257 = math.tanh %256 : vector<2x32xf32>
    %258 = arith.mulf %253, %257 : vector<2x32xf32>
    %259 = arith.index_cast %c3_i32 : i32 to index
    %c0_56 = arith.constant 0 : index
    %c0_57 = arith.constant 0 : index
    %260 = vector.load %arg3[%259, %c0_56, %c0_57] : memref<8x2x64xf32, #tpu.memory_space<vmem>>, vector<1x2x32xf32>
    %261 = vector.shape_cast %260 : vector<1x2x32xf32> to vector<2x32xf32>
    %262 = vector.shape_cast %258 : vector<2x32xf32> to vector<1x2x32xf32>
    tpu.vector_store %arg3[%259, %c0_56, %c0_57], %262 {strides = array<i32>} : memref<8x2x64xf32, #tpu.memory_space<vmem>>, vector<1x2x32xf32>,
    %263 = vector.extract_strided_slice %231 {offsets = [0, 128], sizes = [2, 128], strides = [1, 1]} : vector<2x256xf32> to vector<2x128xf32>
    %264 = arith.addf %229, %263 : vector<2x128xf32>
    %265 = vector.extract_strided_slice %264 {offsets = [0, 0], sizes = [2, 32], strides = [1, 1]} : vector<2x128xf32> to vector<2x32xf32>
    %266 = arith.negf %265 : vector<2x32xf32>
    %267 = math.exp %266 : vector<2x32xf32>
    %cst_58 = arith.constant 1.000000e+00 : f32
    %268 = vector.broadcast %cst_58 : f32 to vector<2x32xf32>
    %269 = arith.addf %268, %267 : vector<2x32xf32>
    %270 = arith.divf %268, %269 : vector<2x32xf32>
    %271 = vector.extract_strided_slice %264 {offsets = [0, 32], sizes = [2, 32], strides = [1, 1]} : vector<2x128xf32> to vector<2x32xf32>
    %272 = arith.negf %271 : vector<2x32xf32>
    %273 = math.exp %272 : vector<2x32xf32>
    %cst_59 = arith.constant 1.000000e+00 : f32
    %274 = vector.broadcast %cst_59 : f32 to vector<2x32xf32>
    %275 = arith.addf %274, %273 : vector<2x32xf32>
    %276 = arith.divf %274, %275 : vector<2x32xf32>
    %277 = vector.extract_strided_slice %264 {offsets = [0, 64], sizes = [2, 32], strides = [1, 1]} : vector<2x128xf32> to vector<2x32xf32>
    %278 = math.tanh %277 : vector<2x32xf32>
    %279 = vector.extract_strided_slice %264 {offsets = [0, 96], sizes = [2, 32], strides = [1, 1]} : vector<2x128xf32> to vector<2x32xf32>
    %280 = arith.negf %279 : vector<2x32xf32>
    %281 = math.exp %280 : vector<2x32xf32>
    %cst_60 = arith.constant 1.000000e+00 : f32
    %282 = vector.broadcast %cst_60 : f32 to vector<2x32xf32>
    %283 = arith.addf %282, %281 : vector<2x32xf32>
    %284 = arith.divf %282, %283 : vector<2x32xf32>
    %285 = arith.mulf %276, %214 : vector<2x32xf32>
    %286 = arith.mulf %270, %278 : vector<2x32xf32>
    %287 = arith.addf %285, %286 : vector<2x32xf32>
    %288 = math.tanh %287 : vector<2x32xf32>
    %289 = arith.mulf %284, %288 : vector<2x32xf32>
    %290 = arith.index_cast %221 : i32 to index
    %c0_61 = arith.constant 0 : index
    %c32_62 = arith.constant 32 : index
    %291 = vector.load %arg3[%290, %c0_61, %c32_62] : memref<8x2x64xf32, #tpu.memory_space<vmem>>, vector<1x2x32xf32>
    %292 = vector.shape_cast %291 : vector<1x2x32xf32> to vector<2x32xf32>
    %293 = vector.shape_cast %289 : vector<2x32xf32> to vector<1x2x32xf32>
    tpu.vector_store %arg3[%290, %c0_61, %c32_62], %293 {strides = array<i32>} : memref<8x2x64xf32, #tpu.memory_space<vmem>>, vector<1x2x32xf32>,
    %c4_i32 = arith.constant 4 : i32
    %c7_i32_63 = arith.constant 7 : i32
    %294 = arith.subi %c7_i32_63, %c4_i32 : i32
    %295 = arith.index_cast %c4_i32 : i32 to index
    %c0_64 = arith.constant 0 : index
    %c0_65 = arith.constant 0 : index
    %296 = vector.load %arg1[%295, %c0_64, %c0_65] : memref<8x2x256xf32, #tpu.memory_space<vmem>>, vector<1x2x256xf32>
    %297 = vector.shape_cast %296 : vector<1x2x256xf32> to vector<2x256xf32>
    %298 = vector.extract_strided_slice %297 {offsets = [0, 0], sizes = [2, 128], strides = [1, 1]} : vector<2x256xf32> to vector<2x128xf32>
    %299 = arith.index_cast %294 : i32 to index
    %c0_66 = arith.constant 0 : index
    %c0_67 = arith.constant 0 : index
    %300 = vector.load %arg1[%299, %c0_66, %c0_67] : memref<8x2x256xf32, #tpu.memory_space<vmem>>, vector<1x2x256xf32>
    %301 = vector.shape_cast %300 : vector<1x2x256xf32> to vector<2x256xf32>
    %302 = vector.extract_strided_slice %301 {offsets = [0, 128], sizes = [2, 128], strides = [1, 1]} : vector<2x256xf32> to vector<2x128xf32>
    %303 = tpu.concatenate %258, %289 in 1 : vector<2x32xf32>, vector<2x32xf32> -> vector<2x64xf32>
    %cst_68 = arith.constant dense<0.000000e+00> : vector<2x256xf32>
    %304 = tpu.matmul %303, %0, %cst_68 {dimension_numbers = #tpu.dot_dimension_numbers<[1], [0], [0], [1], [0, 0, 1, 1], [], []>} : vector<2x64xf32>, vector<64x256xf32>, vector<2x256xf32> -> vector<2x256xf32>
    %305 = vector.extract_strided_slice %304 {offsets = [0, 0], sizes = [2, 128], strides = [1, 1]} : vector<2x256xf32> to vector<2x128xf32>
    %306 = arith.addf %298, %305 : vector<2x128xf32>
    %307 = vector.extract_strided_slice %306 {offsets = [0, 0], sizes = [2, 32], strides = [1, 1]} : vector<2x128xf32> to vector<2x32xf32>
    %308 = arith.negf %307 : vector<2x32xf32>
    %309 = math.exp %308 : vector<2x32xf32>
    %cst_69 = arith.constant 1.000000e+00 : f32
    %310 = vector.broadcast %cst_69 : f32 to vector<2x32xf32>
    %311 = arith.addf %310, %309 : vector<2x32xf32>
    %312 = arith.divf %310, %311 : vector<2x32xf32>
    %313 = vector.extract_strided_slice %306 {offsets = [0, 32], sizes = [2, 32], strides = [1, 1]} : vector<2x128xf32> to vector<2x32xf32>
    %314 = arith.negf %313 : vector<2x32xf32>
    %315 = math.exp %314 : vector<2x32xf32>
    %cst_70 = arith.constant 1.000000e+00 : f32
    %316 = vector.broadcast %cst_70 : f32 to vector<2x32xf32>
    %317 = arith.addf %316, %315 : vector<2x32xf32>
    %318 = arith.divf %316, %317 : vector<2x32xf32>
    %319 = vector.extract_strided_slice %306 {offsets = [0, 64], sizes = [2, 32], strides = [1, 1]} : vector<2x128xf32> to vector<2x32xf32>
    %320 = math.tanh %319 : vector<2x32xf32>
    %321 = vector.extract_strided_slice %306 {offsets = [0, 96], sizes = [2, 32], strides = [1, 1]} : vector<2x128xf32> to vector<2x32xf32>
    %322 = arith.negf %321 : vector<2x32xf32>
    %323 = math.exp %322 : vector<2x32xf32>
    %cst_71 = arith.constant 1.000000e+00 : f32
    %324 = vector.broadcast %cst_71 : f32 to vector<2x32xf32>
    %325 = arith.addf %324, %323 : vector<2x32xf32>
    %326 = arith.divf %324, %325 : vector<2x32xf32>
    %327 = arith.mulf %318, %256 : vector<2x32xf32>
    %328 = arith.mulf %312, %320 : vector<2x32xf32>
    %329 = arith.addf %327, %328 : vector<2x32xf32>
    %330 = math.tanh %329 : vector<2x32xf32>
    %331 = arith.mulf %326, %330 : vector<2x32xf32>
    %332 = arith.index_cast %c4_i32 : i32 to index
    %c0_72 = arith.constant 0 : index
    %c0_73 = arith.constant 0 : index
    %333 = vector.load %arg3[%332, %c0_72, %c0_73] : memref<8x2x64xf32, #tpu.memory_space<vmem>>, vector<1x2x32xf32>
    %334 = vector.shape_cast %333 : vector<1x2x32xf32> to vector<2x32xf32>
    %335 = vector.shape_cast %331 : vector<2x32xf32> to vector<1x2x32xf32>
    tpu.vector_store %arg3[%332, %c0_72, %c0_73], %335 {strides = array<i32>} : memref<8x2x64xf32, #tpu.memory_space<vmem>>, vector<1x2x32xf32>,
    %336 = vector.extract_strided_slice %304 {offsets = [0, 128], sizes = [2, 128], strides = [1, 1]} : vector<2x256xf32> to vector<2x128xf32>
    %337 = arith.addf %302, %336 : vector<2x128xf32>
    %338 = vector.extract_strided_slice %337 {offsets = [0, 0], sizes = [2, 32], strides = [1, 1]} : vector<2x128xf32> to vector<2x32xf32>
    %339 = arith.negf %338 : vector<2x32xf32>
    %340 = math.exp %339 : vector<2x32xf32>
    %cst_74 = arith.constant 1.000000e+00 : f32
    %341 = vector.broadcast %cst_74 : f32 to vector<2x32xf32>
    %342 = arith.addf %341, %340 : vector<2x32xf32>
    %343 = arith.divf %341, %342 : vector<2x32xf32>
    %344 = vector.extract_strided_slice %337 {offsets = [0, 32], sizes = [2, 32], strides = [1, 1]} : vector<2x128xf32> to vector<2x32xf32>
    %345 = arith.negf %344 : vector<2x32xf32>
    %346 = math.exp %345 : vector<2x32xf32>
    %cst_75 = arith.constant 1.000000e+00 : f32
    %347 = vector.broadcast %cst_75 : f32 to vector<2x32xf32>
    %348 = arith.addf %347, %346 : vector<2x32xf32>
    %349 = arith.divf %347, %348 : vector<2x32xf32>
    %350 = vector.extract_strided_slice %337 {offsets = [0, 64], sizes = [2, 32], strides = [1, 1]} : vector<2x128xf32> to vector<2x32xf32>
    %351 = math.tanh %350 : vector<2x32xf32>
    %352 = vector.extract_strided_slice %337 {offsets = [0, 96], sizes = [2, 32], strides = [1, 1]} : vector<2x128xf32> to vector<2x32xf32>
    %353 = arith.negf %352 : vector<2x32xf32>
    %354 = math.exp %353 : vector<2x32xf32>
    %cst_76 = arith.constant 1.000000e+00 : f32
    %355 = vector.broadcast %cst_76 : f32 to vector<2x32xf32>
    %356 = arith.addf %355, %354 : vector<2x32xf32>
    %357 = arith.divf %355, %356 : vector<2x32xf32>
    %358 = arith.mulf %349, %287 : vector<2x32xf32>
    %359 = arith.mulf %343, %351 : vector<2x32xf32>
    %360 = arith.addf %358, %359 : vector<2x32xf32>
    %361 = math.tanh %360 : vector<2x32xf32>
    %362 = arith.mulf %357, %361 : vector<2x32xf32>
    %363 = arith.index_cast %294 : i32 to index
    %c0_77 = arith.constant 0 : index
    %c32_78 = arith.constant 32 : index
    %364 = vector.load %arg3[%363, %c0_77, %c32_78] : memref<8x2x64xf32, #tpu.memory_space<vmem>>, vector<1x2x32xf32>
    %365 = vector.shape_cast %364 : vector<1x2x32xf32> to vector<2x32xf32>
    %366 = vector.shape_cast %362 : vector<2x32xf32> to vector<1x2x32xf32>
    tpu.vector_store %arg3[%363, %c0_77, %c32_78], %366 {strides = array<i32>} : memref<8x2x64xf32, #tpu.memory_space<vmem>>, vector<1x2x32xf32>,
    %c5_i32 = arith.constant 5 : i32
    %c7_i32_79 = arith.constant 7 : i32
    %367 = arith.subi %c7_i32_79, %c5_i32 : i32
    %368 = arith.index_cast %c5_i32 : i32 to index
    %c0_80 = arith.constant 0 : index
    %c0_81 = arith.constant 0 : index
    %369 = vector.load %arg1[%368, %c0_80, %c0_81] : memref<8x2x256xf32, #tpu.memory_space<vmem>>, vector<1x2x256xf32>
    %370 = vector.shape_cast %369 : vector<1x2x256xf32> to vector<2x256xf32>
    %371 = vector.extract_strided_slice %370 {offsets = [0, 0], sizes = [2, 128], strides = [1, 1]} : vector<2x256xf32> to vector<2x128xf32>
    %372 = arith.index_cast %367 : i32 to index
    %c0_82 = arith.constant 0 : index
    %c0_83 = arith.constant 0 : index
    %373 = vector.load %arg1[%372, %c0_82, %c0_83] : memref<8x2x256xf32, #tpu.memory_space<vmem>>, vector<1x2x256xf32>
    %374 = vector.shape_cast %373 : vector<1x2x256xf32> to vector<2x256xf32>
    %375 = vector.extract_strided_slice %374 {offsets = [0, 128], sizes = [2, 128], strides = [1, 1]} : vector<2x256xf32> to vector<2x128xf32>
    %376 = tpu.concatenate %331, %362 in 1 : vector<2x32xf32>, vector<2x32xf32> -> vector<2x64xf32>
    %cst_84 = arith.constant dense<0.000000e+00> : vector<2x256xf32>
    %377 = tpu.matmul %376, %0, %cst_84 {dimension_numbers = #tpu.dot_dimension_numbers<[1], [0], [0], [1], [0, 0, 1, 1], [], []>} : vector<2x64xf32>, vector<64x256xf32>, vector<2x256xf32> -> vector<2x256xf32>
    %378 = vector.extract_strided_slice %377 {offsets = [0, 0], sizes = [2, 128], strides = [1, 1]} : vector<2x256xf32> to vector<2x128xf32>
    %379 = arith.addf %371, %378 : vector<2x128xf32>
    %380 = vector.extract_strided_slice %379 {offsets = [0, 0], sizes = [2, 32], strides = [1, 1]} : vector<2x128xf32> to vector<2x32xf32>
    %381 = arith.negf %380 : vector<2x32xf32>
    %382 = math.exp %381 : vector<2x32xf32>
    %cst_85 = arith.constant 1.000000e+00 : f32
    %383 = vector.broadcast %cst_85 : f32 to vector<2x32xf32>
    %384 = arith.addf %383, %382 : vector<2x32xf32>
    %385 = arith.divf %383, %384 : vector<2x32xf32>
    %386 = vector.extract_strided_slice %379 {offsets = [0, 32], sizes = [2, 32], strides = [1, 1]} : vector<2x128xf32> to vector<2x32xf32>
    %387 = arith.negf %386 : vector<2x32xf32>
    %388 = math.exp %387 : vector<2x32xf32>
    %cst_86 = arith.constant 1.000000e+00 : f32
    %389 = vector.broadcast %cst_86 : f32 to vector<2x32xf32>
    %390 = arith.addf %389, %388 : vector<2x32xf32>
    %391 = arith.divf %389, %390 : vector<2x32xf32>
    %392 = vector.extract_strided_slice %379 {offsets = [0, 64], sizes = [2, 32], strides = [1, 1]} : vector<2x128xf32> to vector<2x32xf32>
    %393 = math.tanh %392 : vector<2x32xf32>
    %394 = vector.extract_strided_slice %379 {offsets = [0, 96], sizes = [2, 32], strides = [1, 1]} : vector<2x128xf32> to vector<2x32xf32>
    %395 = arith.negf %394 : vector<2x32xf32>
    %396 = math.exp %395 : vector<2x32xf32>
    %cst_87 = arith.constant 1.000000e+00 : f32
    %397 = vector.broadcast %cst_87 : f32 to vector<2x32xf32>
    %398 = arith.addf %397, %396 : vector<2x32xf32>
    %399 = arith.divf %397, %398 : vector<2x32xf32>
    %400 = arith.mulf %391, %329 : vector<2x32xf32>
    %401 = arith.mulf %385, %393 : vector<2x32xf32>
    %402 = arith.addf %400, %401 : vector<2x32xf32>
    %403 = math.tanh %402 : vector<2x32xf32>
    %404 = arith.mulf %399, %403 : vector<2x32xf32>
    %405 = arith.index_cast %c5_i32 : i32 to index
    %c0_88 = arith.constant 0 : index
    %c0_89 = arith.constant 0 : index
    %406 = vector.load %arg3[%405, %c0_88, %c0_89] : memref<8x2x64xf32, #tpu.memory_space<vmem>>, vector<1x2x32xf32>
    %407 = vector.shape_cast %406 : vector<1x2x32xf32> to vector<2x32xf32>
    %408 = vector.shape_cast %404 : vector<2x32xf32> to vector<1x2x32xf32>
    tpu.vector_store %arg3[%405, %c0_88, %c0_89], %408 {strides = array<i32>} : memref<8x2x64xf32, #tpu.memory_space<vmem>>, vector<1x2x32xf32>,
    %409 = vector.extract_strided_slice %377 {offsets = [0, 128], sizes = [2, 128], strides = [1, 1]} : vector<2x256xf32> to vector<2x128xf32>
    %410 = arith.addf %375, %409 : vector<2x128xf32>
    %411 = vector.extract_strided_slice %410 {offsets = [0, 0], sizes = [2, 32], strides = [1, 1]} : vector<2x128xf32> to vector<2x32xf32>
    %412 = arith.negf %411 : vector<2x32xf32>
    %413 = math.exp %412 : vector<2x32xf32>
    %cst_90 = arith.constant 1.000000e+00 : f32
    %414 = vector.broadcast %cst_90 : f32 to vector<2x32xf32>
    %415 = arith.addf %414, %413 : vector<2x32xf32>
    %416 = arith.divf %414, %415 : vector<2x32xf32>
    %417 = vector.extract_strided_slice %410 {offsets = [0, 32], sizes = [2, 32], strides = [1, 1]} : vector<2x128xf32> to vector<2x32xf32>
    %418 = arith.negf %417 : vector<2x32xf32>
    %419 = math.exp %418 : vector<2x32xf32>
    %cst_91 = arith.constant 1.000000e+00 : f32
    %420 = vector.broadcast %cst_91 : f32 to vector<2x32xf32>
    %421 = arith.addf %420, %419 : vector<2x32xf32>
    %422 = arith.divf %420, %421 : vector<2x32xf32>
    %423 = vector.extract_strided_slice %410 {offsets = [0, 64], sizes = [2, 32], strides = [1, 1]} : vector<2x128xf32> to vector<2x32xf32>
    %424 = math.tanh %423 : vector<2x32xf32>
    %425 = vector.extract_strided_slice %410 {offsets = [0, 96], sizes = [2, 32], strides = [1, 1]} : vector<2x128xf32> to vector<2x32xf32>
    %426 = arith.negf %425 : vector<2x32xf32>
    %427 = math.exp %426 : vector<2x32xf32>
    %cst_92 = arith.constant 1.000000e+00 : f32
    %428 = vector.broadcast %cst_92 : f32 to vector<2x32xf32>
    %429 = arith.addf %428, %427 : vector<2x32xf32>
    %430 = arith.divf %428, %429 : vector<2x32xf32>
    %431 = arith.mulf %422, %360 : vector<2x32xf32>
    %432 = arith.mulf %416, %424 : vector<2x32xf32>
    %433 = arith.addf %431, %432 : vector<2x32xf32>
    %434 = math.tanh %433 : vector<2x32xf32>
    %435 = arith.mulf %430, %434 : vector<2x32xf32>
    %436 = arith.index_cast %367 : i32 to index
    %c0_93 = arith.constant 0 : index
    %c32_94 = arith.constant 32 : index
    %437 = vector.load %arg3[%436, %c0_93, %c32_94] : memref<8x2x64xf32, #tpu.memory_space<vmem>>, vector<1x2x32xf32>
    %438 = vector.shape_cast %437 : vector<1x2x32xf32> to vector<2x32xf32>
    %439 = vector.shape_cast %435 : vector<2x32xf32> to vector<1x2x32xf32>
    tpu.vector_store %arg3[%436, %c0_93, %c32_94], %439 {strides = array<i32>} : memref<8x2x64xf32, #tpu.memory_space<vmem>>, vector<1x2x32xf32>,
    %c6_i32 = arith.constant 6 : i32
    %c7_i32_95 = arith.constant 7 : i32
    %440 = arith.subi %c7_i32_95, %c6_i32 : i32
    %441 = arith.index_cast %c6_i32 : i32 to index
    %c0_96 = arith.constant 0 : index
    %c0_97 = arith.constant 0 : index
    %442 = vector.load %arg1[%441, %c0_96, %c0_97] : memref<8x2x256xf32, #tpu.memory_space<vmem>>, vector<1x2x256xf32>
    %443 = vector.shape_cast %442 : vector<1x2x256xf32> to vector<2x256xf32>
    %444 = vector.extract_strided_slice %443 {offsets = [0, 0], sizes = [2, 128], strides = [1, 1]} : vector<2x256xf32> to vector<2x128xf32>
    %445 = arith.index_cast %440 : i32 to index
    %c0_98 = arith.constant 0 : index
    %c0_99 = arith.constant 0 : index
    %446 = vector.load %arg1[%445, %c0_98, %c0_99] : memref<8x2x256xf32, #tpu.memory_space<vmem>>, vector<1x2x256xf32>
    %447 = vector.shape_cast %446 : vector<1x2x256xf32> to vector<2x256xf32>
    %448 = vector.extract_strided_slice %447 {offsets = [0, 128], sizes = [2, 128], strides = [1, 1]} : vector<2x256xf32> to vector<2x128xf32>
    %449 = tpu.concatenate %404, %435 in 1 : vector<2x32xf32>, vector<2x32xf32> -> vector<2x64xf32>
    %cst_100 = arith.constant dense<0.000000e+00> : vector<2x256xf32>
    %450 = tpu.matmul %449, %0, %cst_100 {dimension_numbers = #tpu.dot_dimension_numbers<[1], [0], [0], [1], [0, 0, 1, 1], [], []>} : vector<2x64xf32>, vector<64x256xf32>, vector<2x256xf32> -> vector<2x256xf32>
    %451 = vector.extract_strided_slice %450 {offsets = [0, 0], sizes = [2, 128], strides = [1, 1]} : vector<2x256xf32> to vector<2x128xf32>
    %452 = arith.addf %444, %451 : vector<2x128xf32>
    %453 = vector.extract_strided_slice %452 {offsets = [0, 0], sizes = [2, 32], strides = [1, 1]} : vector<2x128xf32> to vector<2x32xf32>
    %454 = arith.negf %453 : vector<2x32xf32>
    %455 = math.exp %454 : vector<2x32xf32>
    %cst_101 = arith.constant 1.000000e+00 : f32
    %456 = vector.broadcast %cst_101 : f32 to vector<2x32xf32>
    %457 = arith.addf %456, %455 : vector<2x32xf32>
    %458 = arith.divf %456, %457 : vector<2x32xf32>
    %459 = vector.extract_strided_slice %452 {offsets = [0, 32], sizes = [2, 32], strides = [1, 1]} : vector<2x128xf32> to vector<2x32xf32>
    %460 = arith.negf %459 : vector<2x32xf32>
    %461 = math.exp %460 : vector<2x32xf32>
    %cst_102 = arith.constant 1.000000e+00 : f32
    %462 = vector.broadcast %cst_102 : f32 to vector<2x32xf32>
    %463 = arith.addf %462, %461 : vector<2x32xf32>
    %464 = arith.divf %462, %463 : vector<2x32xf32>
    %465 = vector.extract_strided_slice %452 {offsets = [0, 64], sizes = [2, 32], strides = [1, 1]} : vector<2x128xf32> to vector<2x32xf32>
    %466 = math.tanh %465 : vector<2x32xf32>
    %467 = vector.extract_strided_slice %452 {offsets = [0, 96], sizes = [2, 32], strides = [1, 1]} : vector<2x128xf32> to vector<2x32xf32>
    %468 = arith.negf %467 : vector<2x32xf32>
    %469 = math.exp %468 : vector<2x32xf32>
    %cst_103 = arith.constant 1.000000e+00 : f32
    %470 = vector.broadcast %cst_103 : f32 to vector<2x32xf32>
    %471 = arith.addf %470, %469 : vector<2x32xf32>
    %472 = arith.divf %470, %471 : vector<2x32xf32>
    %473 = arith.mulf %464, %402 : vector<2x32xf32>
    %474 = arith.mulf %458, %466 : vector<2x32xf32>
    %475 = arith.addf %473, %474 : vector<2x32xf32>
    %476 = math.tanh %475 : vector<2x32xf32>
    %477 = arith.mulf %472, %476 : vector<2x32xf32>
    %478 = arith.index_cast %c6_i32 : i32 to index
    %c0_104 = arith.constant 0 : index
    %c0_105 = arith.constant 0 : index
    %479 = vector.load %arg3[%478, %c0_104, %c0_105] : memref<8x2x64xf32, #tpu.memory_space<vmem>>, vector<1x2x32xf32>
    %480 = vector.shape_cast %479 : vector<1x2x32xf32> to vector<2x32xf32>
    %481 = vector.shape_cast %477 : vector<2x32xf32> to vector<1x2x32xf32>
    tpu.vector_store %arg3[%478, %c0_104, %c0_105], %481 {strides = array<i32>} : memref<8x2x64xf32, #tpu.memory_space<vmem>>, vector<1x2x32xf32>,
    %482 = vector.extract_strided_slice %450 {offsets = [0, 128], sizes = [2, 128], strides = [1, 1]} : vector<2x256xf32> to vector<2x128xf32>
    %483 = arith.addf %448, %482 : vector<2x128xf32>
    %484 = vector.extract_strided_slice %483 {offsets = [0, 0], sizes = [2, 32], strides = [1, 1]} : vector<2x128xf32> to vector<2x32xf32>
    %485 = arith.negf %484 : vector<2x32xf32>
    %486 = math.exp %485 : vector<2x32xf32>
    %cst_106 = arith.constant 1.000000e+00 : f32
    %487 = vector.broadcast %cst_106 : f32 to vector<2x32xf32>
    %488 = arith.addf %487, %486 : vector<2x32xf32>
    %489 = arith.divf %487, %488 : vector<2x32xf32>
    %490 = vector.extract_strided_slice %483 {offsets = [0, 32], sizes = [2, 32], strides = [1, 1]} : vector<2x128xf32> to vector<2x32xf32>
    %491 = arith.negf %490 : vector<2x32xf32>
    %492 = math.exp %491 : vector<2x32xf32>
    %cst_107 = arith.constant 1.000000e+00 : f32
    %493 = vector.broadcast %cst_107 : f32 to vector<2x32xf32>
    %494 = arith.addf %493, %492 : vector<2x32xf32>
    %495 = arith.divf %493, %494 : vector<2x32xf32>
    %496 = vector.extract_strided_slice %483 {offsets = [0, 64], sizes = [2, 32], strides = [1, 1]} : vector<2x128xf32> to vector<2x32xf32>
    %497 = math.tanh %496 : vector<2x32xf32>
    %498 = vector.extract_strided_slice %483 {offsets = [0, 96], sizes = [2, 32], strides = [1, 1]} : vector<2x128xf32> to vector<2x32xf32>
    %499 = arith.negf %498 : vector<2x32xf32>
    %500 = math.exp %499 : vector<2x32xf32>
    %cst_108 = arith.constant 1.000000e+00 : f32
    %501 = vector.broadcast %cst_108 : f32 to vector<2x32xf32>
    %502 = arith.addf %501, %500 : vector<2x32xf32>
    %503 = arith.divf %501, %502 : vector<2x32xf32>
    %504 = arith.mulf %495, %433 : vector<2x32xf32>
    %505 = arith.mulf %489, %497 : vector<2x32xf32>
    %506 = arith.addf %504, %505 : vector<2x32xf32>
    %507 = math.tanh %506 : vector<2x32xf32>
    %508 = arith.mulf %503, %507 : vector<2x32xf32>
    %509 = arith.index_cast %440 : i32 to index
    %c0_109 = arith.constant 0 : index
    %c32_110 = arith.constant 32 : index
    %510 = vector.load %arg3[%509, %c0_109, %c32_110] : memref<8x2x64xf32, #tpu.memory_space<vmem>>, vector<1x2x32xf32>
    %511 = vector.shape_cast %510 : vector<1x2x32xf32> to vector<2x32xf32>
    %512 = vector.shape_cast %508 : vector<2x32xf32> to vector<1x2x32xf32>
    tpu.vector_store %arg3[%509, %c0_109, %c32_110], %512 {strides = array<i32>} : memref<8x2x64xf32, #tpu.memory_space<vmem>>, vector<1x2x32xf32>,
    %c7_i32_111 = arith.constant 7 : i32
    %c7_i32_112 = arith.constant 7 : i32
    %513 = arith.subi %c7_i32_112, %c7_i32_111 : i32
    %514 = arith.index_cast %c7_i32_111 : i32 to index
    %c0_113 = arith.constant 0 : index
    %c0_114 = arith.constant 0 : index
    %515 = vector.load %arg1[%514, %c0_113, %c0_114] : memref<8x2x256xf32, #tpu.memory_space<vmem>>, vector<1x2x256xf32>
    %516 = vector.shape_cast %515 : vector<1x2x256xf32> to vector<2x256xf32>
    %517 = vector.extract_strided_slice %516 {offsets = [0, 0], sizes = [2, 128], strides = [1, 1]} : vector<2x256xf32> to vector<2x128xf32>
    %518 = arith.index_cast %513 : i32 to index
    %c0_115 = arith.constant 0 : index
    %c0_116 = arith.constant 0 : index
    %519 = vector.load %arg1[%518, %c0_115, %c0_116] : memref<8x2x256xf32, #tpu.memory_space<vmem>>, vector<1x2x256xf32>
    %520 = vector.shape_cast %519 : vector<1x2x256xf32> to vector<2x256xf32>
    %521 = vector.extract_strided_slice %520 {offsets = [0, 128], sizes = [2, 128], strides = [1, 1]} : vector<2x256xf32> to vector<2x128xf32>
    %522 = tpu.concatenate %477, %508 in 1 : vector<2x32xf32>, vector<2x32xf32> -> vector<2x64xf32>
    %cst_117 = arith.constant dense<0.000000e+00> : vector<2x256xf32>
    %523 = tpu.matmul %522, %0, %cst_117 {dimension_numbers = #tpu.dot_dimension_numbers<[1], [0], [0], [1], [0, 0, 1, 1], [], []>} : vector<2x64xf32>, vector<64x256xf32>, vector<2x256xf32> -> vector<2x256xf32>
    %524 = vector.extract_strided_slice %523 {offsets = [0, 0], sizes = [2, 128], strides = [1, 1]} : vector<2x256xf32> to vector<2x128xf32>
    %525 = arith.addf %517, %524 : vector<2x128xf32>
    %526 = vector.extract_strided_slice %525 {offsets = [0, 0], sizes = [2, 32], strides = [1, 1]} : vector<2x128xf32> to vector<2x32xf32>
    %527 = arith.negf %526 : vector<2x32xf32>
    %528 = math.exp %527 : vector<2x32xf32>
    %cst_118 = arith.constant 1.000000e+00 : f32
    %529 = vector.broadcast %cst_118 : f32 to vector<2x32xf32>
    %530 = arith.addf %529, %528 : vector<2x32xf32>
    %531 = arith.divf %529, %530 : vector<2x32xf32>
    %532 = vector.extract_strided_slice %525 {offsets = [0, 32], sizes = [2, 32], strides = [1, 1]} : vector<2x128xf32> to vector<2x32xf32>
    %533 = arith.negf %532 : vector<2x32xf32>
    %534 = math.exp %533 : vector<2x32xf32>
    %cst_119 = arith.constant 1.000000e+00 : f32
    %535 = vector.broadcast %cst_119 : f32 to vector<2x32xf32>
    %536 = arith.addf %535, %534 : vector<2x32xf32>
    %537 = arith.divf %535, %536 : vector<2x32xf32>
    %538 = vector.extract_strided_slice %525 {offsets = [0, 64], sizes = [2, 32], strides = [1, 1]} : vector<2x128xf32> to vector<2x32xf32>
    %539 = math.tanh %538 : vector<2x32xf32>
    %540 = vector.extract_strided_slice %525 {offsets = [0, 96], sizes = [2, 32], strides = [1, 1]} : vector<2x128xf32> to vector<2x32xf32>
    %541 = arith.negf %540 : vector<2x32xf32>
    %542 = math.exp %541 : vector<2x32xf32>
    %cst_120 = arith.constant 1.000000e+00 : f32
    %543 = vector.broadcast %cst_120 : f32 to vector<2x32xf32>
    %544 = arith.addf %543, %542 : vector<2x32xf32>
    %545 = arith.divf %543, %544 : vector<2x32xf32>
    %546 = arith.mulf %537, %475 : vector<2x32xf32>
    %547 = arith.mulf %531, %539 : vector<2x32xf32>
    %548 = arith.addf %546, %547 : vector<2x32xf32>
    %549 = math.tanh %548 : vector<2x32xf32>
    %550 = arith.mulf %545, %549 : vector<2x32xf32>
    %551 = arith.index_cast %c7_i32_111 : i32 to index
    %c0_121 = arith.constant 0 : index
    %c0_122 = arith.constant 0 : index
    %552 = vector.load %arg3[%551, %c0_121, %c0_122] : memref<8x2x64xf32, #tpu.memory_space<vmem>>, vector<1x2x32xf32>
    %553 = vector.shape_cast %552 : vector<1x2x32xf32> to vector<2x32xf32>
    %554 = vector.shape_cast %550 : vector<2x32xf32> to vector<1x2x32xf32>
    tpu.vector_store %arg3[%551, %c0_121, %c0_122], %554 {strides = array<i32>} : memref<8x2x64xf32, #tpu.memory_space<vmem>>, vector<1x2x32xf32>,
    %555 = vector.extract_strided_slice %523 {offsets = [0, 128], sizes = [2, 128], strides = [1, 1]} : vector<2x256xf32> to vector<2x128xf32>
    %556 = arith.addf %521, %555 : vector<2x128xf32>
    %557 = vector.extract_strided_slice %556 {offsets = [0, 0], sizes = [2, 32], strides = [1, 1]} : vector<2x128xf32> to vector<2x32xf32>
    %558 = arith.negf %557 : vector<2x32xf32>
    %559 = math.exp %558 : vector<2x32xf32>
    %cst_123 = arith.constant 1.000000e+00 : f32
    %560 = vector.broadcast %cst_123 : f32 to vector<2x32xf32>
    %561 = arith.addf %560, %559 : vector<2x32xf32>
    %562 = arith.divf %560, %561 : vector<2x32xf32>
    %563 = vector.extract_strided_slice %556 {offsets = [0, 32], sizes = [2, 32], strides = [1, 1]} : vector<2x128xf32> to vector<2x32xf32>
    %564 = arith.negf %563 : vector<2x32xf32>
    %565 = math.exp %564 : vector<2x32xf32>
    %cst_124 = arith.constant 1.000000e+00 : f32
    %566 = vector.broadcast %cst_124 : f32 to vector<2x32xf32>
    %567 = arith.addf %566, %565 : vector<2x32xf32>
    %568 = arith.divf %566, %567 : vector<2x32xf32>
    %569 = vector.extract_strided_slice %556 {offsets = [0, 64], sizes = [2, 32], strides = [1, 1]} : vector<2x128xf32> to vector<2x32xf32>
    %570 = math.tanh %569 : vector<2x32xf32>
    %571 = vector.extract_strided_slice %556 {offsets = [0, 96], sizes = [2, 32], strides = [1, 1]} : vector<2x128xf32> to vector<2x32xf32>
    %572 = arith.negf %571 : vector<2x32xf32>
    %573 = math.exp %572 : vector<2x32xf32>
    %cst_125 = arith.constant 1.000000e+00 : f32
    %574 = vector.broadcast %cst_125 : f32 to vector<2x32xf32>
    %575 = arith.addf %574, %573 : vector<2x32xf32>
    %576 = arith.divf %574, %575 : vector<2x32xf32>
    %577 = arith.mulf %568, %506 : vector<2x32xf32>
    %578 = arith.mulf %562, %570 : vector<2x32xf32>
    %579 = arith.addf %577, %578 : vector<2x32xf32>
    %580 = math.tanh %579 : vector<2x32xf32>
    %581 = arith.mulf %576, %580 : vector<2x32xf32>
    %582 = arith.index_cast %513 : i32 to index
    %c0_126 = arith.constant 0 : index
    %c32_127 = arith.constant 32 : index
    %583 = vector.load %arg3[%582, %c0_126, %c32_127] : memref<8x2x64xf32, #tpu.memory_space<vmem>>, vector<1x2x32xf32>
    %584 = vector.shape_cast %583 : vector<1x2x32xf32> to vector<2x32xf32>
    %585 = vector.shape_cast %581 : vector<2x32xf32> to vector<1x2x32xf32>
    tpu.vector_store %arg3[%582, %c0_126, %c32_127], %585 {strides = array<i32>} : memref<8x2x64xf32, #tpu.memory_space<vmem>>, vector<1x2x32xf32>,
    %c8_i32 = arith.constant 8 : i32
    return
  }
  func.func @transform_0(%arg0: i32) -> (i32, i32, i32) {
    %c0_i32 = arith.constant 0 : i32
    %c0_i32_0 = arith.constant 0 : i32
    %c0_i32_1 = arith.constant 0 : i32
    return %c0_i32, %arg0, %c0_i32_0 : i32, i32, i32
  }
  func.func @transform_1(%arg0: i32) -> (i32, i32) {
    %c0_i32 = arith.constant 0 : i32
    %c0_i32_0 = arith.constant 0 : i32
    %c0_i32_1 = arith.constant 0 : i32
    return %c0_i32, %c0_i32_0 : i32, i32
  }
  func.func @transform_2(%arg0: i32) -> (i32, i32, i32) {
    %c0_i32 = arith.constant 0 : i32
    %c0_i32_0 = arith.constant 0 : i32
    %c0_i32_1 = arith.constant 0 : i32
    return %c0_i32, %arg0, %c0_i32_0 : i32, i32, i32
  }
}

module attributes {stable_mosaic.version = 11 : i64} {
  func.func @_heads_biaffine_kernel(%arg0: i32, %arg1: memref<1x8x64xf32, #tpu.memory_space<vmem>>, %arg2: memref<64x512xf32, #tpu.memory_space<vmem>>, %arg3: memref<1x512xf32, #tpu.memory_space<vmem>>, %arg4: memref<128x128xf32, #tpu.memory_space<vmem>>, %arg5: memref<1x8x8xf32, #tpu.memory_space<vmem>>, %arg6: memref<1x8x16xf32, #tpu.memory_space<vmem>>, %arg7: memref<1x8x16xf32, #tpu.memory_space<vmem>>) attributes {dimension_semantics = [#tpu.dimension_semantics<parallel>], iteration_bounds = array<i64: 2>, scalar_prefetch = 0 : i64, scratch_operands = 0 : i64, tpu.core_type = #tpu.core_type<tc>, window_params = [{transform_indices = @transform_0, window_bounds = array<i64: 1, 8, 64>}, {pipeline_mode = #tpu.pipeline_mode<synchronous>, transform_indices = @transform_1, window_bounds = array<i64: 64, 512>}, {pipeline_mode = #tpu.pipeline_mode<synchronous>, transform_indices = @transform_2, window_bounds = array<i64: 1, 512>}, {pipeline_mode = #tpu.pipeline_mode<synchronous>, transform_indices = @transform_3, window_bounds = array<i64: 128, 128>}, {transform_indices = @transform_4, window_bounds = array<i64: 1, 8, 8>}, {transform_indices = @transform_5, window_bounds = array<i64: 1, 8, 16>}, {transform_indices = @transform_6, window_bounds = array<i64: 1, 8, 16>}]} {
    %c0 = arith.constant 0 : index
    %c0_0 = arith.constant 0 : index
    %c0_1 = arith.constant 0 : index
    %0 = vector.load %arg1[%c0, %c0_0, %c0_1] : memref<1x8x64xf32, #tpu.memory_space<vmem>>, vector<1x8x64xf32>
    %1 = vector.shape_cast %0 : vector<1x8x64xf32> to vector<8x64xf32>
    %c0_2 = arith.constant 0 : index
    %c0_3 = arith.constant 0 : index
    %2 = vector.load %arg2[%c0_2, %c0_3] : memref<64x512xf32, #tpu.memory_space<vmem>>, vector<64x512xf32>
    %cst = arith.constant dense<0.000000e+00> : vector<8x512xf32>
    %3 = tpu.matmul %1, %2, %cst {dimension_numbers = #tpu.dot_dimension_numbers<[1], [0], [0], [1], [0, 0, 1, 1], [], []>} : vector<8x64xf32>, vector<64x512xf32>, vector<8x512xf32> -> vector<8x512xf32>
    %c0_4 = arith.constant 0 : index
    %c0_5 = arith.constant 0 : index
    %4 = vector.load %arg3[%c0_4, %c0_5] : memref<1x512xf32, #tpu.memory_space<vmem>>, vector<1x512xf32>
    %5 = vector.broadcast %4 : vector<1x512xf32> to vector<8x512xf32>
    %6 = arith.addf %3, %5 : vector<8x512xf32>
    %cst_6 = arith.constant 0.000000e+00 : f32
    %7 = vector.broadcast %cst_6 : f32 to vector<8x512xf32>
    %8 = arith.cmpf ogt, %6, %7 : vector<8x512xf32>
    %cst_7 = arith.constant 0.000000e+00 : f32
    %9 = vector.broadcast %cst_7 : f32 to vector<8x512xf32>
    %10 = arith.minimumf %6, %9 : vector<8x512xf32>
    %11 = math.exp %10 : vector<8x512xf32>
    %cst_8 = arith.constant 1.000000e+00 : f32
    %12 = vector.broadcast %cst_8 : f32 to vector<8x512xf32>
    %13 = arith.subf %11, %12 : vector<8x512xf32>
    %14 = arith.select %8, %6, %13 : vector<8x512xi1>, vector<8x512xf32>
    %15 = vector.extract_strided_slice %14 {offsets = [0, 0], sizes = [8, 128], strides = [1, 1]} : vector<8x512xf32> to vector<8x128xf32>
    %16 = vector.extract_strided_slice %14 {offsets = [0, 128], sizes = [8, 128], strides = [1, 1]} : vector<8x512xf32> to vector<8x128xf32>
    %17 = vector.extract_strided_slice %14 {offsets = [0, 256], sizes = [8, 16], strides = [1, 1]} : vector<8x512xf32> to vector<8x16xf32>
    %c0_9 = arith.constant 0 : index
    %c0_10 = arith.constant 0 : index
    %c0_11 = arith.constant 0 : index
    %18 = vector.load %arg6[%c0_9, %c0_10, %c0_11] : memref<1x8x16xf32, #tpu.memory_space<vmem>>, vector<1x8x16xf32>
    %19 = vector.shape_cast %18 : vector<1x8x16xf32> to vector<8x16xf32>
    %20 = vector.shape_cast %17 : vector<8x16xf32> to vector<1x8x16xf32>
    tpu.vector_store %arg6[%c0_9, %c0_10, %c0_11], %20 {strides = array<i32>} : memref<1x8x16xf32, #tpu.memory_space<vmem>>, vector<1x8x16xf32>,
    %21 = vector.extract_strided_slice %14 {offsets = [0, 384], sizes = [8, 16], strides = [1, 1]} : vector<8x512xf32> to vector<8x16xf32>
    %c0_12 = arith.constant 0 : index
    %c0_13 = arith.constant 0 : index
    %c0_14 = arith.constant 0 : index
    %22 = vector.load %arg7[%c0_12, %c0_13, %c0_14] : memref<1x8x16xf32, #tpu.memory_space<vmem>>, vector<1x8x16xf32>
    %23 = vector.shape_cast %22 : vector<1x8x16xf32> to vector<8x16xf32>
    %24 = vector.shape_cast %21 : vector<8x16xf32> to vector<1x8x16xf32>
    tpu.vector_store %arg7[%c0_12, %c0_13, %c0_14], %24 {strides = array<i32>} : memref<1x8x16xf32, #tpu.memory_space<vmem>>, vector<1x8x16xf32>,
    %c0_15 = arith.constant 0 : index
    %c0_16 = arith.constant 0 : index
    %25 = vector.load %arg4[%c0_15, %c0_16] : memref<128x128xf32, #tpu.memory_space<vmem>>, vector<128x128xf32>
    %cst_17 = arith.constant dense<0.000000e+00> : vector<8x128xf32>
    %26 = tpu.matmul %15, %25, %cst_17 {dimension_numbers = #tpu.dot_dimension_numbers<[1], [0], [0], [1], [0, 0, 1, 1], [], []>} : vector<8x128xf32>, vector<128x128xf32>, vector<8x128xf32> -> vector<8x128xf32>
    %cst_18 = arith.constant dense<0.000000e+00> : vector<8x8xf32>
    %27 = tpu.matmul %26, %16, %cst_18 {dimension_numbers = #tpu.dot_dimension_numbers<[1], [1], [0], [0], [0, 0, 1, 0], [], []>} : vector<8x128xf32>, vector<8x128xf32>, vector<8x8xf32> -> vector<8x8xf32>
    %c0_19 = arith.constant 0 : index
    %c0_20 = arith.constant 0 : index
    %c0_21 = arith.constant 0 : index
    %28 = vector.load %arg5[%c0_19, %c0_20, %c0_21] : memref<1x8x8xf32, #tpu.memory_space<vmem>>, vector<1x8x8xf32>
    %29 = vector.shape_cast %28 : vector<1x8x8xf32> to vector<8x8xf32>
    %30 = vector.shape_cast %27 : vector<8x8xf32> to vector<1x8x8xf32>
    tpu.vector_store %arg5[%c0_19, %c0_20, %c0_21], %30 {strides = array<i32>} : memref<1x8x8xf32, #tpu.memory_space<vmem>>, vector<1x8x8xf32>,
    return
  }
  func.func @transform_0(%arg0: i32) -> (i32, i32, i32) {
    %c0_i32 = arith.constant 0 : i32
    %c0_i32_0 = arith.constant 0 : i32
    %c0_i32_1 = arith.constant 0 : i32
    return %arg0, %c0_i32, %c0_i32_0 : i32, i32, i32
  }
  func.func @transform_1(%arg0: i32) -> (i32, i32) {
    %c0_i32 = arith.constant 0 : i32
    %c0_i32_0 = arith.constant 0 : i32
    %c0_i32_1 = arith.constant 0 : i32
    return %c0_i32, %c0_i32_0 : i32, i32
  }
  func.func @transform_2(%arg0: i32) -> (i32, i32) {
    %c0_i32 = arith.constant 0 : i32
    %c0_i32_0 = arith.constant 0 : i32
    %c0_i32_1 = arith.constant 0 : i32
    return %c0_i32, %c0_i32_0 : i32, i32
  }
  func.func @transform_3(%arg0: i32) -> (i32, i32) {
    %c0_i32 = arith.constant 0 : i32
    %c0_i32_0 = arith.constant 0 : i32
    %c0_i32_1 = arith.constant 0 : i32
    return %c0_i32, %c0_i32_0 : i32, i32
  }
  func.func @transform_4(%arg0: i32) -> (i32, i32, i32) {
    %c0_i32 = arith.constant 0 : i32
    %c0_i32_0 = arith.constant 0 : i32
    %c0_i32_1 = arith.constant 0 : i32
    return %arg0, %c0_i32, %c0_i32_0 : i32, i32, i32
  }
  func.func @transform_5(%arg0: i32) -> (i32, i32, i32) {
    %c0_i32 = arith.constant 0 : i32
    %c0_i32_0 = arith.constant 0 : i32
    %c0_i32_1 = arith.constant 0 : i32
    return %arg0, %c0_i32, %c0_i32_0 : i32, i32, i32
  }
  func.func @transform_6(%arg0: i32) -> (i32, i32, i32) {
    %c0_i32 = arith.constant 0 : i32
    %c0_i32_0 = arith.constant 0 : i32
    %c0_i32_1 = arith.constant 0 : i32
    return %arg0, %c0_i32, %c0_i32_0 : i32, i32, i32
  }
}

</mosaic_0001>

<bundles_post_ra>
// kernel: forward.4
= control target key start
LH: loop header
LB: loop body
LE: loop exit
PB: predicated region body
PF: predicated region fallthrough
CT: control target
= control target key end

     0   :  { %v251_v3 = vmov 0.0   ;;  %vm40_vm0 = vcmask 785408   ;;  %s252_s10 = smov 96   ;;  %s254_s11 = smov 80   ;;  %vm205_vm1 = vcmask 130048   ;;  %s366_s1 = inlined_call_operand.vmem [shape: f32[96,160], index: 1, kind: input, shape index: {}]   ;;  %s367_s0 = inlined_call_operand.vmem [shape: f32[16,96], index: 0, kind: input, shape index: {}]   ;;  %s368_s2 = inlined_call_operand.vmem [shape: f32[1,16], index: 2, kind: input, shape index: {}]   ;;  %s369_s3 = inlined_call_operand.vmem [shape: f32[16,16], index: 3, kind: output, shape index: {}]  }
   0x1   :  { %v39_v0 = vld [vmem:[%s366_s1 + $0xb8] sm:$0xff]  ;;  %v38_v1 = vld [vmem:[%s366_s1 + $0xb0] sm:$0xff]  ;;  %v37_v2 = vld [vmem:[%s366_s1 + $0xa8] sm:$0xff]  ;;  %111 = vmatprep.mubr.f32.mxu0 %v251_v3  ;;  %117 = vmatprep.mubr.f32.mxu1 %v251_v3  ;;  %s255_s12 = smov 64   ;;  %s257_s13 = smov 32  }
   0x2   :  { %55 = vmatprep.subr.mxu0 %v39_v0  ;;  %215 = vmatprep.subr.mxu1 %v39_v0  ;;  %v36_v4 = vld [vmem:[%s366_s1 + $0xa0] sm:$0xff]  ;;  %v35_v5 = vld [vmem:[%s366_s1 + $0x98] sm:$0xff]  ;;  %v34_v6 = vld [vmem:[%s366_s1 + $0x90] sm:$0xff]  ;;  %s258_s14 = smov 16  }
   0x3   :  { %56 = vmatpush1.msra.mxu0 %v38_v1  ;;  %227 = vmatpush1.msra.mxu1 %v38_v1  ;;  %v33_v7 = vld [vmem:[%s366_s1 + $0x88] sm:$0xff]  ;;  %v32_v8 = vld [vmem:[%s366_s1 + $0x80] sm:$0xff]  ;;  %v31_v9 = vld [vmem:[%s366_s1 + $0x78] sm:$0xff] }
   0x4   :  { %57 = vmatprep.subr.mxu0 %v37_v2  ;;  %216 = vmatprep.subr.mxu1 %v37_v2  ;;  %v30_v10 = vld [vmem:[%s366_s1 + $0x70] sm:$0xff]  ;;  %v29_v11 = vld [vmem:[%s366_s1 + $0x68] sm:$0xff]  ;;  %v28_v12 = vld [vmem:[%s366_s1 + $0x60] sm:$0xff] }
   0x5   :  { %58 = vmatpush1.msra.mxu0 %v36_v4  ;;  %228 = vmatpush1.msra.mxu1 %v36_v4  ;;  %v27_v13 = vld [vmem:[%s366_s1 + $0x58] sm:$0xff]  ;;  %v26_v14 = vld [vmem:[%s366_s1 + $0x50] sm:$0xff]  ;;  %v25_v15 = vld [vmem:[%s366_s1 + $0x48] sm:$0xff] }
   0x6   :  { %59 = vmatprep.subr.mxu0 %v35_v5  ;;  %217 = vmatprep.subr.mxu1 %v35_v5  ;;  %v24_v16 = vld [vmem:[%s366_s1 + $0x40] sm:$0xff]  ;;  %v23_v17 = vld [vmem:[%s366_s1 + $0x38] sm:$0xff]  ;;  %v22_v18 = vld [vmem:[%s366_s1 + $0x30] sm:$0xff] }
   0x7   :  { %60 = vmatpush1.msra.mxu0 %v34_v6  ;;  %229 = vmatpush1.msra.mxu1 %v34_v6  ;;  %v21_v19 = vld [vmem:[%s366_s1 + $0x28] sm:$0xff]  ;;  %v20_v20 = vld [vmem:[%s366_s1 + $0x20] sm:$0xff]  ;;  %v19_v21 = vld [vmem:[%s366_s1 + $0x18] sm:$0xff] }
   0x8   :  { %61 = vmatprep.subr.mxu0 %v33_v7  ;;  %218 = vmatprep.subr.mxu1 %v33_v7  ;;  %v18_v22 = vld [vmem:[%s366_s1 + $0x10] sm:$0xff]  ;;  %v17_v23 = vld [vmem:[%s366_s1 + $0x8] sm:$0xff]  ;;  %v16_v24 = vld [vmem:[%s366_s1] sm:$0xff]  ;;  %s253_s1 = smov 112  }
   0x9   :  { %62 = vmatpush1.msra.mxu0 %v32_v8  ;;  %230 = vmatpush1.msra.mxu1 %v32_v8  ;;  %v14_v25 = vld [vmem:[%s367_s0] sm:$0xff]  ;;  %v15_v26 = vld [vmem:[%s367_s0 + $0x8] sm:$0xff]  ;;  %s256_s0 = smov 48  }
   0xa   :  { %63 = vmatprep.subr.mxu0 %v31_v9  ;;  %219 = vmatprep.subr.mxu1 %v31_v9  ;;  %v214_v61 = vld [vmem:[%s368_s2] ss:$0 sm:$0xff] }
   0xb   :  { %64 = vmatpush1.msra.mxu0 %v30_v10  ;;  %231 = vmatpush1.msra.mxu1 %v30_v10 }
   0xc   :  { %65 = vmatprep.subr.mxu0 %v29_v11  ;;  %220 = vmatprep.subr.mxu1 %v29_v11 }
   0xd   :  { %66 = vmatpush1.msra.mxu0 %v28_v12  ;;  %232 = vmatpush1.msra.mxu1 %v28_v12 }
   0xe   :  { %67 = vmatprep.subr.mxu0 %v27_v13  ;;  %221 = vmatprep.subr.mxu1 %v27_v13 }
   0xf   :  { %68 = vmatpush1.msra.mxu0 %v26_v14  ;;  %233 = vmatpush1.msra.mxu1 %v26_v14 }
  0x10   :  { %69 = vmatprep.subr.mxu0 %v25_v15  ;;  %222 = vmatprep.subr.mxu1 %v25_v15 }
  0x11   :  { %70 = vmatpush1.msra.mxu0 %v24_v16  ;;  %234 = vmatpush1.msra.mxu1 %v24_v16 }
  0x12   :  { %71 = vmatprep.subr.mxu0 %v23_v17  ;;  %223 = vmatprep.subr.mxu1 %v23_v17 }
  0x13   :  { %72 = vmatpush1.msra.mxu0 %v22_v18  ;;  %235 = vmatpush1.msra.mxu1 %v22_v18 }
  0x14   :  { %73 = vmatprep.subr.mxu0 %v21_v19  ;;  %224 = vmatprep.subr.mxu1 %v21_v19 }
  0x15   :  { %74 = vmatpush1.msra.mxu0 %v20_v20  ;;  %236 = vmatpush1.msra.mxu1 %v20_v20 }
  0x16   :  { %75 = vmatprep.subr.mxu0 %v19_v21  ;;  %225 = vmatprep.subr.mxu1 %v19_v21 }
  0x17   :  { %76 = vmatpush1.msra.mxu0 %v18_v22  ;;  %237 = vmatpush1.msra.mxu1 %v18_v22 }
  0x18   :  { %77 = vmatprep.subr.mxu0 %v17_v23  ;;  %226 = vmatprep.subr.mxu1 %v17_v23 }
  0x19   :  { %78 = vmatpush1.msra.mxu0 %v16_v24  ;;  %238 = vmatpush1.msra.mxu1 %v16_v24 }
  0x1a   :  { %212 = vmatmul.mubr.msk.f32.vlgmr.msra.gmra.mxu0 %vm40_vm0, %v14_v25  ;;  %213 = vmatmul.mubr.msk.f32.vlgmr.msra.gmra.mxu1 %vm40_vm0, %v15_v26 }
  0xda   :  { %v113_v27 = vpop.f32.mrf.mxu0  ;;  %v119_v28 = vpop.f32.mrf.mxu1 }
  0xdb   :  { %134 = vrot.lane.b32.xlu1 %v113_v27, %s252_s10  ;;  %126 = vrot.lane.b32.xlu0 %v113_v27, %s253_s1 }
  0xdc   :  { %v115_v29 = vpop.f32.mrf.mxu0  ;;  %v121_v30 = vpop.f32.mrf.mxu1 }
  0xdf   :  { %136 = vrot.lane.b32.xlu1 %v119_v28, %s252_s10  ;;  %128 = vrot.lane.b32.xlu0 %v119_v28, %s253_s1 }
  0xe3   :  { %144 = vrot.lane.b32.xlu1 %v119_v28, %s254_s11  ;;  %142 = vrot.lane.b32.xlu0 %v113_v27, %s254_s11 }
  0xe7   :  { %152 = vrot.lane.b32.xlu1 %v119_v28, %s255_s12  ;;  %150 = vrot.lane.b32.xlu0 %v113_v27, %s255_s12 }
  0xeb   :  { %160 = vrot.lane.b32.xlu1 %v119_v28, %s256_s0  ;;  %158 = vrot.lane.b32.xlu0 %v113_v27, %s256_s0 }
  0xef   :  { %168 = vrot.lane.b32.xlu1 %v119_v28, %s257_s13  ;;  %166 = vrot.lane.b32.xlu0 %v113_v27, %s257_s13 }
  0xf3   :  { %176 = vrot.lane.b32.xlu1 %v119_v28, %s258_s14  ;;  %174 = vrot.lane.b32.xlu0 %v113_v27, %s258_s14 }
  0xf7   :  { %188 = vrot.lane.b32.xlu1 %v121_v30, %s253_s1  ;;  %186 = vrot.lane.b32.xlu0 %v115_v29, %s253_s1 }
 0x14d   :  { %v135_v31 = vpop.permute.xlu1 %134  ;;  %v127_v32 = vpop.permute.xlu0 %126 }
 0x14e   :  { %v132_v38 = vmax.f32 %v113_v27, %v127_v32 }
 0x150   :  { %v140_v42 = vmax.f32 %v132_v38, %v135_v31 }
 0x151   :  { %v137_v33 = vpop.permute.xlu1 %136  ;;  %v129_v34 = vpop.permute.xlu0 %128 }
 0x152   :  { %v133_v37 = vmax.f32 %v119_v28, %v129_v34 }
 0x154   :  { %v141_v41 = vmax.f32 %v133_v37, %v137_v33 }
 0x155   :  { %v145_v35 = vpop.permute.xlu1 %144  ;;  %v143_v36 = vpop.permute.xlu0 %142 }
 0x156   :  { %v149_v45 = vmax.f32 %v141_v41, %v145_v35  ;;  %v148_v46 = vmax.f32 %v140_v42, %v143_v36 }
 0x159   :  { %v153_v39 = vpop.permute.xlu1 %152  ;;  %v151_v40 = vpop.permute.xlu0 %150 }
 0x15a   :  { %v157_v47 = vmax.f32 %v149_v45, %v153_v39  ;;  %v156_v48 = vmax.f32 %v148_v46, %v151_v40 }
 0x15d   :  { %v161_v43 = vpop.permute.xlu1 %160  ;;  %v159_v44 = vpop.permute.xlu0 %158 }
 0x15e   :  { %v165_v51 = vmax.f32 %v157_v47, %v161_v43  ;;  %v164_v52 = vmax.f32 %v156_v48, %v159_v44 }
 0x161   :  { %v169_v49 = vpop.permute.xlu1 %168  ;;  %v167_v50 = vpop.permute.xlu0 %166 }
 0x162   :  { %v173_v53 = vmax.f32 %v165_v51, %v169_v49  ;;  %v172_v54 = vmax.f32 %v164_v52, %v167_v50 }
 0x165   :  { %v177_v55 = vpop.permute.xlu1 %176  ;;  %v175_v56 = vpop.permute.xlu0 %174 }
 0x166   :  { %v181_v57 = vmax.f32 %v173_v53, %v177_v55  ;;  %v180_v58 = vmax.f32 %v172_v54, %v175_v56 }
 0x168   :  { %v183_v59 = vmax.f32 %v181_v57, %v121_v30  ;;  %v182_v60 = vmax.f32 %v180_v58, %v115_v29 }
 0x169   :  { %v189_v62 = vpop.permute.xlu1 %188  ;;  %v187_v63 = vpop.permute.xlu0 %186 }
 0x16a   :  { %v193_v0 = vmax.f32 %v183_v59, %v189_v62  ;;  %v192_v1 = vmax.f32 %v182_v60, %v187_v63 }
 0x16c   :  { %v202_v2 = vadd.f32 %v214_v61, %v193_v0  ;;  %v201_v3 = vadd.f32 %v214_v61, %v192_v1 }
 0x16e   :  { %247 = vtanh.f32 %v202_v2 }
 0x16f   :  { %249 = vtanh.f32 %v201_v3 }
 0x17b   :  { %v248_v4 = vpop.eup %247 }
 0x17c   :  { %v250_v5 = vpop.eup %249  ;;  %207 = vst.msk [vmem:[%s369_s3 + $0x8] sm:$0xff] %vm205_vm1, %v248_v4 }
 0x17d   :  { %206 = vst.msk [vmem:[%s369_s3] sm:$0xff] %vm205_vm1, %v250_v5 }

// kernel: forward.5
= control target key start
LH: loop header
LB: loop body
LE: loop exit
PB: predicated region body
PF: predicated region fallthrough
CT: control target
= control target key end

     0   :  { %v143_v3 = vmov 0.0   ;;  %vm38_vm0 = vcmask 326656   ;;  %v28_v13 = vlaneseq  ;;  %s215_s1 = inlined_call_operand.vmem [shape: f32[40,256], index: 1, kind: input, shape index: {}]   ;;  %s216_s0 = inlined_call_operand.vmem [shape: f32[16,40], index: 0, kind: input, shape index: {}]   ;;  %s217_s2 = inlined_call_operand.vmem [shape: f32[1,256], index: 2, kind: input, shape index: {}]   ;;  %s218_s3 = inlined_call_operand.vmem [shape: f32[16,256], index: 3, kind: output, shape index: {}]  }
   0x1   :  { %v25_v0 = vld [vmem:[%s215_s1 + $0x48] sm:$0xff]  ;;  %v24_v1 = vld [vmem:[%s215_s1 + $0x40] sm:$0xff]  ;;  %v23_v2 = vld [vmem:[%s215_s1 + $0x38] sm:$0xff]  ;;  %109 = vmatprep.mubr.f32.mxu0 %v143_v3  ;;  %115 = vmatprep.mubr.f32.mxu1 %v143_v3 }
   0x2   :  { %67 = vmatprep.subr.mxu0 %v25_v0  ;;  %132 = vmatprep.subr.mxu1 %v25_v0  ;;  %v22_v4 = vld [vmem:[%s215_s1 + $0x30] sm:$0xff]  ;;  %v21_v5 = vld [vmem:[%s215_s1 + $0x28] sm:$0xff]  ;;  %v20_v6 = vld [vmem:[%s215_s1 + $0x20] sm:$0xff]  ;;  %v29_v14 = vshrl.u32 %v28_v13, 7 }
   0x3   :  { %68 = vmatpush1.msra.mxu0 %v24_v1  ;;  %137 = vmatpush1.msra.mxu1 %v24_v1  ;;  %v19_v7 = vld [vmem:[%s215_s1 + $0x18] sm:$0xff]  ;;  %v18_v8 = vld [vmem:[%s215_s1 + $0x10] sm:$0xff]  ;;  %v17_v9 = vld [vmem:[%s215_s1 + $0x8] sm:$0xff] }
   0x4   :  { %69 = vmatprep.subr.mxu0 %v23_v2  ;;  %133 = vmatprep.subr.mxu1 %v23_v2  ;;  %v16_v10 = vld [vmem:[%s215_s1] sm:$0xff]  ;;  %v15_v12 = vld [vmem:[%s216_s0 + $0x8] sm:$0xff]  ;;  %v30_v15 = vsub.s32 0, %v29_v14  ;;  %v34_v17 = vsub.s32 1, %v29_v14 }
   0x5   :  { %70 = vmatpush1.msra.mxu0 %v22_v4  ;;  %138 = vmatpush1.msra.mxu1 %v22_v4  ;;  %v14_v11 = vld [vmem:[%s216_s0] sm:$0xff] }
   0x6   :  { %71 = vmatprep.subr.mxu0 %v21_v5  ;;  %134 = vmatprep.subr.mxu1 %v21_v5  ;;  %v26_v16 = vld [vmem:[%s217_s2] sm:$0x3] }
   0x7   :  { %72 = vmatpush1.msra.mxu0 %v20_v6  ;;  %139 = vmatpush1.msra.mxu1 %v20_v6  ;;  %v31_v18 = vrot.slane %v26_v16, %v30_v15  ;;  %v35_v19 = vrot.slane %v26_v16, %v34_v17 }
   0x8   :  { %73 = vmatprep.subr.mxu0 %v19_v7  ;;  %135 = vmatprep.subr.mxu1 %v19_v7 }
   0x9   :  { %74 = vmatpush1.msra.mxu0 %v18_v8  ;;  %140 = vmatpush1.msra.mxu1 %v18_v8 }
   0xa   :  { %75 = vmatprep.subr.mxu0 %v17_v9  ;;  %136 = vmatprep.subr.mxu1 %v17_v9 }
   0xb   :  { %76 = vmatpush1.msra.mxu0 %v16_v10  ;;  %141 = vmatpush1.msra.mxu1 %v16_v10 }
   0xc   :  { %130 = vmatmul.mubr.msk.f32.vlgmr.msra.gmra.mxu0 %vm38_vm0, %v14_v11  ;;  %131 = vmatmul.mubr.msk.f32.vlgmr.msra.gmra.mxu1 %vm38_vm0, %v15_v12 }
  0xcc   :  { %v111_v20 = vpop.f32.mrf.mxu0  ;;  %v117_v21 = vpop.f32.mrf.mxu1 }
  0xcd   :  { %v112_v22 = vadd.f32 %v111_v20, %v31_v18  ;;  %v118_v23 = vadd.f32 %v117_v21, %v31_v18 }
  0xce   :  { %v113_v24 = vpop.f32.mrf.mxu0  ;;  %v119_v25 = vpop.f32.mrf.mxu1 }
  0xcf   :  { %122 = vst [vmem:[%s218_s3] sm:$0xff] %v112_v22  ;;  %124 = vst [vmem:[%s218_s3 + $0x10] sm:$0xff] %v118_v23  ;;  %v114_v26 = vadd.f32 %v113_v24, %v35_v19  ;;  %v120_v27 = vadd.f32 %v119_v25, %v35_v19 }
  0xd1   :  { %123 = vst [vmem:[%s218_s3 + $0x8] sm:$0xff] %v114_v26  ;;  %125 = vst [vmem:[%s218_s3 + $0x18] sm:$0xff] %v120_v27 }

// kernel: forward.6
= control target key start
LH: loop header
LB: loop body
LE: loop exit
PB: predicated region body
PF: predicated region fallthrough
CT: control target
= control target key end

     0   :  { %v1463_v3 = vmov 0.0   ;;  %s1464_s16 = smov 64   ;;  %s1465_s17 = smov 32   ;;  %v1466_v46 = vmov 1983009808   ;;  %v134_v48 = vlaneseq  ;;  %vm141_vm0 = vcmask 254976   ;;  %s1947_s1 = inlined_call_operand.vmem [shape: f32[64,256], index: 1, kind: input, shape index: {}]   ;;  %s1948_s0 = inlined_call_operand.vmem [shape: f32[8,2,256], index: 0, kind: input, shape index: {}]   ;;  %s1949_s2 = inlined_call_operand.vmem [shape: f32[8,2,64], index: 2, kind: output, shape index: {}]  }
   0x1   :  { %v1485_v0 = vld [vmem:[%s1947_s1 + $0x78] sm:$0xff]  ;;  %v1490_v1 = vld [vmem:[%s1947_s1 + $0x70] sm:$0xff]  ;;  %v1495_v2 = vld [vmem:[%s1947_s1 + $0x68] sm:$0xff]  ;;  %98 = vmatprep.mubr.f32.mxu0 %v1463_v3  ;;  %258 = vmatprep.mubr.f32.mxu1 %v1463_v3  ;;  %v132_v47 = vunpack.c.l.s4 %v1466_v46  ;;  %vm183_vm1 = vcmask 517376   ;;  %vm189_vm2 = vcmask 261120   ;;  %vm30_vm3 = vcmask 523264  }
   0x2   :  { %50 = vmatprep.subr.mxu0 %v1485_v0  ;;  %v1503_v4 = vld [vmem:[%s1947_s1 + $0x60] sm:$0xff]  ;;  %210 = vmatprep.subr.mxu1 %v1485_v0  ;;  %v1510_v5 = vld [vmem:[%s1947_s1 + $0x58] sm:$0xff]  ;;  %v1517_v6 = vld [vmem:[%s1947_s1 + $0x50] sm:$0xff]  ;;  %v135_v50 = vshrl.u32 %v134_v48, 7 }
   0x3   :  { %51 = vmatpush1.msra.mxu0 %v1490_v1  ;;  %211 = vmatpush1.msra.mxu1 %v1490_v1  ;;  %v1524_v7 = vld [vmem:[%s1947_s1 + $0x48] sm:$0xff]  ;;  %v1531_v8 = vld [vmem:[%s1947_s1 + $0x40] sm:$0xff]  ;;  %v1538_v9 = vld [vmem:[%s1947_s1 + $0x38] sm:$0xff]  ;;  %v133_v49 = vunpack.c.0.s8 %v132_v47 }
   0x4   :  { %52 = vmatprep.subr.mxu0 %v1495_v2  ;;  %212 = vmatprep.subr.mxu1 %v1495_v2  ;;  %v1545_v10 = vld [vmem:[%s1947_s1 + $0x30] sm:$0xff]  ;;  %v1552_v11 = vld [vmem:[%s1947_s1 + $0x28] sm:$0xff]  ;;  %v1559_v12 = vld [vmem:[%s1947_s1 + $0x20] sm:$0xff] }
   0x5   :  { %53 = vmatpush1.msra.mxu0 %v1503_v4  ;;  %213 = vmatpush1.msra.mxu1 %v1503_v4  ;;  %v1566_v13 = vld [vmem:[%s1947_s1 + $0x18] sm:$0xff]  ;;  %v1573_v14 = vld [vmem:[%s1947_s1 + $0x10] sm:$0xff]  ;;  %v1580_v15 = vld [vmem:[%s1947_s1 + $0x8] sm:$0xff]  ;;  %v1634_v51 = vsub.s32 %v133_v49, %v135_v50 }
   0x6   :  { %54 = vmatprep.subr.mxu0 %v1510_v5  ;;  %214 = vmatprep.subr.mxu1 %v1510_v5  ;;  %v1587_v16 = vld [vmem:[%s1947_s1] sm:$0xff]  ;;  %v1280_v17 = vld [vmem:[%s1948_s0 + $0x1c] sm:$0xf]  ;;  %v1285_v61 = vld [vmem:[%s1948_s0 + $0x18] sm:$0xf] }
   0x7   :  { %55 = vmatpush1.msra.mxu0 %v1517_v6  ;;  %215 = vmatpush1.msra.mxu1 %v1517_v6  ;;  %v27_v18 = vld [vmem:[%s1948_s0] sm:$0xf]  ;;  %v144_v19 = vrot.slane %v1280_v17, 2  ;;  %v1284_v62 = vld [vmem:[%s1948_s0 + $0x4] sm:$0xf]  ;;  %v304_v63 = vrot.slane %v1285_v61, 2 }
   0x8   :  { %56 = vmatprep.subr.mxu0 %v1524_v7  ;;  %216 = vmatprep.subr.mxu1 %v1524_v7 }
   0x9   :  { %57 = vmatpush1.msra.mxu0 %v1531_v8  ;;  %217 = vmatpush1.msra.mxu1 %v1531_v8 }
   0xa   :  { %58 = vmatprep.subr.mxu0 %v1538_v9  ;;  %218 = vmatprep.subr.mxu1 %v1538_v9 }
   0xb   :  { %59 = vmatpush1.msra.mxu0 %v1545_v10  ;;  %219 = vmatpush1.msra.mxu1 %v1545_v10 }
   0xc   :  { %60 = vmatprep.subr.mxu0 %v1552_v11  ;;  %220 = vmatprep.subr.mxu1 %v1552_v11 }
   0xd   :  { %61 = vmatpush1.msra.mxu0 %v1559_v12  ;;  %221 = vmatpush1.msra.mxu1 %v1559_v12 }
   0xe   :  { %62 = vmatprep.subr.mxu0 %v1566_v13  ;;  %222 = vmatprep.subr.mxu1 %v1566_v13 }
   0xf   :  { %63 = vmatpush1.msra.mxu0 %v1573_v14  ;;  %223 = vmatpush1.msra.mxu1 %v1573_v14 }
  0x10   :  { %64 = vmatprep.subr.mxu0 %v1580_v15  ;;  %224 = vmatprep.subr.mxu1 %v1580_v15 }
  0x11   :  { %65 = vmatpush1.msra.mxu0 %v1587_v16  ;;  %225 = vmatpush1.msra.mxu1 %v1587_v16 }
  0x12   :  { %99 = vmatmul.mubr.f32.vlgmr.msra.gmra.mxu0 %v1463_v3  ;;  %368 = vmatprep.subr.mxu0 %v1485_v0 }
  0x13   :  { %369 = vmatpush1.msra.mxu0 %v1490_v1  ;;  %416 = vmatprep.mubr.f32.mxu0 %v1463_v3 }
  0x14   :  { %370 = vmatprep.subr.mxu0 %v1495_v2  ;;  %526 = vmatprep.subr.mxu1 %v1485_v0 }
  0x15   :  { %371 = vmatpush1.msra.mxu0 %v1503_v4 }
  0x16   :  { %372 = vmatprep.subr.mxu0 %v1510_v5 }
  0x17   :  { %373 = vmatpush1.msra.mxu0 %v1517_v6 }
  0x18   :  { %374 = vmatprep.subr.mxu0 %v1524_v7 }
  0x19   :  { %375 = vmatpush1.msra.mxu0 %v1531_v8 }
  0x1a   :  { %376 = vmatprep.subr.mxu0 %v1538_v9 }
  0x1b   :  { %377 = vmatpush1.msra.mxu0 %v1545_v10 }
  0x1c   :  { %378 = vmatprep.subr.mxu0 %v1552_v11 }
  0x1d   :  { %379 = vmatpush1.msra.mxu0 %v1559_v12 }
  0x1e   :  { %380 = vmatprep.subr.mxu0 %v1566_v13 }
  0x1f   :  { %381 = vmatpush1.msra.mxu0 %v1573_v14 }
  0x20   :  { %382 = vmatprep.subr.mxu0 %v1580_v15 }
  0x21   :  { %383 = vmatpush1.msra.mxu0 %v1587_v16 }
  0x22   :  { %682 = vmatprep.subr.mxu0 %v1485_v0 }
  0xd2   :  { %v100_v20 = vpop.f32.mrf.mxu0 }
  0xd3   :  { %v105_v21 = vadd.f32 %v100_v20, %v27_v18 }
  0xd4   :  { %v102_v22 = vpop.f32.mrf.mxu0 }
  0xd5   :  { %1335 = vtanh.f32 %v105_v21  ;;  %v146_v23 = vadd.f32 %v144_v19, %v102_v22  ;;  %v1281_v26 = vmul.f32 -1.442695, %v105_v21 }
  0xd7   :  { %1337 = vtanh.f32 %v146_v23  ;;  %v1282_v27 = vmul.f32 -1.442695, %v146_v23 }
  0xd8   :  { %1339 = vpow2.f32 %v1281_v26 }
  0xd9   :  { %1341 = vpow2.f32 %v1282_v27 }
  0xe2   :  { %v1336_v24 = vpop.eup %1335 }
  0xe3   :  { %115 = vrot.lane.b32.xlu0 %v1336_v24, %s1464_s16 }
  0xe4   :  { %v1338_v25 = vpop.eup %1337 }
  0xe5   :  { %v1340_v28 = vpop.eup %1339 }
  0xe6   :  { %v109_v29 = vadd.f32 1.0, %v1340_v28  ;;  %v1342_v30 = vpop.eup %1341 }
  0xe7   :  { %156 = vrot.lane.b32.xlu0 %v1338_v25, %s1464_s16  ;;  %v150_v31 = vadd.f32 1.0, %v1342_v30 }
  0xe8   :  { %1343 = vrcp.f32 %v109_v29 }
  0xe9   :  { %1345 = vrcp.f32 %v150_v31 }
  0xf5   :  { %v1344_v32 = vpop.eup %1343 }
  0xf6   :  { %v1346_v35 = vpop.eup %1345  ;;  %v113_v38 = vmul.f32 0.0, %v1344_v32 }
  0xf7   :  { %v154_v41 = vmul.f32 0.0, %v1346_v35 }
 0x155   :  { %v116_v33 = vpop.permute.xlu0 %115 }
 0x156   :  { %v118_v34 = vmul.f32 %v1344_v32, %v116_v33 }
 0x158   :  { %120 = vrot.lane.b32.xlu1 %v118_v34, %s1465_s17 }
 0x159   :  { %v157_v36 = vpop.permute.xlu0 %156 }
 0x15a   :  { %v159_v37 = vmul.f32 %v1346_v35, %v157_v36 }
 0x15c   :  { %161 = vrot.lane.b32.xlu1 %v159_v37, %s1465_s17 }
 0x1ca   :  { %v121_v39 = vpop.permute.xlu1 %120 }
 0x1cb   :  { %v1626_v40 = vadd.f32 %v121_v39, %v113_v38 }
 0x1cd   :  { %1347 = vtanh.f32 %v1626_v40 }
 0x1ce   :  { %v162_v42 = vpop.permute.xlu1 %161 }
 0x1cf   :  { %v1629_v43 = vadd.f32 %v162_v42, %v154_v41 }
 0x1d1   :  { %1349 = vtanh.f32 %v1629_v43 }
 0x1da   :  { %v1348_v44 = vpop.eup %1347 }
 0x1db   :  { %126 = vrot.lane.b32.xlu0 %v1348_v44, %s1464_s16 }
 0x1de   :  { %v1350_v45 = vpop.eup %1349 }
 0x1df   :  { %167 = vrot.lane.b32.xlu1 %v1350_v45, %s1464_s16 }
 0x24d   :  { %v127_v52 = vpop.permute.xlu0 %126 }
 0x24e   :  { %v129_v53 = vmul.f32 %v1344_v32, %v127_v52 }
 0x250   :  { %v137_v54 = vrot.slane %v129_v53, %v1634_v51  ;;  %v1292_v53 = vld [vmem:[%s1948_s0 + $0x14] sm:$0xf] }
 0x251   :  { %v168_v55 = vpop.permute.xlu1 %167 }
 0x252   :  { %v170_v56 = vmul.f32 %v1346_v35, %v168_v55  ;;  %138 = vrot.lane.b32.xlu0 %v137_v54, %s1465_s17  ;;  %v1291_v54 = vld [vmem:[%s1948_s0 + $0x8] sm:$0xf]  ;;  %v462_v55 = vrot.slane %v1292_v53, 2 }
 0x254   :  { %v178_v57 = vrot.slane %v170_v56, %v1634_v51 }
 0x256   :  { %179 = vrot.lane.b32.xlu1 %v178_v57, %s1464_s16 }
 0x2c4   :  { %v139_v58 = vpop.permute.xlu0 %138 }
 0x2c5   :  { %142 = vst.msk [vmem:[%s1949_s2] sm:$0x3] %vm141_vm0, %v139_v58 }
 0x2c8   :  { %v180_v59 = vpop.permute.xlu1 %179 }
 0x2c9   :  { %1283 = vst.msk [vmem:[%s1949_s2 + $0xe] sm:$0x3] %vm183_vm1, %v180_v59  ;;  %v190_v60 = vsel %vm189_vm2, %v139_v58, %v180_v59 }
 0x2ca   :  { %1286 = vmatmul.mubr.msk.f32.vlgmr.msra.gmra.mxu1 %vm30_vm3, %v190_v60 }
 0x2cb   :  { %527 = vmatpush1.msra.mxu1 %v1490_v1  ;;  %574 = vmatprep.mubr.f32.mxu1 %v1463_v3 }
 0x2cc   :  { %528 = vmatprep.subr.mxu1 %v1495_v2 }
 0x2cd   :  { %529 = vmatpush1.msra.mxu1 %v1503_v4 }
 0x2ce   :  { %530 = vmatprep.subr.mxu1 %v1510_v5 }
 0x2cf   :  { %531 = vmatpush1.msra.mxu1 %v1517_v6 }
 0x2d0   :  { %532 = vmatprep.subr.mxu1 %v1524_v7 }
 0x2d1   :  { %533 = vmatpush1.msra.mxu1 %v1531_v8 }
 0x2d2   :  { %534 = vmatprep.subr.mxu1 %v1538_v9 }
 0x2d3   :  { %535 = vmatpush1.msra.mxu1 %v1545_v10 }
 0x2d4   :  { %536 = vmatprep.subr.mxu1 %v1552_v11 }
 0x2d5   :  { %537 = vmatpush1.msra.mxu1 %v1559_v12 }
 0x2d6   :  { %538 = vmatprep.subr.mxu1 %v1566_v13 }
 0x2d7   :  { %539 = vmatpush1.msra.mxu1 %v1573_v14 }
 0x2d8   :  { %540 = vmatprep.subr.mxu1 %v1580_v15 }
 0x2d9   :  { %541 = vmatpush1.msra.mxu1 %v1587_v16 }
 0x2da   :  { %836 = vmatprep.subr.mxu1 %v1485_v0 }
 0x38a   :  { %v260_v17 = vpop.f32.mrf.mxu1 }
 0x38b   :  { %v265_v18 = vadd.f32 %v1284_v62, %v260_v17 }
 0x38c   :  { %v262_v19 = vpop.f32.mrf.mxu1 }
 0x38d   :  { %1351 = vtanh.f32 %v265_v18  ;;  %v306_v20 = vadd.f32 %v304_v63, %v262_v19  ;;  %v1287_v23 = vmul.f32 -1.442695, %v265_v18 }
 0x38f   :  { %1353 = vtanh.f32 %v306_v20  ;;  %v1289_v24 = vmul.f32 -1.442695, %v306_v20 }
 0x390   :  { %1355 = vpow2.f32 %v1287_v23 }
 0x391   :  { %1357 = vpow2.f32 %v1289_v24 }
 0x39a   :  { %v1352_v21 = vpop.eup %1351 }
 0x39b   :  { %275 = vrot.lane.b32.xlu0 %v1352_v21, %s1464_s16 }
 0x39c   :  { %v1354_v22 = vpop.eup %1353 }
 0x39d   :  { %316 = vrot.lane.b32.xlu1 %v1354_v22, %s1464_s16  ;;  %v1356_v25 = vpop.eup %1355 }
 0x39e   :  { %v1358_v26 = vpop.eup %1357  ;;  %v269_v27 = vadd.f32 1.0, %v1356_v25 }
 0x39f   :  { %v310_v28 = vadd.f32 1.0, %v1358_v26 }
 0x3a0   :  { %1359 = vrcp.f32 %v269_v27 }
 0x3a1   :  { %1361 = vrcp.f32 %v310_v28 }
 0x3ad   :  { %v1360_v29 = vpop.eup %1359 }
 0x3ae   :  { %v1362_v32 = vpop.eup %1361  ;;  %v273_v35 = vmul.f32 %v1360_v29, %v1626_v40 }
 0x3af   :  { %v314_v38 = vmul.f32 %v1362_v32, %v1629_v43 }
 0x40d   :  { %v276_v30 = vpop.permute.xlu0 %275 }
 0x40e   :  { %v278_v31 = vmul.f32 %v1360_v29, %v276_v30 }
 0x40f   :  { %v317_v33 = vpop.permute.xlu1 %316 }
 0x410   :  { %280 = vrot.lane.b32.xlu0 %v278_v31, %s1465_s17  ;;  %v319_v34 = vmul.f32 %v1362_v32, %v317_v33 }
 0x412   :  { %321 = vrot.lane.b32.xlu1 %v319_v34, %s1465_s17 }
 0x482   :  { %v281_v36 = vpop.permute.xlu0 %280 }
 0x483   :  { %v1678_v37 = vadd.f32 %v281_v36, %v273_v35 }
 0x484   :  { %v322_v39 = vpop.permute.xlu1 %321 }
 0x485   :  { %1363 = vtanh.f32 %v1678_v37  ;;  %v1682_v41 = vadd.f32 %v322_v39, %v314_v38 }
 0x487   :  { %1365 = vtanh.f32 %v1682_v41 }
 0x492   :  { %v1364_v42 = vpop.eup %1363 }
 0x493   :  { %286 = vrot.lane.b32.xlu0 %v1364_v42, %s1464_s16 }
 0x494   :  { %v1366_v44 = vpop.eup %1365 }
 0x495   :  { %327 = vrot.lane.b32.xlu1 %v1366_v44, %s1464_s16 }
 0x505   :  { %v287_v45 = vpop.permute.xlu0 %286 }
 0x506   :  { %v289_v40 = vmul.f32 %v1360_v29, %v287_v45 }
 0x507   :  { %v328_v47 = vpop.permute.xlu1 %327 }
 0x508   :  { %v297_v46 = vrot.slane %v289_v40, %v1634_v51  ;;  %v330_v48 = vmul.f32 %v1362_v32, %v328_v47  ;;  %v1299_v40 = vld [vmem:[%s1948_s0 + $0x10] sm:$0xf] }
 0x509   :  { %v620_v47 = vrot.slane %v1299_v40, 2 }
 0x50a   :  { %298 = vrot.lane.b32.xlu0 %v297_v46, %s1465_s17  ;;  %v338_v43 = vrot.slane %v330_v48, %v1634_v51  ;;  %v1298_v46 = vld [vmem:[%s1948_s0 + $0xc] sm:$0xf] }
 0x50c   :  { %339 = vrot.lane.b32.xlu1 %v338_v43, %s1464_s16 }
 0x57c   :  { %v299_v49 = vpop.permute.xlu0 %298 }
 0x57d   :  { %1288 = vst.msk [vmem:[%s1949_s2 + $0x2] sm:$0x3] %vm141_vm0, %v299_v49 }
 0x57e   :  { %v340_v50 = vpop.permute.xlu1 %339 }
 0x57f   :  { %1290 = vst.msk [vmem:[%s1949_s2 + $0xc] sm:$0x3] %vm183_vm1, %v340_v50  ;;  %v348_v52 = vsel %vm189_vm2, %v299_v49, %v340_v50 }
 0x580   :  { %1293 = vmatmul.mubr.msk.f32.vlgmr.msra.gmra.mxu0 %vm30_vm3, %v348_v52 }
 0x581   :  { %683 = vmatpush1.msra.mxu0 %v1490_v1  ;;  %730 = vmatprep.mubr.f32.mxu0 %v1463_v3 }
 0x582   :  { %684 = vmatprep.subr.mxu0 %v1495_v2 }
 0x583   :  { %685 = vmatpush1.msra.mxu0 %v1503_v4 }
 0x584   :  { %686 = vmatprep.subr.mxu0 %v1510_v5 }
 0x585   :  { %687 = vmatpush1.msra.mxu0 %v1517_v6 }
 0x586   :  { %688 = vmatprep.subr.mxu0 %v1524_v7 }
 0x587   :  { %689 = vmatpush1.msra.mxu0 %v1531_v8 }
 0x588   :  { %690 = vmatprep.subr.mxu0 %v1538_v9 }
 0x589   :  { %691 = vmatpush1.msra.mxu0 %v1545_v10 }
 0x58a   :  { %692 = vmatprep.subr.mxu0 %v1552_v11 }
 0x58b   :  { %693 = vmatpush1.msra.mxu0 %v1559_v12 }
 0x58c   :  { %694 = vmatprep.subr.mxu0 %v1566_v13 }
 0x58d   :  { %695 = vmatpush1.msra.mxu0 %v1573_v14 }
 0x58e   :  { %696 = vmatprep.subr.mxu0 %v1580_v15 }
 0x58f   :  { %697 = vmatpush1.msra.mxu0 %v1587_v16 }
 0x590   :  { %990 = vmatprep.subr.mxu0 %v1485_v0 }
 0x640   :  { %v418_v56 = vpop.f32.mrf.mxu0 }
 0x641   :  { %v423_v57 = vadd.f32 %v1291_v54, %v418_v56 }
 0x642   :  { %v420_v58 = vpop.f32.mrf.mxu0 }
 0x643   :  { %1367 = vtanh.f32 %v423_v57  ;;  %v464_v59 = vadd.f32 %v462_v55, %v420_v58  ;;  %v1294_v62 = vmul.f32 -1.442695, %v423_v57 }
 0x645   :  { %1369 = vtanh.f32 %v464_v59  ;;  %v1296_v63 = vmul.f32 -1.442695, %v464_v59 }
 0x646   :  { %1371 = vpow2.f32 %v1294_v62 }
 0x647   :  { %1373 = vpow2.f32 %v1296_v63 }
 0x650   :  { %v1368_v60 = vpop.eup %1367 }
 0x651   :  { %433 = vrot.lane.b32.xlu0 %v1368_v60, %s1464_s16 }
 0x652   :  { %v1370_v61 = vpop.eup %1369 }
 0x653   :  { %474 = vrot.lane.b32.xlu1 %v1370_v61, %s1464_s16  ;;  %v1372_v17 = vpop.eup %1371 }
 0x654   :  { %v1374_v18 = vpop.eup %1373  ;;  %v427_v19 = vadd.f32 1.0, %v1372_v17 }
 0x655   :  { %v468_v20 = vadd.f32 1.0, %v1374_v18 }
 0x656   :  { %1375 = vrcp.f32 %v427_v19 }
 0x657   :  { %1377 = vrcp.f32 %v468_v20 }
 0x663   :  { %v1376_v21 = vpop.eup %1375 }
 0x664   :  { %v1378_v24 = vpop.eup %1377  ;;  %v431_v27 = vmul.f32 %v1376_v21, %v1678_v37 }
 0x665   :  { %v472_v30 = vmul.f32 %v1378_v24, %v1682_v41 }
 0x6c3   :  { %v434_v22 = vpop.permute.xlu0 %433 }
 0x6c4   :  { %v436_v23 = vmul.f32 %v1376_v21, %v434_v22 }
 0x6c5   :  { %v475_v25 = vpop.permute.xlu1 %474 }
 0x6c6   :  { %438 = vrot.lane.b32.xlu0 %v436_v23, %s1465_s17  ;;  %v477_v26 = vmul.f32 %v1378_v24, %v475_v25 }
 0x6c8   :  { %479 = vrot.lane.b32.xlu1 %v477_v26, %s1465_s17 }
 0x738   :  { %v439_v28 = vpop.permute.xlu0 %438 }
 0x739   :  { %v1729_v29 = vadd.f32 %v439_v28, %v431_v27 }
 0x73a   :  { %v480_v31 = vpop.permute.xlu1 %479 }
 0x73b   :  { %1379 = vtanh.f32 %v1729_v29  ;;  %v1733_v32 = vadd.f32 %v480_v31, %v472_v30 }
 0x73d   :  { %1381 = vtanh.f32 %v1733_v32 }
 0x748   :  { %v1380_v33 = vpop.eup %1379 }
 0x749   :  { %444 = vrot.lane.b32.xlu0 %v1380_v33, %s1464_s16 }
 0x74a   :  { %v1382_v34 = vpop.eup %1381 }
 0x74b   :  { %485 = vrot.lane.b32.xlu1 %v1382_v34, %s1464_s16 }
 0x7bb   :  { %v445_v35 = vpop.permute.xlu0 %444 }
 0x7bc   :  { %v447_v36 = vmul.f32 %v1376_v21, %v445_v35  ;;  %v1306_v35 = vld [vmem:[%s1948_s0 + $0xc] sm:$0xf] }
 0x7bd   :  { %v486_v38 = vpop.permute.xlu1 %485 }
 0x7be   :  { %v455_v37 = vrot.slane %v447_v36, %v1634_v51  ;;  %v488_v39 = vmul.f32 %v1378_v24, %v486_v38  ;;  %v1305_v36 = vld [vmem:[%s1948_s0 + $0x10] sm:$0xf] }
 0x7c0   :  { %456 = vrot.lane.b32.xlu0 %v455_v37, %s1465_s17  ;;  %v496_v41 = vrot.slane %v488_v39, %v1634_v51  ;;  %v775_v37 = vrot.slane %v1306_v35, 2 }
 0x7c2   :  { %497 = vrot.lane.b32.xlu1 %v496_v41, %s1464_s16 }
 0x832   :  { %v457_v42 = vpop.permute.xlu0 %456 }
 0x833   :  { %1295 = vst.msk [vmem:[%s1949_s2 + $0x4] sm:$0x3] %vm141_vm0, %v457_v42 }
 0x834   :  { %v498_v44 = vpop.permute.xlu1 %497 }
 0x835   :  { %1297 = vst.msk [vmem:[%s1949_s2 + $0xa] sm:$0x3] %vm183_vm1, %v498_v44  ;;  %v506_v45 = vsel %vm189_vm2, %v457_v42, %v498_v44 }
 0x836   :  { %1300 = vmatmul.mubr.msk.f32.vlgmr.msra.gmra.mxu1 %vm30_vm3, %v506_v45 }
 0x837   :  { %837 = vmatpush1.msra.mxu1 %v1490_v1  ;;  %884 = vmatprep.mubr.f32.mxu1 %v1463_v3 }
 0x838   :  { %838 = vmatprep.subr.mxu1 %v1495_v2 }
 0x839   :  { %839 = vmatpush1.msra.mxu1 %v1503_v4 }
 0x83a   :  { %840 = vmatprep.subr.mxu1 %v1510_v5 }
 0x83b   :  { %841 = vmatpush1.msra.mxu1 %v1517_v6 }
 0x83c   :  { %842 = vmatprep.subr.mxu1 %v1524_v7 }
 0x83d   :  { %843 = vmatpush1.msra.mxu1 %v1531_v8 }
 0x83e   :  { %844 = vmatprep.subr.mxu1 %v1538_v9 }
 0x83f   :  { %845 = vmatpush1.msra.mxu1 %v1545_v10 }
 0x840   :  { %846 = vmatprep.subr.mxu1 %v1552_v11 }
 0x841   :  { %847 = vmatpush1.msra.mxu1 %v1559_v12 }
 0x842   :  { %848 = vmatprep.subr.mxu1 %v1566_v13 }
 0x843   :  { %849 = vmatpush1.msra.mxu1 %v1573_v14 }
 0x844   :  { %850 = vmatprep.subr.mxu1 %v1580_v15 }
 0x845   :  { %851 = vmatpush1.msra.mxu1 %v1587_v16 }
 0x846   :  { %1144 = vmatprep.subr.mxu1 %v1485_v0 }
 0x8f6   :  { %v576_v48 = vpop.f32.mrf.mxu1 }
 0x8f7   :  { %v581_v43 = vadd.f32 %v1298_v46, %v576_v48 }
 0x8f8   :  { %v578_v49 = vpop.f32.mrf.mxu1 }
 0x8f9   :  { %1383 = vtanh.f32 %v581_v43  ;;  %v622_v50 = vadd.f32 %v620_v47, %v578_v49  ;;  %v1301_v0 = vmul.f32 -1.442695, %v581_v43 }
 0x8fb   :  { %1385 = vtanh.f32 %v622_v50  ;;  %v1303_v54 = vmul.f32 -1.442695, %v622_v50 }
 0x8fc   :  { %1387 = vpow2.f32 %v1301_v0 }
 0x8fd   :  { %1389 = vpow2.f32 %v1303_v54 }
 0x906   :  { %v1384_v52 = vpop.eup %1383 }
 0x907   :  { %591 = vrot.lane.b32.xlu0 %v1384_v52, %s1464_s16 }
 0x908   :  { %v1386_v53 = vpop.eup %1385 }
 0x909   :  { %632 = vrot.lane.b32.xlu1 %v1386_v53, %s1464_s16  ;;  %v1388_v55 = vpop.eup %1387 }
 0x90a   :  { %v1390_v56 = vpop.eup %1389  ;;  %v585_v57 = vadd.f32 1.0, %v1388_v55 }
 0x90b   :  { %v626_v58 = vadd.f32 1.0, %v1390_v56 }
 0x90c   :  { %1391 = vrcp.f32 %v585_v57 }
 0x90d   :  { %1393 = vrcp.f32 %v626_v58 }
 0x919   :  { %v1392_v59 = vpop.eup %1391 }
 0x91a   :  { %v1394_v62 = vpop.eup %1393  ;;  %v589_v18 = vmul.f32 %v1392_v59, %v1729_v29 }
 0x91b   :  { %v630_v21 = vmul.f32 %v1394_v62, %v1733_v32 }
 0x979   :  { %v592_v60 = vpop.permute.xlu0 %591 }
 0x97a   :  { %v594_v61 = vmul.f32 %v1392_v59, %v592_v60 }
 0x97b   :  { %v633_v63 = vpop.permute.xlu1 %632 }
 0x97c   :  { %596 = vrot.lane.b32.xlu0 %v594_v61, %s1465_s17  ;;  %v635_v17 = vmul.f32 %v1394_v62, %v633_v63 }
 0x97e   :  { %637 = vrot.lane.b32.xlu1 %v635_v17, %s1465_s17 }
 0x9ee   :  { %v597_v19 = vpop.permute.xlu0 %596 }
 0x9ef   :  { %v1780_v20 = vadd.f32 %v597_v19, %v589_v18 }
 0x9f0   :  { %v638_v22 = vpop.permute.xlu1 %637 }
 0x9f1   :  { %1395 = vtanh.f32 %v1780_v20  ;;  %v1784_v23 = vadd.f32 %v638_v22, %v630_v21 }
 0x9f3   :  { %1397 = vtanh.f32 %v1784_v23 }
 0x9fe   :  { %v1396_v24 = vpop.eup %1395 }
 0x9ff   :  { %602 = vrot.lane.b32.xlu0 %v1396_v24, %s1464_s16 }
 0xa00   :  { %v1398_v25 = vpop.eup %1397 }
 0xa01   :  { %643 = vrot.lane.b32.xlu1 %v1398_v25, %s1464_s16 }
 0xa71   :  { %v603_v26 = vpop.permute.xlu0 %602 }
 0xa72   :  { %v605_v27 = vmul.f32 %v1392_v59, %v603_v26 }
 0xa73   :  { %v644_v29 = vpop.permute.xlu1 %643 }
 0xa74   :  { %v613_v28 = vrot.slane %v605_v27, %v1634_v51  ;;  %v646_v30 = vmul.f32 %v1394_v62, %v644_v29 }
 0xa76   :  { %614 = vrot.lane.b32.xlu0 %v613_v28, %s1465_s17  ;;  %v654_v31 = vrot.slane %v646_v30, %v1634_v51 }
 0xa78   :  { %655 = vrot.lane.b32.xlu1 %v654_v31, %s1464_s16 }
 0xae8   :  { %v615_v32 = vpop.permute.xlu0 %614 }
 0xae9   :  { %1302 = vst.msk [vmem:[%s1949_s2 + $0x6] sm:$0x3] %vm141_vm0, %v615_v32 }
 0xaea   :  { %v656_v33 = vpop.permute.xlu1 %655 }
 0xaeb   :  { %1304 = vst.msk [vmem:[%s1949_s2 + $0x8] sm:$0x3] %vm183_vm1, %v656_v33  ;;  %v662_v34 = vsel %vm189_vm2, %v615_v32, %v656_v33 }
 0xaec   :  { %1307 = vmatmul.mubr.msk.f32.vlgmr.msra.gmra.mxu0 %vm30_vm3, %v662_v34 }
 0xaed   :  { %991 = vmatpush1.msra.mxu0 %v1490_v1  ;;  %1038 = vmatprep.mubr.f32.mxu0 %v1463_v3 }
 0xaee   :  { %992 = vmatprep.subr.mxu0 %v1495_v2 }
 0xaef   :  { %993 = vmatpush1.msra.mxu0 %v1503_v4 }
 0xaf0   :  { %994 = vmatprep.subr.mxu0 %v1510_v5 }
 0xaf1   :  { %995 = vmatpush1.msra.mxu0 %v1517_v6 }
 0xaf2   :  { %996 = vmatprep.subr.mxu0 %v1524_v7 }
 0xaf3   :  { %997 = vmatpush1.msra.mxu0 %v1531_v8 }
 0xaf4   :  { %998 = vmatprep.subr.mxu0 %v1538_v9 }
 0xaf5   :  { %999 = vmatpush1.msra.mxu0 %v1545_v10 }
 0xaf6   :  { %1000 = vmatprep.subr.mxu0 %v1552_v11 }
 0xaf7   :  { %1001 = vmatpush1.msra.mxu0 %v1559_v12 }
 0xaf8   :  { %1002 = vmatprep.subr.mxu0 %v1566_v13 }
 0xaf9   :  { %1003 = vmatpush1.msra.mxu0 %v1573_v14 }
 0xafa   :  { %1004 = vmatprep.subr.mxu0 %v1580_v15 }
 0xafb   :  { %1005 = vmatpush1.msra.mxu0 %v1587_v16 }
 0xbac   :  { %v732_v38 = vpop.f32.mrf.mxu0 }
 0xbad   :  { %v737_v39 = vadd.f32 %v1305_v36, %v732_v38 }
 0xbae   :  { %v734_v41 = vpop.f32.mrf.mxu0 }
 0xbaf   :  { %1399 = vtanh.f32 %v737_v39  ;;  %v777_v42 = vadd.f32 %v775_v37, %v734_v41  ;;  %v1308_v40 = vmul.f32 -1.442695, %v737_v39 }
 0xbb1   :  { %1401 = vtanh.f32 %v777_v42  ;;  %v1310_v46 = vmul.f32 -1.442695, %v777_v42 }
 0xbb2   :  { %1403 = vpow2.f32 %v1308_v40 }
 0xbb3   :  { %1405 = vpow2.f32 %v1310_v46 }
 0xbbc   :  { %v1400_v44 = vpop.eup %1399 }
 0xbbd   :  { %747 = vrot.lane.b32.xlu0 %v1400_v44, %s1464_s16 }
 0xbbe   :  { %v1402_v45 = vpop.eup %1401 }
 0xbbf   :  { %787 = vrot.lane.b32.xlu1 %v1402_v45, %s1464_s16  ;;  %v1404_v47 = vpop.eup %1403 }
 0xbc0   :  { %v1406_v48 = vpop.eup %1405  ;;  %v741_v43 = vadd.f32 1.0, %v1404_v47 }
 0xbc1   :  { %v781_v49 = vadd.f32 1.0, %v1406_v48 }
 0xbc2   :  { %1407 = vrcp.f32 %v741_v43  ;;  %v1320_v43 = vld [vmem:[%s1948_s0 + $0x4] sm:$0xf] }
 0xbc3   :  { %1409 = vrcp.f32 %v781_v49  ;;  %v1319_v49 = vld [vmem:[%s1948_s0 + $0x18] sm:$0xf] }
 0xbcf   :  { %v1408_v50 = vpop.eup %1407 }
 0xbd0   :  { %v1410_v0 = vpop.eup %1409  ;;  %v745_v56 = vmul.f32 %v1408_v50, %v1780_v20 }
 0xbd1   :  { %v785_v59 = vmul.f32 %v1410_v0, %v1784_v23 }
 0xc2f   :  { %v748_v52 = vpop.permute.xlu0 %747 }
 0xc30   :  { %v750_v53 = vmul.f32 %v1408_v50, %v748_v52 }
 0xc31   :  { %v788_v54 = vpop.permute.xlu1 %787 }
 0xc32   :  { %752 = vrot.lane.b32.xlu0 %v750_v53, %s1465_s17  ;;  %v790_v55 = vmul.f32 %v1410_v0, %v788_v54 }
 0xc34   :  { %792 = vrot.lane.b32.xlu1 %v790_v55, %s1465_s17 }
 0xca4   :  { %v753_v57 = vpop.permute.xlu0 %752 }
 0xca5   :  { %v1830_v58 = vadd.f32 %v753_v57, %v745_v56 }
 0xca6   :  { %v793_v60 = vpop.permute.xlu1 %792 }
 0xca7   :  { %1411 = vtanh.f32 %v1830_v58  ;;  %v1834_v61 = vadd.f32 %v793_v60, %v785_v59 }
 0xca9   :  { %1413 = vtanh.f32 %v1834_v61 }
 0xcb4   :  { %v1412_v62 = vpop.eup %1411 }
 0xcb5   :  { %758 = vrot.lane.b32.xlu0 %v1412_v62, %s1464_s16 }
 0xcb6   :  { %v1414_v63 = vpop.eup %1413 }
 0xcb7   :  { %798 = vrot.lane.b32.xlu1 %v1414_v63, %s1464_s16 }
 0xd27   :  { %v759_v17 = vpop.permute.xlu0 %758 }
 0xd28   :  { %v761_v18 = vmul.f32 %v1408_v50, %v759_v17  ;;  %v1083_v50 = vrot.slane %v1320_v43, 2 }
 0xd29   :  { %v799_v20 = vpop.permute.xlu1 %798 }
 0xd2a   :  { %v769_v19 = vrot.slane %v761_v18, %v1634_v51  ;;  %v801_v21 = vmul.f32 %v1410_v0, %v799_v20 }
 0xd2c   :  { %770 = vrot.lane.b32.xlu0 %v769_v19, %s1465_s17  ;;  %v809_v22 = vrot.slane %v801_v21, %v1634_v51 }
 0xd2e   :  { %810 = vrot.lane.b32.xlu1 %v809_v22, %s1464_s16 }
 0xd9e   :  { %v771_v23 = vpop.permute.xlu0 %770 }
 0xd9f   :  { %1309 = vst.msk [vmem:[%s1949_s2 + $0x8] sm:$0x3] %vm141_vm0, %v771_v23 }
 0xda0   :  { %v811_v24 = vpop.permute.xlu1 %810 }
 0xda1   :  { %1311 = vst.msk [vmem:[%s1949_s2 + $0x6] sm:$0x3] %vm183_vm1, %v811_v24  ;;  %v816_v25 = vsel %vm189_vm2, %v771_v23, %v811_v24 }
 0xda2   :  { %1314 = vmatmul.mubr.msk.f32.vlgmr.msra.gmra.mxu1 %vm30_vm3, %v816_v25 }
 0xda3   :  { %1145 = vmatpush1.msra.mxu1 %v1490_v1  ;;  %1192 = vmatprep.mubr.f32.mxu1 %v1463_v3  ;;  %v1313_v1 = vld [vmem:[%s1948_s0 + $0x8] sm:$0xf] }
 0xda4   :  { %1146 = vmatprep.subr.mxu1 %v1495_v2  ;;  %v1312_v2 = vld [vmem:[%s1948_s0 + $0x14] sm:$0xf]  ;;  %v929_v3 = vrot.slane %v1313_v1, 2 }
 0xda5   :  { %1147 = vmatpush1.msra.mxu1 %v1503_v4 }
 0xda6   :  { %1148 = vmatprep.subr.mxu1 %v1510_v5 }
 0xda7   :  { %1149 = vmatpush1.msra.mxu1 %v1517_v6 }
 0xda8   :  { %1150 = vmatprep.subr.mxu1 %v1524_v7 }
 0xda9   :  { %1151 = vmatpush1.msra.mxu1 %v1531_v8 }
 0xdaa   :  { %1152 = vmatprep.subr.mxu1 %v1538_v9 }
 0xdab   :  { %1153 = vmatpush1.msra.mxu1 %v1545_v10 }
 0xdac   :  { %1154 = vmatprep.subr.mxu1 %v1552_v11 }
 0xdad   :  { %1155 = vmatpush1.msra.mxu1 %v1559_v12 }
 0xdae   :  { %1156 = vmatprep.subr.mxu1 %v1566_v13 }
 0xdaf   :  { %1157 = vmatpush1.msra.mxu1 %v1573_v14 }
 0xdb0   :  { %1158 = vmatprep.subr.mxu1 %v1580_v15 }
 0xdb1   :  { %1159 = vmatpush1.msra.mxu1 %v1587_v16 }
 0xe62   :  { %v886_v4 = vpop.f32.mrf.mxu1 }
 0xe63   :  { %v891_v5 = vadd.f32 %v1312_v2, %v886_v4 }
 0xe64   :  { %v888_v6 = vpop.f32.mrf.mxu1 }
 0xe65   :  { %1415 = vtanh.f32 %v891_v5  ;;  %v931_v7 = vadd.f32 %v929_v3, %v888_v6  ;;  %v1315_v10 = vmul.f32 -1.442695, %v891_v5 }
 0xe67   :  { %1417 = vtanh.f32 %v931_v7  ;;  %v1317_v11 = vmul.f32 -1.442695, %v931_v7 }
 0xe68   :  { %1419 = vpow2.f32 %v1315_v10 }
 0xe69   :  { %1421 = vpow2.f32 %v1317_v11 }
 0xe72   :  { %v1416_v8 = vpop.eup %1415 }
 0xe73   :  { %901 = vrot.lane.b32.xlu0 %v1416_v8, %s1464_s16 }
 0xe74   :  { %v1418_v9 = vpop.eup %1417 }
 0xe75   :  { %941 = vrot.lane.b32.xlu1 %v1418_v9, %s1464_s16  ;;  %v1420_v12 = vpop.eup %1419 }
 0xe76   :  { %v1422_v13 = vpop.eup %1421  ;;  %v895_v14 = vadd.f32 1.0, %v1420_v12 }
 0xe77   :  { %v935_v15 = vadd.f32 1.0, %v1422_v13 }
 0xe78   :  { %1423 = vrcp.f32 %v895_v14  ;;  %v1123_v14 = vld [vmem:[%s1948_s0] sm:$0xf] }
 0xe79   :  { %1425 = vrcp.f32 %v935_v15  ;;  %v1326_v15 = vld [vmem:[%s1948_s0 + $0x1c] sm:$0xf] }
 0xe85   :  { %v1424_v16 = vpop.eup %1423 }
 0xe86   :  { %v1426_v28 = vpop.eup %1425  ;;  %v899_v31 = vmul.f32 %v1424_v16, %v1830_v58 }
 0xe87   :  { %v939_v34 = vmul.f32 %v1426_v28, %v1834_v61 }
 0xee5   :  { %v902_v26 = vpop.permute.xlu0 %901 }
 0xee6   :  { %v904_v27 = vmul.f32 %v1424_v16, %v902_v26 }
 0xee7   :  { %v942_v29 = vpop.permute.xlu1 %941 }
 0xee8   :  { %906 = vrot.lane.b32.xlu0 %v904_v27, %s1465_s17  ;;  %v944_v30 = vmul.f32 %v1426_v28, %v942_v29 }
 0xeea   :  { %946 = vrot.lane.b32.xlu1 %v944_v30, %s1465_s17 }
 0xf5a   :  { %v907_v32 = vpop.permute.xlu0 %906 }
 0xf5b   :  { %v909_v33 = vadd.f32 %v907_v32, %v899_v31 }
 0xf5c   :  { %v947_v35 = vpop.permute.xlu1 %946 }
 0xf5d   :  { %1427 = vtanh.f32 %v909_v33  ;;  %v949_v36 = vadd.f32 %v947_v35, %v939_v34 }
 0xf5f   :  { %1429 = vtanh.f32 %v949_v36 }
 0xf6a   :  { %v1428_v37 = vpop.eup %1427 }
 0xf6b   :  { %912 = vrot.lane.b32.xlu0 %v1428_v37, %s1464_s16 }
 0xf6c   :  { %v1430_v38 = vpop.eup %1429 }
 0xf6d   :  { %952 = vrot.lane.b32.xlu1 %v1430_v38, %s1464_s16 }
 0xfdd   :  { %v913_v39 = vpop.permute.xlu0 %912 }
 0xfde   :  { %v915_v41 = vmul.f32 %v1424_v16, %v913_v39  ;;  %v1237_v16 = vrot.slane %v1123_v14, 2 }
 0xfdf   :  { %v953_v44 = vpop.permute.xlu1 %952 }
 0xfe0   :  { %v923_v42 = vrot.slane %v915_v41, %v1634_v51  ;;  %v955_v45 = vmul.f32 %v1426_v28, %v953_v44 }
 0xfe2   :  { %924 = vrot.lane.b32.xlu0 %v923_v42, %s1465_s17  ;;  %v963_v40 = vrot.slane %v955_v45, %v1634_v51 }
 0xfe4   :  { %964 = vrot.lane.b32.xlu1 %v963_v40, %s1464_s16 }
0x1054   :  { %v925_v46 = vpop.permute.xlu0 %924 }
0x1055   :  { %1316 = vst.msk [vmem:[%s1949_s2 + $0xa] sm:$0x3] %vm141_vm0, %v925_v46 }
0x1056   :  { %v965_v47 = vpop.permute.xlu1 %964 }
0x1057   :  { %1318 = vst.msk [vmem:[%s1949_s2 + $0x4] sm:$0x3] %vm183_vm1, %v965_v47  ;;  %v970_v48 = vsel %vm189_vm2, %v925_v46, %v965_v47 }
0x1058   :  { %1321 = vmatmul.mubr.msk.f32.vlgmr.msra.gmra.mxu0 %vm30_vm3, %v970_v48 }
0x1118   :  { %v1040_v52 = vpop.f32.mrf.mxu0 }
0x1119   :  { %v1045_v53 = vadd.f32 %v1319_v49, %v1040_v52 }
0x111a   :  { %v1042_v0 = vpop.f32.mrf.mxu0 }
0x111b   :  { %1431 = vtanh.f32 %v1045_v53  ;;  %v1085_v54 = vadd.f32 %v1083_v50, %v1042_v0  ;;  %v1322_v57 = vmul.f32 -1.442695, %v1045_v53 }
0x111d   :  { %1433 = vtanh.f32 %v1085_v54  ;;  %v1324_v58 = vmul.f32 -1.442695, %v1085_v54 }
0x111e   :  { %1435 = vpow2.f32 %v1322_v57 }
0x111f   :  { %1437 = vpow2.f32 %v1324_v58 }
0x1128   :  { %v1432_v55 = vpop.eup %1431 }
0x1129   :  { %1055 = vrot.lane.b32.xlu0 %v1432_v55, %s1464_s16 }
0x112a   :  { %v1434_v56 = vpop.eup %1433 }
0x112b   :  { %1095 = vrot.lane.b32.xlu1 %v1434_v56, %s1464_s16  ;;  %v1436_v59 = vpop.eup %1435 }
0x112c   :  { %v1438_v60 = vpop.eup %1437  ;;  %v1049_v61 = vadd.f32 1.0, %v1436_v59 }
0x112d   :  { %v1089_v62 = vadd.f32 1.0, %v1438_v60 }
0x112e   :  { %1439 = vrcp.f32 %v1049_v61 }
0x112f   :  { %1441 = vrcp.f32 %v1089_v62 }
0x113b   :  { %v1440_v63 = vpop.eup %1439 }
0x113c   :  { %v1442_v19 = vpop.eup %1441  ;;  %v1053_v22 = vmul.f32 %v1440_v63, %v909_v33 }
0x113d   :  { %v1093_v25 = vmul.f32 %v1442_v19, %v949_v36 }
0x119b   :  { %v1056_v17 = vpop.permute.xlu0 %1055 }
0x119c   :  { %v1058_v18 = vmul.f32 %v1440_v63, %v1056_v17 }
0x119d   :  { %v1096_v20 = vpop.permute.xlu1 %1095 }
0x119e   :  { %1060 = vrot.lane.b32.xlu0 %v1058_v18, %s1465_s17  ;;  %v1098_v21 = vmul.f32 %v1442_v19, %v1096_v20 }
0x11a0   :  { %1100 = vrot.lane.b32.xlu1 %v1098_v21, %s1465_s17 }
0x1210   :  { %v1061_v23 = vpop.permute.xlu0 %1060 }
0x1211   :  { %v1063_v24 = vadd.f32 %v1061_v23, %v1053_v22 }
0x1212   :  { %v1101_v1 = vpop.permute.xlu1 %1100 }
0x1213   :  { %1443 = vtanh.f32 %v1063_v24  ;;  %v1103_v2 = vadd.f32 %v1101_v1, %v1093_v25 }
0x1215   :  { %1445 = vtanh.f32 %v1103_v2 }
0x1220   :  { %v1444_v3 = vpop.eup %1443 }
0x1221   :  { %1066 = vrot.lane.b32.xlu0 %v1444_v3, %s1464_s16 }
0x1222   :  { %v1446_v4 = vpop.eup %1445 }
0x1223   :  { %1106 = vrot.lane.b32.xlu1 %v1446_v4, %s1464_s16 }
0x1293   :  { %v1067_v5 = vpop.permute.xlu0 %1066 }
0x1294   :  { %v1069_v6 = vmul.f32 %v1440_v63, %v1067_v5 }
0x1295   :  { %v1107_v8 = vpop.permute.xlu1 %1106 }
0x1296   :  { %v1077_v7 = vrot.slane %v1069_v6, %v1634_v51  ;;  %v1109_v9 = vmul.f32 %v1442_v19, %v1107_v8 }
0x1298   :  { %1078 = vrot.lane.b32.xlu0 %v1077_v7, %s1465_s17  ;;  %v1117_v10 = vrot.slane %v1109_v9, %v1634_v51 }
0x129a   :  { %1118 = vrot.lane.b32.xlu1 %v1117_v10, %s1464_s16 }
0x130a   :  { %v1079_v11 = vpop.permute.xlu0 %1078 }
0x130b   :  { %1323 = vst.msk [vmem:[%s1949_s2 + $0xc] sm:$0x3] %vm141_vm0, %v1079_v11 }
0x130c   :  { %v1119_v12 = vpop.permute.xlu1 %1118 }
0x130d   :  { %1325 = vst.msk [vmem:[%s1949_s2 + $0x2] sm:$0x3] %vm183_vm1, %v1119_v12  ;;  %v1124_v13 = vsel %vm189_vm2, %v1079_v11, %v1119_v12 }
0x130e   :  { %1327 = vmatmul.mubr.msk.f32.vlgmr.msra.gmra.mxu1 %vm30_vm3, %v1124_v13 }
0x13ce   :  { %v1194_v26 = vpop.f32.mrf.mxu1 }
0x13cf   :  { %v1199_v27 = vadd.f32 %v1326_v15, %v1194_v26 }
0x13d0   :  { %v1196_v28 = vpop.f32.mrf.mxu1 }
0x13d1   :  { %1447 = vtanh.f32 %v1199_v27  ;;  %v1239_v29 = vadd.f32 %v1237_v16, %v1196_v28  ;;  %v1328_v32 = vmul.f32 -1.442695, %v1199_v27 }
0x13d3   :  { %1449 = vtanh.f32 %v1239_v29  ;;  %v1330_v33 = vmul.f32 -1.442695, %v1239_v29 }
0x13d4   :  { %1451 = vpow2.f32 %v1328_v32 }
0x13d5   :  { %1453 = vpow2.f32 %v1330_v33 }
0x13de   :  { %v1448_v30 = vpop.eup %1447 }
0x13df   :  { %1209 = vrot.lane.b32.xlu0 %v1448_v30, %s1464_s16 }
0x13e0   :  { %v1450_v31 = vpop.eup %1449 }
0x13e1   :  { %1249 = vrot.lane.b32.xlu1 %v1450_v31, %s1464_s16  ;;  %v1452_v34 = vpop.eup %1451 }
0x13e2   :  { %v1454_v35 = vpop.eup %1453  ;;  %v1203_v36 = vadd.f32 1.0, %v1452_v34 }
0x13e3   :  { %v1243_v37 = vadd.f32 1.0, %v1454_v35 }
0x13e4   :  { %1455 = vrcp.f32 %v1203_v36 }
0x13e5   :  { %1457 = vrcp.f32 %v1243_v37 }
0x13f1   :  { %v1456_v38 = vpop.eup %1455 }
0x13f2   :  { %v1458_v42 = vpop.eup %1457  ;;  %v1207_v40 = vmul.f32 %v1456_v38, %v1063_v24 }
0x13f3   :  { %v1247_v48 = vmul.f32 %v1458_v42, %v1103_v2 }
0x1451   :  { %v1210_v39 = vpop.permute.xlu0 %1209 }
0x1452   :  { %v1212_v41 = vmul.f32 %v1456_v38, %v1210_v39 }
0x1453   :  { %v1250_v44 = vpop.permute.xlu1 %1249 }
0x1454   :  { %1214 = vrot.lane.b32.xlu0 %v1212_v41, %s1465_s17  ;;  %v1252_v45 = vmul.f32 %v1458_v42, %v1250_v44 }
0x1456   :  { %1254 = vrot.lane.b32.xlu1 %v1252_v45, %s1465_s17 }
0x14c6   :  { %v1215_v46 = vpop.permute.xlu0 %1214 }
0x14c7   :  { %v1217_v47 = vadd.f32 %v1215_v46, %v1207_v40 }
0x14c8   :  { %v1255_v43 = vpop.permute.xlu1 %1254 }
0x14c9   :  { %1459 = vtanh.f32 %v1217_v47  ;;  %v1257_v49 = vadd.f32 %v1255_v43, %v1247_v48 }
0x14cb   :  { %1461 = vtanh.f32 %v1257_v49 }
0x14d6   :  { %v1460_v50 = vpop.eup %1459 }
0x14d7   :  { %1220 = vrot.lane.b32.xlu0 %v1460_v50, %s1464_s16 }
0x14d8   :  { %v1462_v52 = vpop.eup %1461 }
0x14d9   :  { %1260 = vrot.lane.b32.xlu1 %v1462_v52, %s1464_s16 }
0x1549   :  { %v1221_v53 = vpop.permute.xlu0 %1220 }
0x154a   :  { %v1223_v0 = vmul.f32 %v1456_v38, %v1221_v53 }
0x154b   :  { %v1261_v55 = vpop.permute.xlu1 %1260 }
0x154c   :  { %v1231_v54 = vrot.slane %v1223_v0, %v1634_v51  ;;  %v1263_v56 = vmul.f32 %v1458_v42, %v1261_v55 }
0x154e   :  { %1232 = vrot.lane.b32.xlu0 %v1231_v54, %s1465_s17  ;;  %v1271_v57 = vrot.slane %v1263_v56, %v1634_v51 }
0x1550   :  { %1272 = vrot.lane.b32.xlu1 %v1271_v57, %s1464_s16 }
0x15c0   :  { %v1233_v58 = vpop.permute.xlu0 %1232 }
0x15c1   :  { %1329 = vst.msk [vmem:[%s1949_s2 + $0xe] sm:$0x3] %vm141_vm0, %v1233_v58 }
0x15c2   :  { %v1273_v59 = vpop.permute.xlu1 %1272 }
0x15c3   :  { %1275 = vst.msk [vmem:[%s1949_s2] sm:$0x3] %vm183_vm1, %v1273_v59 }

// kernel: forward.7
= control target key start
LH: loop header
LB: loop body
LE: loop exit
PB: predicated region body
PF: predicated region fallthrough
CT: control target
= control target key end

     0   :  { %12 = vsyncpa [#allocation3], 0  ;;  %s1449_s0 = inlined_call_operand.vmem [shape: f32[2,8,64], index: 0, kind: input, shape index: {}]   ;;  %s1450_s1 = inlined_call_operand.vmem [shape: f32[64,512], index: 1, kind: input, shape index: {}]   ;;  %s1451_s2 = inlined_call_operand.vmem [shape: f32[1,512], index: 2, kind: input, shape index: {}]   ;;  %s1452_s3 = inlined_call_operand.vmem [shape: f32[128,128], index: 3, kind: input, shape index: {}]   ;;  %s1453_s4 = inlined_call_operand.hbm [shape: f32[2,8,8], index: 4, kind: output, shape index: {0}]   ;;  %s1454_s5 = inlined_call_operand.hbm [shape: f32[2,8,16], index: 5, kind: output, shape index: {1}]   ;;  %s1455_s6 = inlined_call_operand.hbm [shape: f32[2,8,16], index: 6, kind: output, shape index: {2}]  }
   0x1   :  { %14 = vsyncpa [#allocation3 + $0x1], 0 }
   0x2   :  { %15 = vsyncpa [#allocation5], 0 }
   0x3   :  { %17 = vsyncpa [#allocation5 + $0x1], 0  ;;  %s1119_s21 = smov 0   ;;  %s1121_s22 = smov 0  }
   0x4   :  { %s1123_s23 = smov 0   ;;  %s1125_s24 = smov 0  }
   0x5 LB: > { %s1140_s25 = sadd.s32 4294967295, %s1077_s24   ;;  %s1456_s26 = sadd.s32 4294967294, %s1077_s24   ;;  %s1077_s24 = sphi %s1125_s24, %s1465_s24   ;;  %s1073_s23 = sphi %s1123_s23, %s1464_s23   ;;  %s1069_s22 = sphi %s1121_s22, %s1463_s22   ;;  %s1065_s21 = sphi %s1119_s21, %s1462_s21  }
   0x6   : > { %s1144_s27 = sadd.s32 1, %s1077_s24   ;;  %s119_s28 = sadd.s32 1, %s1073_s23 }
   0x7   : > { %s116_s29 = ssub.s32 %s1077_s24, %s1144_s27  ;;  %p129_p0 = scmp.ne.s32.totalorder %s1073_s23, %s1069_s22 }
   0x8   : > { %p117_p1 = scmp.eq.s32.totalorder %s116_s29, 0  ;;  %p130_p2 = scmp.eq.s32.totalorder %s1140_s25, 1 }
   0x9   : > { %p135_p3 = scmp.ne.s32.totalorder %s1069_s22, %s1065_s21  ;;  %p136_p4 = scmp.eq.s32.totalorder %s1456_s26, 1 }
   0xa   : > { %s1157_s30 = scalar_select %p117_p1, %s1073_s23, %s119_s28  }
   0xb   : > { %p1159_p5 = por %p130_p2, %p129_p0  ;;  %p1163_p6 = por %p136_p4, %p135_p3 }
   0xc   : > { %p824_p7 = scmp.ge.s32.totalorder %s1077_s24, 1  ;;  %p222_p8 = scmp.lt.s32.totalorder %s1077_s24, 3 }
   0xe   : > { %p223_p9 = pnand %p824_p7, %p222_p8 }
   0xf   : > { %p261_p10 = scmp.lt.s32.totalorder (!%p223_p9), %s1140_s25, 1  ;;  %s1457_s15 = sand.u32 (!%p223_p9), 1, %s1069_s22  }
  0x10   : > { %226 = sbr.rel (%p223_p9) target bundleno = 654 (0x28e), region = 36  ;;  %s1351_s16 = sshll.u32 (!%p223_p9), %s1457_s15, 3 }
  0x11   : > { %s253_s17 = scalar_lea.vmem (!%p223_p9), [#allocation4], %s1351_s16  ;;  %s656_s18 = sand.u32 (!%p223_p9), 1, %s1140_s25  }
  0x12   : > { %s1359_s19 = sshll.u32 (!%p223_p9), %s1140_s25, 7  ;;  %s688_s10 = sshll.u32 (!%p223_p9), %s253_s17, 4  ;;  %s689_s10 = int_to_ptr.vmem [resolvable:$true] %s688_s10 }
  0x13   : > { %s686_s29 = scalar_lea.hbm (!%p223_p9), %s1454_s5, %s1359_s19  ;;  %s1365_s12 = scalar_lea.sflag (!%p223_p9), [#allocation5], %s656_s18 }
  0x14   : > { %s961_s13 = scalar_lea.vmem (!%p223_p9), %s689_s10, 128 }
  0x15   : > { %v295_v0 = vld [vmem:[%s1450_s1 + $0xe8] sm:$0xff]  ;;  %v294_v1 = vld [vmem:[%s1450_s1 + $0xe0] sm:$0xff]  ;;  %v1079_v4 = vmov 0.0   ;;  %s262_s9 = scalar_select %p261_p10, %s1140_s25, 1  ;;  %v508_v9 = vld [vmem:[%s1452_s3 + $0x78] sm:$0xff]  ;;  %vm320_vm0 = vcmask 523264   ;;  %v300_v50 = vlaneseq }
  0x16   : > { %v291_v2 = vld [vmem:[%s1450_s1 + $0xc8] sm:$0xff]  ;;  %340 = vmatprep.subr.mxu1 %v295_v0  ;;  %v290_v3 = vld [vmem:[%s1450_s1 + $0xc0] sm:$0xff]  ;;  %388 = vmatprep.mubr.f32.mxu1 %v1079_v4  ;;  %v507_v10 = vld [vmem:[%s1452_s3 + $0x70] sm:$0xff]  ;;  %vm1080_vm1 = vmmov 0   ;;  %vm490_vm6 = vcmask 130048   ;;  %p962_p11 = scmp.ne.s32.totalorder %s689_s10, %s961_s13 }
  0x17   : > { %341 = vmatpush1.msra.mxu1 %v294_v1  ;;  %v287_v5 = vld [vmem:[%s1450_s1 + $0xa8] sm:$0xff]  ;;  %862 = vmatprep.subr.mxu0 %v1079_v4  ;;  %v286_v6 = vld [vmem:[%s1450_s1 + $0xa0] sm:$0xff]  ;;  %s828_s11 = sshll.u32 %s262_s9, 3  ;;  %v504_v22 = vld [vmem:[%s1452_s3 + $0x58] sm:$0xff]  ;;  %v301_v51 = vshrl.u32 %v300_v50, 7  ;;  %s260_s9 = scalar_lea.vmem [#allocation6], %s1351_s16 }
  0x18   : > { %342 = vmatprep.subr.mxu1 %v291_v2  ;;  %v283_v7 = vld [vmem:[%s1450_s1 + $0x88] sm:$0xff]  ;;  %v282_v8 = vld [vmem:[%s1450_s1 + $0x80] sm:$0xff]  ;;  %863 = vmatpush3.msra.mxu0 %v508_v9  ;;  %s264_s28 = scalar_lea.vmem %s1449_s0, %s828_s11  ;;  %v503_v23 = vld [vmem:[%s1452_s3 + $0x50] sm:$0xff]  ;;  %p963_p12 = pnand %p962_p11, %p1159_p5 }
  0x19   : > { %343 = vmatpush1.msra.mxu1 %v290_v3  ;;  %v279_v11 = vld [vmem:[%s1450_s1 + $0x68] sm:$0xff]  ;;  %v278_v12 = vld [vmem:[%s1450_s1 + $0x60] sm:$0xff]  ;;  %864 = vmatprep.subr.mxu0 %v1079_v4  ;;  %v297_v26 = vld [vmem:[%s1450_s1 + $0xf8] sm:$0xff]  ;;  %v302_v52 = vsub.s32 0, %v301_v51  ;;  %v306_v54 = vsub.s32 1, %v301_v51  ;;  %v314_v9 = vsub.s32 3, %v301_v51 }
  0x1a   : > { %344 = vmatprep.subr.mxu1 %v287_v5  ;;  %v506_v13 = vld [vmem:[%s1452_s3 + $0x68] sm:$0xff]  ;;  %865 = vmatpush3.msra.mxu0 %v507_v10  ;;  %v274_v15 = vld [vmem:[%s1450_s1 + $0x40] sm:$0xff]  ;;  %v500_v27 = vld [vmem:[%s1452_s3 + $0x38] sm:$0xff]  ;;  %p964_p13 = pneg %p963_p12  ;;  %s1081_s11 = smov [#allocation4]  }
  0x1b   : > { %345 = vmatpush1.msra.mxu1 %v286_v6  ;;  %v275_v14 = vld [vmem:[%s1450_s1 + $0x48] sm:$0xff]  ;;  %866 = vmatprep.subr.mxu0 %v1079_v4  ;;  %v505_v16 = vld [vmem:[%s1452_s3 + $0x60] sm:$0xff]  ;;  %v296_v28 = vld [vmem:[%s1450_s1 + $0xf0] sm:$0xff]  ;;  %s965_s14 = sshll.u32 %s1081_s11, 4  ;;  %s966_s14 = int_to_ptr.vmem [resolvable:$false] %s965_s14 }
  0x1c   : > { %346 = vmatprep.subr.mxu1 %v283_v7  ;;  %v271_v17 = vld [vmem:[%s1450_s1 + $0x28] sm:$0xff]  ;;  %867 = vmatpush3.msra.mxu0 %v506_v13  ;;  %v270_v18 = vld [vmem:[%s1450_s1 + $0x20] sm:$0xff]  ;;  %v293_v29 = vld [vmem:[%s1450_s1 + $0xd8] sm:$0xff]  ;;  %s967_s26 = scalar_lea.vmem %s966_s14, 256  ;;  %p968_p0 = scmp.lt.s32.totalorder %s689_s10, %s966_s14 }
  0x1d   : > { %347 = vmatpush1.msra.mxu1 %v282_v8  ;;  %868 = vmatprep.subr.mxu0 %v1079_v4  ;;  %v267_v19 = vld [vmem:[%s1450_s1 + $0x8] sm:$0xff]  ;;  %v266_v20 = vld [vmem:[%s1450_s1] sm:$0xff]  ;;  %v499_v30 = vld [vmem:[%s1452_s3 + $0x30] sm:$0xff]  ;;  %v310_v8 = vsub.s32 2, %v301_v51  ;;  %p969_p1 = scmp.lt.s32.totalorder %s967_s26, %s961_s13 }
  0x1e   : > { %348 = vmatprep.subr.mxu1 %v279_v11  ;;  %869 = vmatpush3.msra.mxu0 %v505_v16  ;;  %v1240_v21 = vld [vmem:[%s264_s28] sm:$0xff]  ;;  %v502_v24 = vld [vmem:[%s1452_s3 + $0x48] sm:$0xff]  ;;  %v292_v31 = vld [vmem:[%s1450_s1 + $0xd0] sm:$0xff] }
  0x1f   : > { %349 = vmatpush1.msra.mxu1 %v278_v12  ;;  %870 = vmatprep.subr.mxu0 %v1079_v4  ;;  %v501_v25 = vld [vmem:[%s1452_s3 + $0x40] sm:$0xff]  ;;  %v289_v32 = vld [vmem:[%s1450_s1 + $0xb8] sm:$0xff]  ;;  %v498_v33 = vld [vmem:[%s1452_s3 + $0x28] sm:$0xff]  ;;  %p970_p2 = por %p969_p1, %p968_p0 }
  0x20   : > { %350 = vmatprep.subr.mxu1 %v275_v14  ;;  %871 = vmatpush3.msra.mxu0 %v504_v22  ;;  %v288_v34 = vld [vmem:[%s1450_s1 + $0xb0] sm:$0xff]  ;;  %v285_v35 = vld [vmem:[%s1450_s1 + $0x98] sm:$0xff]  ;;  %v497_v36 = vld [vmem:[%s1452_s3 + $0x20] sm:$0xff] }
  0x21   : > { %351 = vmatpush1.msra.mxu1 %v274_v15  ;;  %872 = vmatprep.subr.mxu0 %v1079_v4  ;;  %v284_v37 = vld [vmem:[%s1450_s1 + $0x90] sm:$0xff]  ;;  %v281_v38 = vld [vmem:[%s1450_s1 + $0x78] sm:$0xff]  ;;  %v494_v45 = vld [vmem:[%s1452_s3 + $0x8] sm:$0xff]  ;;  %p971_p3 = pnand %p970_p2, %p964_p13 }
  0x22   : > { %352 = vmatprep.subr.mxu1 %v271_v17  ;;  %873 = vmatpush3.msra.mxu0 %v503_v23  ;;  %v496_v39 = vld [vmem:[%s1452_s3 + $0x18] sm:$0xff]  ;;  %v280_v40 = vld [vmem:[%s1450_s1 + $0x70] sm:$0xff]  ;;  %v493_v48 = vld [vmem:[%s1452_s3] sm:$0xff] }
  0x23   : > { %353 = vmatpush1.msra.mxu1 %v270_v18  ;;  %874 = vmatprep.subr.mxu0 %v1079_v4  ;;  %v277_v41 = vld [vmem:[%s1450_s1 + $0x58] sm:$0xff]  ;;  %v495_v42 = vld [vmem:[%s1452_s3 + $0x10] sm:$0xff]  ;;  %v298_v53 = vld [vmem:[%s1451_s2] sm:$0xf] }
  0x24   : > { %354 = vmatprep.subr.mxu1 %v267_v19  ;;  %875 = vmatpush3.msra.mxu0 %v502_v24  ;;  %v276_v43 = vld [vmem:[%s1450_s1 + $0x50] sm:$0xff]  ;;  %v273_v44 = vld [vmem:[%s1450_s1 + $0x38] sm:$0xff]  ;;  %v303_v55 = vrot.slane %v298_v53, %v302_v52  ;;  %v307_v56 = vrot.slane %v298_v53, %v306_v54  ;;  %v311_v12 = vrot.slane %v298_v53, %v310_v8 }
  0x25   : > { %355 = vmatpush1.msra.mxu1 %v266_v20  ;;  %876 = vmatprep.subr.mxu0 %v1079_v4  ;;  %v272_v46 = vld [vmem:[%s1450_s1 + $0x30] sm:$0xff]  ;;  %v269_v47 = vld [vmem:[%s1450_s1 + $0x18] sm:$0xff]  ;;  %v315_v13 = vrot.slane %v298_v53, %v314_v9 }
  0x26   : > { %829 = vmatmul.mubr.msk.f32.vlgmr.msra.gmra.mxu1 %vm320_vm0, %v1240_v21  ;;  %877 = vmatpush3.msra.mxu0 %v501_v25  ;;  %v268_v49 = vld [vmem:[%s1450_s1 + $0x10] sm:$0xff] }
  0x27   : > { %459 = vmatprep.mubr.f32.mxu1 %v1079_v4  ;;  %878 = vmatprep.subr.mxu0 %v1079_v4 }
  0x28   : > { %411 = vmatprep.subr.mxu1 %v297_v26  ;;  %879 = vmatpush3.msra.mxu0 %v500_v27 }
  0x29   : > { %412 = vmatpush1.msra.mxu1 %v296_v28  ;;  %880 = vmatprep.subr.mxu0 %v1079_v4 }
  0x2a   : > { %413 = vmatprep.subr.mxu1 %v293_v29  ;;  %881 = vmatpush3.msra.mxu0 %v499_v30 }
  0x2b   : > { %414 = vmatpush1.msra.mxu1 %v292_v31  ;;  %882 = vmatprep.subr.mxu0 %v1079_v4 }
  0x2c   : > { %415 = vmatprep.subr.mxu1 %v289_v32  ;;  %883 = vmatpush3.msra.mxu0 %v498_v33 }
  0x2d   : > { %416 = vmatpush1.msra.mxu1 %v288_v34  ;;  %884 = vmatprep.subr.mxu0 %v1079_v4 }
  0x2e   : > { %417 = vmatprep.subr.mxu1 %v285_v35  ;;  %885 = vmatpush3.msra.mxu0 %v497_v36 }
  0x2f   : > { %418 = vmatpush1.msra.mxu1 %v284_v37  ;;  %886 = vmatprep.subr.mxu0 %v1079_v4 }
  0x30   : > { %419 = vmatprep.subr.mxu1 %v281_v38  ;;  %887 = vmatpush3.msra.mxu0 %v496_v39 }
  0x31   : > { %420 = vmatpush1.msra.mxu1 %v280_v40  ;;  %888 = vmatprep.subr.mxu0 %v1079_v4 }
  0x32   : > { %421 = vmatprep.subr.mxu1 %v277_v41  ;;  %889 = vmatpush3.msra.mxu0 %v495_v42 }
  0x33   : > { %422 = vmatpush1.msra.mxu1 %v276_v43  ;;  %890 = vmatprep.subr.mxu0 %v1079_v4 }
  0x34   : > { %423 = vmatprep.subr.mxu1 %v273_v44  ;;  %891 = vmatpush3.msra.mxu0 %v494_v45 }
  0x35   : > { %424 = vmatpush1.msra.mxu1 %v272_v46  ;;  %892 = vmatprep.subr.mxu0 %v1079_v4 }
  0x36   : > { %425 = vmatprep.subr.mxu1 %v269_v47  ;;  %893 = vmatpush3.msra.mxu0 %v493_v48 }
  0x37   : > { %894 = vmatprep.mubr.msk.f32.mxu0 %vm1080_vm1, %v1079_v4  ;;  %426 = vmatpush1.msra.mxu1 %v268_v49 }
  0x38   : > { %897 = vmatprep.subr.mxu1 %v1079_v4  ;;  %830 = vmatmul.mubr.msk.f32.vlgmr.msra.gmra.mxu1 %vm320_vm0, %v1240_v21 }
  0x39   : > { %899 = vmatprep.mubr.msk.f32.mxu1 %vm1080_vm1, %v1079_v4 }
  0xe6   : > { %v390_v57 = vpop.f32.mrf.mxu1 }
  0xe7   : > { %v391_v58 = vadd.f32 %v390_v57, %v303_v55 }
  0xe8   : > { %v392_v59 = vpop.f32.mrf.mxu1 }
  0xe9   : > { %v470_v60 = vmin.f32 %v391_v58, 0.0  ;;  %v393_v61 = vadd.f32 %v392_v59, %v307_v56  ;;  %vm466_vm2 = vcmp.gt.f32.partialorder %v391_v58, 0.0 }
  0xeb   : > { %v474_v62 = vmul.f32 1.442695, %v470_v60  ;;  %v471_v63 = vmin.f32 %v393_v61, 0.0  ;;  %vm467_vm3 = vcmp.gt.f32.partialorder %v393_v61, 0.0 }
  0xed   : > { %953 = vpow2.f32 %v474_v62  ;;  %v476_v0 = vmul.f32 1.442695, %v471_v63 }
  0xef   : > { %955 = vpow2.f32 %v476_v0 }
  0xf8   : > { %v461_v11 = vpop.f32.mrf.mxu1 }
  0xf9   : > { %v462_v15 = vadd.f32 %v461_v11, %v311_v12 }
  0xfa   : > { %v954_v1 = vpop.eup %953  ;;  %v463_v14 = vpop.f32.mrf.mxu1 }
  0xfb   : > { %v831_v2 = vadd.f32 -1.0, %v954_v1  ;;  %v464_v16 = vadd.f32 %v463_v14, %v315_v13  ;;  %v472_v17 = vmin.f32 %v462_v15, 0.0  ;;  %vm468_vm4 = vcmp.gt.f32.partialorder %v462_v15, 0.0 }
  0xfc   : > { %v956_v3 = vpop.eup %955 }
  0xfd   : > { %v486_v4 = vsel %vm466_vm2, %v391_v58, %v831_v2  ;;  %v832_v5 = vadd.f32 -1.0, %v956_v3  ;;  %v473_v18 = vmin.f32 %v464_v16, 0.0  ;;  %v478_v19 = vmul.f32 1.442695, %v472_v17 }
  0xfe   : > { %895 = vmatmul.mubr.f32.vlgmr.msra.gmra.mxu0 %v486_v4  ;;  %vm469_vm5 = vcmp.gt.f32.partialorder %v464_v16, 0.0 }
  0xff   : > { %v487_v6 = vsel %vm467_vm3, %v393_v61, %v832_v5  ;;  %v480_v20 = vmul.f32 1.442695, %v473_v18  ;;  %957 = vpow2.f32 %v478_v19 }
 0x100   : > { %898 = vmatpush3.xpose.msra.mxu1 %v487_v6 }
 0x101   : > { %959 = vpow2.f32 %v480_v20 }
 0x10c   : > { %v958_v21 = vpop.eup %957 }
 0x10d   : > { %v833_v23 = vadd.f32 -1.0, %v958_v21 }
 0x10e   : > { %v960_v22 = vpop.eup %959 }
 0x10f   : > { %v834_v24 = vadd.f32 -1.0, %v960_v22  ;;  %v488_v25 = vsel %vm468_vm4, %v462_v15, %v833_v23 }
 0x110   : > { %491 = vst.msk [vmem:[%s253_s17] sm:$0xff] %vm490_vm6, %v488_v25 }
 0x111   : > { %v489_v26 = vsel %vm469_vm5, %v464_v16, %v834_v24 }
 0x112   : > { %492 = vst.msk [vmem:[%s260_s9] sm:$0xff] %vm490_vm6, %v489_v26 }
 0x1be   : > { %v575_v7 = vpop.f32.mrf.mxu0 }
 0x1bf   : > { %900 = vmatmul.mubr.f32.vlgmr.msra.gmra.mxu1 %v575_v7 }
 0x1c0   : > { %v896_v10 = vpop.f32.mrf.mxu0 }
 0x1c1   : > { %974 = shalt.err (!%p971_p3)
}
 0x1c2   : > { %s975_s25 = scalar_lea.hbm %s686_s29, 128  ;;  %s979_s20 = scalar_lea.hbm %s1454_s5, 256 }
 0x1c3   : > { %p976_p4 = scmp.ne.s32.totalorder %s686_s29, %s975_s25  ;;  %p980_p9 = scmp.lt.s32.totalorder %s686_s29, %s1454_s5 }
 0x1c4   : > { %p981_p10 = scmp.lt.s32.totalorder %s979_s20, %s975_s25 }
 0x1c5   : > { %p977_p7 = pnand %p976_p4, %p1159_p5 }
 0x1c6   : > { %p982_p11 = por %p981_p10, %p980_p9 }
 0x1c7   : > { %p978_p8 = pneg %p977_p7 }
 0x1c9   : > { %p983_p12 = pnand %p982_p11, %p978_p8 }
 0x1cb   : > { %986 = shalt.err (!%p983_p12)
}
 0x1cc   : > { %903 = dma.vmem_to_hbm [thread:$0]  (%p1159_p5), %s689_s10, 128, %s686_s29, %s1365_s12  }
 0x1cd   : > { %s699_s11 = scalar_lea.hbm %s1455_s6, %s1359_s19  ;;  %s701_s14 = sshll.u32 %s260_s9, 4  ;;  %s702_s14 = int_to_ptr.vmem [resolvable:$true] %s701_s14 }
 0x1ce   : > { %s987_s15 = scalar_lea.vmem %s702_s14, 128  ;;  %s1082_s25 = smov [#allocation6]  }
 0x1cf   : > { %p988_p13 = scmp.ne.s32.totalorder %s702_s14, %s987_s15  ;;  %s991_s17 = sshll.u32 %s1082_s25, 4  ;;  %s992_s17 = int_to_ptr.vmem [resolvable:$false] %s991_s17 }
 0x1d0   : > { %s993_s18 = scalar_lea.vmem %s992_s17, 256  ;;  %p994_p2 = scmp.lt.s32.totalorder %s702_s14, %s992_s17 }
 0x1d1   : > { %p989_p0 = pnand %p988_p13, %p1159_p5  ;;  %p995_p3 = scmp.lt.s32.totalorder %s993_s18, %s987_s15 }
 0x1d3   : > { %p990_p1 = pneg %p989_p0  ;;  %p996_p4 = por %p995_p3, %p994_p2 }
 0x1d5   : > { %p997_p7 = pnand %p996_p4, %p990_p1 }
 0x1d7   : > { %1000 = shalt.err (!%p997_p7)
}
 0x1d8   : > { %s1001_s29 = scalar_lea.hbm %s699_s11, 128  ;;  %s1005_s20 = scalar_lea.hbm %s1455_s6, 256 }
 0x1d9   : > { %p1002_p8 = scmp.ne.s32.totalorder %s699_s11, %s1001_s29  ;;  %p1006_p11 = scmp.lt.s32.totalorder %s699_s11, %s1455_s6 }
 0x1da   : > { %p1007_p12 = scmp.lt.s32.totalorder %s1005_s20, %s1001_s29 }
 0x1db   : > { %p1003_p9 = pnand %p1002_p8, %p1159_p5 }
 0x1dc   : > { %p1008_p13 = por %p1007_p12, %p1006_p11 }
 0x1dd   : > { %p1004_p10 = pneg %p1003_p9 }
 0x1df   : > { %p1009_p0 = pnand %p1008_p13, %p1004_p10 }
 0x1e1   : > { %1012 = shalt.err (!%p1009_p0)
}
 0x1e2   : > { %904 = dma.vmem_to_hbm [thread:$0]  (%p1159_p5), %s702_s14, 128, %s699_s11, %s1365_s12   ;;  %vm649_vm7 = vcmask 64512  }
 0x1e3   : > { %s246_s13 = scalar_lea.vmem [#allocation2], %s1351_s16  ;;  %s1404_s18 = scalar_lea.hbm %s1453_s4, %s1359_s19 }
 0x1e4   : > { %s675_s15 = sshll.u32 %s246_s13, 4  ;;  %s1460_s29 = sand.u32 1, %s1069_s22   ;;  %s1406_s15 = int_to_ptr.vmem [resolvable:$true] %s675_s15 }
 0x1e5   : > { %s652_s9 = scalar_lea.sflag [#allocation3], %s1460_s29  ;;  %s1013_s10 = scalar_lea.vmem %s1406_s15, 128 }
 0x1e6   : > { %p1014_p1 = scmp.ne.s32.totalorder %s1406_s15, %s1013_s10  ;;  %s1083_s16 = smov [#allocation2]  }
 0x1e7   : > { %s1017_s12 = sshll.u32 %s1083_s16, 4  ;;  %s1018_s12 = int_to_ptr.vmem [resolvable:$false] %s1017_s12 }
 0x1e8   : > { %p1015_p2 = pnand %p1014_p1, %p1159_p5  ;;  %s1019_s19 = scalar_lea.vmem %s1018_s12, 256 }
 0x1e9   : > { %p1020_p4 = scmp.lt.s32.totalorder %s1406_s15, %s1018_s12  ;;  %p1021_p7 = scmp.lt.s32.totalorder %s1019_s19, %s1013_s10 }
 0x1ea   : > { %p1016_p3 = pneg %p1015_p2 }
 0x1eb   : > { %p1022_p8 = por %p1021_p7, %p1020_p4 }
 0x1ed   : > { %p1023_p9 = pnand %p1022_p8, %p1016_p3 }
 0x27f   : > { %v645_v27 = vpop.f32.mrf.mxu1 }
 0x280   : > { %650 = vst.msk [vmem:[%s246_s13] sm:$0xff] %vm649_vm7, %v645_v27 }
 0x281   : > { %v901_v28 = vpop.f32.mrf.mxu1 }
 0x282   : > { %1026 = shalt.err (!%p1023_p9)
}
 0x283   : > { %s1027_s11 = scalar_lea.hbm %s1404_s18, 128  ;;  %s1031_s28 = scalar_lea.hbm %s1453_s4, 256 }
 0x284   : > { %p1028_p10 = scmp.ne.s32.totalorder %s1404_s18, %s1027_s11  ;;  %p1032_p13 = scmp.lt.s32.totalorder %s1404_s18, %s1453_s4 }
 0x285   : > { %p1033_p0 = scmp.lt.s32.totalorder %s1031_s28, %s1027_s11 }
 0x286   : > { %p1029_p11 = pnand %p1028_p10, %p1159_p5 }
 0x287   : > { %p1034_p1 = por %p1033_p0, %p1032_p13 }
 0x288   : > { %p1030_p12 = pneg %p1029_p11 }
 0x28a   : > { %p1035_p2 = pnand %p1034_p1, %p1030_p12 }
 0x28c   : > { %1038 = shalt.err (!%p1035_p2)
}
 0x28d   : > { %902 = dma.vmem_to_hbm [thread:$0]  (%p1159_p5), %s1406_s15, 128, %s1404_s18, %s652_s9  }
 0x28e PF: > { %p918_p3 = scmp.ge.s32.totalorder %s1077_s24, 2  ;;  %s713_s25 = sand.u32 1, %s1065_s21  }
 0x28f   : > { %s714_s17 = scalar_lea.sflag [#allocation3], %s713_s25 }
 0x290   : > { %p909_p4 = pnand %p918_p3, %p1163_p6 }
 0x292   : > { %p910_p7 = pneg %p909_p4 }
 0x294   : > { %1056 = dma.done.wait (%p910_p7), %s714_s17, 128  }
 0x295   : > { %1058 = vsyncadd (%p910_p7), %s714_s17, 4294967168  ;;  %s1461_s29 = sadd.s32 4294967294, %s1077_s24  }
 0x296   : > { %s722_s10 = sand.u32 1, %s1461_s29  }
 0x297   : > { %s723_s16 = scalar_lea.sflag [#allocation5], %s722_s10 }
 0x298   : > { %1060 = dma.done.wait (%p910_p7), %s723_s16, 256  }
 0x299   : > { %1062 = vsyncadd (%p910_p7), %s723_s16, 4294967040  ;;  %p20_p5 = scmp.ge.s32.totalorder %s1144_s27, 4   ;;  %s1462_s21 = smov %s1069_s22 }
 0x29a   : > { %s1463_s22 = smov %s1073_s23  ;;  %s1464_s23 = smov %s1157_s30 }
 0x29b   : > { %s1465_s24 = smov %s1144_s27  ;;  %22 = sbr.rel (!%p20_p5) target bundleno = 5 (0x5), region = 103 }
 0x2a0   :  { %737 = vsyncpa [#allocation3], 1 }
 0x2a1   :  { %739 = vsyncpa [#allocation3 + $0x1], 1 }
 0x2a2   :  { %740 = vsyncpa [#allocation5], 1 }
 0x2a3   :  { %742 = vsyncpa [#allocation5 + $0x1], 1 }

</bundles_post_ra>
